<compile_context>
chip_gen: v7x
topology: tpu7x:2x2x1
jax: 0.10.0
libtpu: 0.0.40
codegen_flags: <defaults>
</compile_context>

<pallas_src>
import numpy as np
import jax
import jax.numpy as jnp
from jax import lax
from jax.experimental import pallas as pl
from jax.experimental.pallas import tpu as pltpu

IMG_SIZE = 32
CHANNELS = [3, 16, 32, 64, 128]
N_CLASSES = 10
LANES = 128
LEAKY_SLOPE = 0.2


def _make_geom():
    # Per conv block: (H_in, lane-padded W_in*C_in, H_out, W_out*C_out).
    geom, h = [], IMG_SIZE
    for i in range(4):
        cin, cout = CHANNELS[i], CHANNELS[i + 1]
        wc = h * cin
        wc_pad = -(-wc // LANES) * LANES
        geom.append((h, wc_pad, h // 2, (h // 2) * cout))
        h //= 2
    return geom, h


GEOM, DS = _make_geom()            # DS = 2 (final spatial size)
FEAT = CHANNELS[-1] * DS * DS      # 512


# ----------------------------- Pallas kernel --------------------------------

def _conv_block(x, cm_ref, vec_ref, h_in, wc, h_out, owc):
    """Conv2d(3x3, s=2, p=1) + bias + LeakyReLU(0.2) + folded eval BatchNorm.

    x:       [h_in, wc]    activation slab, lane index = w*Cin + cin
    cm_ref:  [3*wc, owc]   banded conv matrices, stacked kh-major
    vec_ref: [3, owc]      rows: bias, bn_scale, bn_shift (tiled per (ow, cout) lane)
    returns  [h_out, owc]  lane index = ow*Cout + cout
    """
    oh = lax.broadcasted_iota(jnp.int32, (h_out, h_in), 0)
    h = lax.broadcasted_iota(jnp.int32, (h_out, h_in), 1)
    acc = jnp.zeros((h_out, owc), jnp.float32)
    for kh in range(3):
        # Output row oh reads input row 2*oh + kh - 1 (zero when out of range).
        # Row gather + zero padding expressed as a tiny 0/1 selection matmul.
        sel = (h == 2 * oh + (kh - 1)).astype(jnp.float32)               # [h_out, h_in]
        xk = jnp.dot(sel, x, preferred_element_type=jnp.float32)         # [h_out, wc]
        acc = acc + jnp.dot(xk, cm_ref[kh * wc:(kh + 1) * wc, :],
                            preferred_element_type=jnp.float32)          # [h_out, owc]
    acc = acc + vec_ref[0:1, :]                                          # conv bias
    acc = jnp.where(acc >= 0.0, acc, LEAKY_SLOPE * acc)                  # LeakyReLU(0.2)
    # Dropout2d(0.25) is the identity at inference time.
    # TODO(synk): training-mode Dropout2d masks / BatchNorm batch statistics are not modeled.
    return acc * vec_ref[1:2, :] + vec_ref[2:3, :]                       # eval BatchNorm (folded)


def discriminator_kernel(img_ref, cm1, v1, cm2, v2, cm3, v3, cm4, v4,
                         wh_ref, bh_ref, out_ref):
    x = img_ref[...]                                                     # [32, 128] one image
    for (cm, vec), (h_in, wc, h_out, owc) in zip(
            ((cm1, v1), (cm2, v2), (cm3, v3), (cm4, v4)), GEOM):
        x = _conv_block(x, cm, vec, h_in, wc, h_out, owc)
    # x: [2, 256] = [h4, w4*128 + c]  — the full 512-dim feature map of this image.
    half = DS * CHANNELS[-1]                                             # 256
    logits = (jnp.dot(x[0:1, :], wh_ref[0:half, :], preferred_element_type=jnp.float32)
              + jnp.dot(x[1:2, :], wh_ref[half:2 * half, :], preferred_element_type=jnp.float32)
              + bh_ref[...])                                             # [1, 128]
    # lane 0 = adversarial logit -> sigmoid ; lanes 1..10 = class logits -> softmax.
    lane = lax.broadcasted_iota(jnp.int32, (1, LANES), 1)
    is_cls = (lane >= 1) & (lane <= N_CLASSES)
    m = jnp.max(jnp.where(is_cls, logits, -jnp.inf), axis=-1, keepdims=True)
    e = jnp.where(is_cls, jnp.exp(logits - m), 0.0)
    inv_den = pl.reciprocal(jnp.sum(e, axis=-1, keepdims=True), approx=True)
    sig = pl.reciprocal(1.0 + jnp.exp(-logits), approx=True)             # sigmoid via EUP exp + rcp
    out_ref[0] = jnp.where(lane == 0, sig, e * inv_den)                  # lane-dense [1, 128] store


# ------------------------------ JAX wrapper ----------------------------------

def _const_spec(arr):
    nd = arr.ndim
    return pl.BlockSpec(arr.shape, lambda b, _nd=nd: (0,) * _nd)


@jax.jit
def discriminator_forward(img_nchw, ops):
    B = img_nchw.shape[0]
    # NCHW -> lane-dense per-row slab [B*32, 128]: rows = (b, h), lanes = (w, c), zero pad 96->128.
    x = jnp.transpose(img_nchw, (0, 2, 3, 1)).reshape(B, IMG_SIZE, IMG_SIZE * CHANNELS[0])
    x = jnp.pad(x, ((0, 0), (0, 0), (0, LANES - IMG_SIZE * CHANNELS[0])))
    x = x.reshape(B * IMG_SIZE, LANES)

    consts = (ops["cm1"], ops["vec1"], ops["cm2"], ops["vec2"],
              ops["cm3"], ops["vec3"], ops["cm4"], ops["vec4"],
              ops["wh"], ops["bh"])

    out = pl.pallas_call(
        discriminator_kernel,
        out_shape=jax.ShapeDtypeStruct((B, 1, LANES), jnp.float32),
        grid=(B,),
        in_specs=[pl.BlockSpec((IMG_SIZE, LANES), lambda b: (b, 0))]
                 + [_const_spec(c) for c in consts],
        out_specs=pl.BlockSpec((1, 1, LANES), lambda b: (b, 0, 0)),
        compiler_params=pltpu.CompilerParams(
            dimension_semantics=("parallel",),
            vmem_limit_bytes=32 * 1024 * 1024),
    )(x, *consts)

    out = out.reshape(B, LANES)
    return out[:, 0:1], out[:, 1:1 + N_CLASSES]


# --------------------- parameter construction / repacking --------------------

def init_torch_style_params(key):
    """Deterministic synthetic parameters with the PyTorch module's shapes."""
    conv, bn = [], []
    for i in range(4):
        cin, cout = CHANNELS[i], CHANNELS[i + 1]
        key, kw, kb = jax.random.split(key, 3)
        w = np.asarray(0.1 * jax.random.normal(kw, (cout, cin, 3, 3), jnp.float32))
        b = np.asarray(0.1 * jax.random.normal(kb, (cout,), jnp.float32))
        conv.append((w, b))
        if i == 0:
            bn.append(None)                                   # first block: bn=False
        else:                                                 # BatchNorm2d(cout, eps=0.8), eval mode
            key, kg, kbe, km, kv = jax.random.split(key, 5)
            gamma = np.asarray(1.0 + 0.1 * jax.random.normal(kg, (cout,), jnp.float32))
            beta = np.asarray(0.1 * jax.random.normal(kbe, (cout,), jnp.float32))
            mean = np.asarray(0.1 * jax.random.normal(km, (cout,), jnp.float32))
            var = np.asarray(1.0 + 0.1 * jnp.abs(jax.random.normal(kv, (cout,), jnp.float32)))
            bn.append((gamma, beta, mean, var, 0.8))
    key, k1, k2, k3, k4 = jax.random.split(key, 5)
    adv_w = np.asarray(0.05 * jax.random.normal(k1, (1, FEAT), jnp.float32))
    adv_b = np.asarray(0.05 * jax.random.normal(k2, (1,), jnp.float32))
    aux_w = np.asarray(0.05 * jax.random.normal(k3, (N_CLASSES, FEAT), jnp.float32))
    aux_b = np.asarray(0.05 * jax.random.normal(k4, (N_CLASSES,), jnp.float32))
    return conv, bn, adv_w, adv_b, aux_w, aux_b


def build_kernel_operands(conv, bn, adv_w, adv_b, aux_w, aux_b):
    """One-time host-side repack of PyTorch-layout parameters into lane-dense
    kernel operands (banded conv matrices, folded BN vectors, merged+permuted heads)."""
    ops = {}
    h = IMG_SIZE
    for i, ((w, b), bnp) in enumerate(zip(conv, bn)):
        cout, cin = w.shape[0], w.shape[1]
        w_in, oh, ow = h, h // 2, h // 2
        wc = w_in * cin
        wc_pad = -(-wc // LANES) * LANES
        owc = ow * cout
        # cm[kh, w*cin+ci, ow*cout+co] = weight[co, ci, kh, w-(2*ow-1)] (zero outside 3x3 / padding)
        cm = np.zeros((3, wc_pad, owc), np.float32)
        for kh in range(3):
            for j in range(ow):
                for kw in range(3):
                    col = 2 * j + kw - 1
                    if 0 <= col < w_in:
                        cm[kh, col * cin:(col + 1) * cin, j * cout:(j + 1) * cout] = w[:, :, kh, kw].T
        if bnp is None:
            scale = np.ones((cout,), np.float32)
            shift = np.zeros((cout,), np.float32)
        else:
            gamma, beta, mean, var, eps = bnp
            scale = gamma / np.sqrt(var + eps)
            shift = beta - mean * scale
        vec = np.stack([np.tile(b, ow), np.tile(scale, ow), np.tile(shift, ow)], 0).astype(np.float32)
        ops[f"cm{i + 1}"] = jnp.asarray(cm.reshape(3 * wc_pad, owc))
        ops[f"vec{i + 1}"] = jnp.asarray(vec)
        h = oh
    # Heads: merge adv(1) + aux(10) into one 128-lane matmul and permute rows so they
    # consume the kernel's (h4, w4, c) layout directly (torch flat index = c*4 + h4*2 + w4).
    cout = CHANNELS[-1]
    whcat = np.concatenate([adv_w, aux_w], axis=0)            # [11, 512]
    bhcat = np.concatenate([adv_b, aux_b], axis=0)            # [11]
    n_out = whcat.shape[0]
    wh = np.zeros((DS * DS * cout, LANES), np.float32)        # [512, 128], h4-major blocks
    for h4 in range(DS):
        for w4 in range(DS):
            for c in range(cout):
                wh[h4 * DS * cout + w4 * cout + c, :n_out] = whcat[:, c * DS * DS + h4 * DS + w4]
    bh = np.zeros((1, LANES), np.float32)
    bh[0, :n_out] = bhcat
    ops["wh"] = jnp.asarray(wh)
    ops["bh"] = jnp.asarray(bh)
    return ops


# ------------------------- pure-JAX reference (check) -------------------------

def reference_forward(img, conv, bn, adv_w, adv_b, aux_w, aux_b):
    x = img
    for (w, b), bnp in zip(conv, bn):
        x = lax.conv_general_dilated(x, jnp.asarray(w), window_strides=(2, 2),
                                     padding=((1, 1), (1, 1)),
                                     dimension_numbers=("NCHW", "OIHW", "NCHW"))
        x = x + jnp.asarray(b)[None, :, None, None]
        x = jnp.where(x >= 0, x, LEAKY_SLOPE * x)
        if bnp is not None:
            gamma, beta, mean, var, eps = bnp
            scale = (jnp.asarray(gamma) / jnp.sqrt(jnp.asarray(var) + eps))[None, :, None, None]
            x = (x - jnp.asarray(mean)[None, :, None, None]) * scale + jnp.asarray(beta)[None, :, None, None]
    flat = x.reshape(x.shape[0], -1)
    validity = jax.nn.sigmoid(flat @ jnp.asarray(adv_w).T + jnp.asarray(adv_b))
    label = jax.nn.softmax(flat @ jnp.asarray(aux_w).T + jnp.asarray(aux_b), axis=-1)
    return validity, label


if __name__ == "__main__":
    key = jax.random.PRNGKey(0)
    key, k_img = jax.random.split(key)
    img = jax.random.normal(k_img, (2, 3, IMG_SIZE, IMG_SIZE), jnp.float32)   # NCHW, like torch

    torch_params = init_torch_style_params(key)
    ops = build_kernel_operands(*torch_params)

    validity, label = discriminator_forward(img, ops)
    jax.block_until_ready((validity, label))

    assert validity.shape == (2, 1) and label.shape == (2, N_CLASSES)
    assert bool(jnp.all(jnp.isfinite(validity))) and bool(jnp.all(jnp.isfinite(label)))
    assert bool(jnp.allclose(jnp.sum(label, axis=-1), 1.0, atol=5e-3))

    v_ref, l_ref = reference_forward(img, *torch_params)
    assert float(jnp.max(jnp.abs(validity - v_ref))) < 1e-2
    assert float(jnp.max(jnp.abs(label - l_ref))) < 1e-2

    print("KERNEL_OK")
</pallas_src>

<mosaic_0001>
module attributes {stable_mosaic.version = 11 : i64} {
  func.func @discriminator_kernel(%arg0: i32, %arg1: memref<32x128xf32, #tpu.memory_space<vmem>>, %arg2: memref<384x256xf32, #tpu.memory_space<vmem>>, %arg3: memref<3x256xf32, #tpu.memory_space<vmem>>, %arg4: memref<768x256xf32, #tpu.memory_space<vmem>>, %arg5: memref<3x256xf32, #tpu.memory_space<vmem>>, %arg6: memref<768x256xf32, #tpu.memory_space<vmem>>, %arg7: memref<3x256xf32, #tpu.memory_space<vmem>>, %arg8: memref<768x256xf32, #tpu.memory_space<vmem>>, %arg9: memref<3x256xf32, #tpu.memory_space<vmem>>, %arg10: memref<512x128xf32, #tpu.memory_space<vmem>>, %arg11: memref<1x128xf32, #tpu.memory_space<vmem>>, %arg12: memref<1x1x128xf32, #tpu.memory_space<vmem>>) attributes {dimension_semantics = [#tpu.dimension_semantics<parallel>], iteration_bounds = array<i64: 2>, scalar_prefetch = 0 : i64, scratch_operands = 0 : i64, tpu.core_type = #tpu.core_type<tc>, window_params = [{transform_indices = @transform_0, window_bounds = array<i64: 32, 128>}, {pipeline_mode = #tpu.pipeline_mode<synchronous>, transform_indices = @transform_1, window_bounds = array<i64: 384, 256>}, {pipeline_mode = #tpu.pipeline_mode<synchronous>, transform_indices = @transform_2, window_bounds = array<i64: 3, 256>}, {pipeline_mode = #tpu.pipeline_mode<synchronous>, transform_indices = @transform_3, window_bounds = array<i64: 768, 256>}, {pipeline_mode = #tpu.pipeline_mode<synchronous>, transform_indices = @transform_4, window_bounds = array<i64: 3, 256>}, {pipeline_mode = #tpu.pipeline_mode<synchronous>, transform_indices = @transform_5, window_bounds = array<i64: 768, 256>}, {pipeline_mode = #tpu.pipeline_mode<synchronous>, transform_indices = @transform_6, window_bounds = array<i64: 3, 256>}, {pipeline_mode = #tpu.pipeline_mode<synchronous>, transform_indices = @transform_7, window_bounds = array<i64: 768, 256>}, {pipeline_mode = #tpu.pipeline_mode<synchronous>, transform_indices = @transform_8, window_bounds = array<i64: 3, 256>}, {pipeline_mode = #tpu.pipeline_mode<synchronous>, transform_indices = @transform_9, window_bounds = array<i64: 512, 128>}, {pipeline_mode = #tpu.pipeline_mode<synchronous>, transform_indices = @transform_10, window_bounds = array<i64: 1, 128>}, {transform_indices = @transform_11, window_bounds = array<i64: 1, 1, 128>}]} {
    %c0 = arith.constant 0 : index
    %c0_0 = arith.constant 0 : index
    %0 = vector.load %arg1[%c0, %c0_0] : memref<32x128xf32, #tpu.memory_space<vmem>>, vector<32x128xf32>
    %1 = tpu.iota {dimensions = array<i32: 0>} : vector<16x32xi32>
    %2 = tpu.iota {dimensions = array<i32: 1>} : vector<16x32xi32>
    %cst = arith.constant 0.000000e+00 : f32
    %3 = vector.broadcast %cst : f32 to vector<16x256xf32>
    %c2_i32 = arith.constant 2 : i32
    %4 = vector.broadcast %c2_i32 : i32 to vector<16x32xi32>
    %5 = arith.muli %4, %1 : vector<16x32xi32>
    %c-1_i32 = arith.constant -1 : i32
    %6 = vector.broadcast %c-1_i32 : i32 to vector<16x32xi32>
    %7 = arith.addi %5, %6 : vector<16x32xi32>
    %8 = arith.cmpi eq, %2, %7 : vector<16x32xi32>
    %9 = arith.extui %8 : vector<16x32xi1> to vector<16x32xi32>
    %10 = arith.sitofp %9 : vector<16x32xi32> to vector<16x32xf32>
    %cst_1 = arith.constant dense<0.000000e+00> : vector<16x128xf32>
    %11 = tpu.matmul %10, %0, %cst_1 {dimension_numbers = #tpu.dot_dimension_numbers<[1], [0], [0], [1], [0, 0, 1, 1], [], []>} : vector<16x32xf32>, vector<32x128xf32>, vector<16x128xf32> -> vector<16x128xf32>
    %c0_2 = arith.constant 0 : index
    %c0_3 = arith.constant 0 : index
    %12 = vector.load %arg2[%c0_2, %c0_3] : memref<384x256xf32, #tpu.memory_space<vmem>>, vector<128x256xf32>
    %cst_4 = arith.constant dense<0.000000e+00> : vector<16x256xf32>
    %13 = tpu.matmul %11, %12, %cst_4 {dimension_numbers = #tpu.dot_dimension_numbers<[1], [0], [0], [1], [0, 0, 1, 1], [], []>} : vector<16x128xf32>, vector<128x256xf32>, vector<16x256xf32> -> vector<16x256xf32>
    %14 = arith.addf %3, %13 : vector<16x256xf32>
    %c2_i32_5 = arith.constant 2 : i32
    %15 = vector.broadcast %c2_i32_5 : i32 to vector<16x32xi32>
    %16 = arith.muli %15, %1 : vector<16x32xi32>
    %c0_i32 = arith.constant 0 : i32
    %17 = vector.broadcast %c0_i32 : i32 to vector<16x32xi32>
    %18 = arith.addi %16, %17 : vector<16x32xi32>
    %19 = arith.cmpi eq, %2, %18 : vector<16x32xi32>
    %20 = arith.extui %19 : vector<16x32xi1> to vector<16x32xi32>
    %21 = arith.sitofp %20 : vector<16x32xi32> to vector<16x32xf32>
    %cst_6 = arith.constant dense<0.000000e+00> : vector<16x128xf32>
    %22 = tpu.matmul %21, %0, %cst_6 {dimension_numbers = #tpu.dot_dimension_numbers<[1], [0], [0], [1], [0, 0, 1, 1], [], []>} : vector<16x32xf32>, vector<32x128xf32>, vector<16x128xf32> -> vector<16x128xf32>
    %c128 = arith.constant 128 : index
    %c0_7 = arith.constant 0 : index
    %23 = vector.load %arg2[%c128, %c0_7] : memref<384x256xf32, #tpu.memory_space<vmem>>, vector<128x256xf32>
    %cst_8 = arith.constant dense<0.000000e+00> : vector<16x256xf32>
    %24 = tpu.matmul %22, %23, %cst_8 {dimension_numbers = #tpu.dot_dimension_numbers<[1], [0], [0], [1], [0, 0, 1, 1], [], []>} : vector<16x128xf32>, vector<128x256xf32>, vector<16x256xf32> -> vector<16x256xf32>
    %25 = arith.addf %14, %24 : vector<16x256xf32>
    %c2_i32_9 = arith.constant 2 : i32
    %26 = vector.broadcast %c2_i32_9 : i32 to vector<16x32xi32>
    %27 = arith.muli %26, %1 : vector<16x32xi32>
    %c1_i32 = arith.constant 1 : i32
    %28 = vector.broadcast %c1_i32 : i32 to vector<16x32xi32>
    %29 = arith.addi %27, %28 : vector<16x32xi32>
    %30 = arith.cmpi eq, %2, %29 : vector<16x32xi32>
    %31 = arith.extui %30 : vector<16x32xi1> to vector<16x32xi32>
    %32 = arith.sitofp %31 : vector<16x32xi32> to vector<16x32xf32>
    %cst_10 = arith.constant dense<0.000000e+00> : vector<16x128xf32>
    %33 = tpu.matmul %32, %0, %cst_10 {dimension_numbers = #tpu.dot_dimension_numbers<[1], [0], [0], [1], [0, 0, 1, 1], [], []>} : vector<16x32xf32>, vector<32x128xf32>, vector<16x128xf32> -> vector<16x128xf32>
    %c256 = arith.constant 256 : index
    %c0_11 = arith.constant 0 : index
    %34 = vector.load %arg2[%c256, %c0_11] : memref<384x256xf32, #tpu.memory_space<vmem>>, vector<128x256xf32>
    %cst_12 = arith.constant dense<0.000000e+00> : vector<16x256xf32>
    %35 = tpu.matmul %33, %34, %cst_12 {dimension_numbers = #tpu.dot_dimension_numbers<[1], [0], [0], [1], [0, 0, 1, 1], [], []>} : vector<16x128xf32>, vector<128x256xf32>, vector<16x256xf32> -> vector<16x256xf32>
    %36 = arith.addf %25, %35 : vector<16x256xf32>
    %c0_13 = arith.constant 0 : index
    %c0_14 = arith.constant 0 : index
    %37 = vector.load %arg3[%c0_13, %c0_14] : memref<3x256xf32, #tpu.memory_space<vmem>>, vector<1x256xf32>
    %38 = vector.broadcast %37 : vector<1x256xf32> to vector<16x256xf32>
    %39 = arith.addf %36, %38 : vector<16x256xf32>
    %cst_15 = arith.constant 0.000000e+00 : f32
    %40 = vector.broadcast %cst_15 : f32 to vector<16x256xf32>
    %41 = arith.cmpf oge, %39, %40 : vector<16x256xf32>
    %cst_16 = arith.constant 2.000000e-01 : f32
    %42 = vector.broadcast %cst_16 : f32 to vector<16x256xf32>
    %43 = arith.mulf %42, %39 : vector<16x256xf32>
    %44 = arith.select %41, %39, %43 : vector<16x256xi1>, vector<16x256xf32>
    %c1 = arith.constant 1 : index
    %c0_17 = arith.constant 0 : index
    %45 = vector.load %arg3[%c1, %c0_17] : memref<3x256xf32, #tpu.memory_space<vmem>>, vector<1x256xf32>
    %46 = vector.broadcast %45 : vector<1x256xf32> to vector<16x256xf32>
    %47 = arith.mulf %44, %46 : vector<16x256xf32>
    %c2 = arith.constant 2 : index
    %c0_18 = arith.constant 0 : index
    %48 = vector.load %arg3[%c2, %c0_18] : memref<3x256xf32, #tpu.memory_space<vmem>>, vector<1x256xf32>
    %49 = vector.broadcast %48 : vector<1x256xf32> to vector<16x256xf32>
    %50 = arith.addf %47, %49 : vector<16x256xf32>
    %51 = tpu.iota {dimensions = array<i32: 0>} : vector<8x16xi32>
    %52 = tpu.iota {dimensions = array<i32: 1>} : vector<8x16xi32>
    %cst_19 = arith.constant 0.000000e+00 : f32
    %53 = vector.broadcast %cst_19 : f32 to vector<8x256xf32>
    %c2_i32_20 = arith.constant 2 : i32
    %54 = vector.broadcast %c2_i32_20 : i32 to vector<8x16xi32>
    %55 = arith.muli %54, %51 : vector<8x16xi32>
    %c-1_i32_21 = arith.constant -1 : i32
    %56 = vector.broadcast %c-1_i32_21 : i32 to vector<8x16xi32>
    %57 = arith.addi %55, %56 : vector<8x16xi32>
    %58 = arith.cmpi eq, %52, %57 : vector<8x16xi32>
    %59 = arith.extui %58 : vector<8x16xi1> to vector<8x16xi32>
    %60 = arith.sitofp %59 : vector<8x16xi32> to vector<8x16xf32>
    %cst_22 = arith.constant dense<0.000000e+00> : vector<8x256xf32>
    %61 = tpu.matmul %60, %50, %cst_22 {dimension_numbers = #tpu.dot_dimension_numbers<[1], [0], [0], [1], [0, 0, 1, 1], [], []>} : vector<8x16xf32>, vector<16x256xf32>, vector<8x256xf32> -> vector<8x256xf32>
    %c0_23 = arith.constant 0 : index
    %c0_24 = arith.constant 0 : index
    %62 = vector.load %arg4[%c0_23, %c0_24] : memref<768x256xf32, #tpu.memory_space<vmem>>, vector<256x256xf32>
    %cst_25 = arith.constant dense<0.000000e+00> : vector<8x256xf32>
    %63 = tpu.matmul %61, %62, %cst_25 {dimension_numbers = #tpu.dot_dimension_numbers<[1], [0], [0], [1], [0, 0, 1, 1], [], []>} : vector<8x256xf32>, vector<256x256xf32>, vector<8x256xf32> -> vector<8x256xf32>
    %64 = arith.addf %53, %63 : vector<8x256xf32>
    %c2_i32_26 = arith.constant 2 : i32
    %65 = vector.broadcast %c2_i32_26 : i32 to vector<8x16xi32>
    %66 = arith.muli %65, %51 : vector<8x16xi32>
    %c0_i32_27 = arith.constant 0 : i32
    %67 = vector.broadcast %c0_i32_27 : i32 to vector<8x16xi32>
    %68 = arith.addi %66, %67 : vector<8x16xi32>
    %69 = arith.cmpi eq, %52, %68 : vector<8x16xi32>
    %70 = arith.extui %69 : vector<8x16xi1> to vector<8x16xi32>
    %71 = arith.sitofp %70 : vector<8x16xi32> to vector<8x16xf32>
    %cst_28 = arith.constant dense<0.000000e+00> : vector<8x256xf32>
    %72 = tpu.matmul %71, %50, %cst_28 {dimension_numbers = #tpu.dot_dimension_numbers<[1], [0], [0], [1], [0, 0, 1, 1], [], []>} : vector<8x16xf32>, vector<16x256xf32>, vector<8x256xf32> -> vector<8x256xf32>
    %c256_29 = arith.constant 256 : index
    %c0_30 = arith.constant 0 : index
    %73 = vector.load %arg4[%c256_29, %c0_30] : memref<768x256xf32, #tpu.memory_space<vmem>>, vector<256x256xf32>
    %cst_31 = arith.constant dense<0.000000e+00> : vector<8x256xf32>
    %74 = tpu.matmul %72, %73, %cst_31 {dimension_numbers = #tpu.dot_dimension_numbers<[1], [0], [0], [1], [0, 0, 1, 1], [], []>} : vector<8x256xf32>, vector<256x256xf32>, vector<8x256xf32> -> vector<8x256xf32>
    %75 = arith.addf %64, %74 : vector<8x256xf32>
    %c2_i32_32 = arith.constant 2 : i32
    %76 = vector.broadcast %c2_i32_32 : i32 to vector<8x16xi32>
    %77 = arith.muli %76, %51 : vector<8x16xi32>
    %c1_i32_33 = arith.constant 1 : i32
    %78 = vector.broadcast %c1_i32_33 : i32 to vector<8x16xi32>
    %79 = arith.addi %77, %78 : vector<8x16xi32>
    %80 = arith.cmpi eq, %52, %79 : vector<8x16xi32>
    %81 = arith.extui %80 : vector<8x16xi1> to vector<8x16xi32>
    %82 = arith.sitofp %81 : vector<8x16xi32> to vector<8x16xf32>
    %cst_34 = arith.constant dense<0.000000e+00> : vector<8x256xf32>
    %83 = tpu.matmul %82, %50, %cst_34 {dimension_numbers = #tpu.dot_dimension_numbers<[1], [0], [0], [1], [0, 0, 1, 1], [], []>} : vector<8x16xf32>, vector<16x256xf32>, vector<8x256xf32> -> vector<8x256xf32>
    %c512 = arith.constant 512 : index
    %c0_35 = arith.constant 0 : index
    %84 = vector.load %arg4[%c512, %c0_35] : memref<768x256xf32, #tpu.memory_space<vmem>>, vector<256x256xf32>
    %cst_36 = arith.constant dense<0.000000e+00> : vector<8x256xf32>
    %85 = tpu.matmul %83, %84, %cst_36 {dimension_numbers = #tpu.dot_dimension_numbers<[1], [0], [0], [1], [0, 0, 1, 1], [], []>} : vector<8x256xf32>, vector<256x256xf32>, vector<8x256xf32> -> vector<8x256xf32>
    %86 = arith.addf %75, %85 : vector<8x256xf32>
    %c0_37 = arith.constant 0 : index
    %c0_38 = arith.constant 0 : index
    %87 = vector.load %arg5[%c0_37, %c0_38] : memref<3x256xf32, #tpu.memory_space<vmem>>, vector<1x256xf32>
    %88 = vector.broadcast %87 : vector<1x256xf32> to vector<8x256xf32>
    %89 = arith.addf %86, %88 : vector<8x256xf32>
    %cst_39 = arith.constant 0.000000e+00 : f32
    %90 = vector.broadcast %cst_39 : f32 to vector<8x256xf32>
    %91 = arith.cmpf oge, %89, %90 : vector<8x256xf32>
    %cst_40 = arith.constant 2.000000e-01 : f32
    %92 = vector.broadcast %cst_40 : f32 to vector<8x256xf32>
    %93 = arith.mulf %92, %89 : vector<8x256xf32>
    %94 = arith.select %91, %89, %93 : vector<8x256xi1>, vector<8x256xf32>
    %c1_41 = arith.constant 1 : index
    %c0_42 = arith.constant 0 : index
    %95 = vector.load %arg5[%c1_41, %c0_42] : memref<3x256xf32, #tpu.memory_space<vmem>>, vector<1x256xf32>
    %96 = vector.broadcast %95 : vector<1x256xf32> to vector<8x256xf32>
    %97 = arith.mulf %94, %96 : vector<8x256xf32>
    %c2_43 = arith.constant 2 : index
    %c0_44 = arith.constant 0 : index
    %98 = vector.load %arg5[%c2_43, %c0_44] : memref<3x256xf32, #tpu.memory_space<vmem>>, vector<1x256xf32>
    %99 = vector.broadcast %98 : vector<1x256xf32> to vector<8x256xf32>
    %100 = arith.addf %97, %99 : vector<8x256xf32>
    %101 = tpu.iota {dimensions = array<i32: 0>} : vector<4x8xi32>
    %102 = tpu.iota {dimensions = array<i32: 1>} : vector<4x8xi32>
    %cst_45 = arith.constant 0.000000e+00 : f32
    %103 = vector.broadcast %cst_45 : f32 to vector<4x256xf32>
    %c2_i32_46 = arith.constant 2 : i32
    %104 = vector.broadcast %c2_i32_46 : i32 to vector<4x8xi32>
    %105 = arith.muli %104, %101 : vector<4x8xi32>
    %c-1_i32_47 = arith.constant -1 : i32
    %106 = vector.broadcast %c-1_i32_47 : i32 to vector<4x8xi32>
    %107 = arith.addi %105, %106 : vector<4x8xi32>
    %108 = arith.cmpi eq, %102, %107 : vector<4x8xi32>
    %109 = arith.extui %108 : vector<4x8xi1> to vector<4x8xi32>
    %110 = arith.sitofp %109 : vector<4x8xi32> to vector<4x8xf32>
    %cst_48 = arith.constant dense<0.000000e+00> : vector<4x256xf32>
    %111 = tpu.matmul %110, %100, %cst_48 {dimension_numbers = #tpu.dot_dimension_numbers<[1], [0], [0], [1], [0, 0, 1, 1], [], []>} : vector<4x8xf32>, vector<8x256xf32>, vector<4x256xf32> -> vector<4x256xf32>
    %c0_49 = arith.constant 0 : index
    %c0_50 = arith.constant 0 : index
    %112 = vector.load %arg6[%c0_49, %c0_50] : memref<768x256xf32, #tpu.memory_space<vmem>>, vector<256x256xf32>
    %cst_51 = arith.constant dense<0.000000e+00> : vector<4x256xf32>
    %113 = tpu.matmul %111, %112, %cst_51 {dimension_numbers = #tpu.dot_dimension_numbers<[1], [0], [0], [1], [0, 0, 1, 1], [], []>} : vector<4x256xf32>, vector<256x256xf32>, vector<4x256xf32> -> vector<4x256xf32>
    %114 = arith.addf %103, %113 : vector<4x256xf32>
    %c2_i32_52 = arith.constant 2 : i32
    %115 = vector.broadcast %c2_i32_52 : i32 to vector<4x8xi32>
    %116 = arith.muli %115, %101 : vector<4x8xi32>
    %c0_i32_53 = arith.constant 0 : i32
    %117 = vector.broadcast %c0_i32_53 : i32 to vector<4x8xi32>
    %118 = arith.addi %116, %117 : vector<4x8xi32>
    %119 = arith.cmpi eq, %102, %118 : vector<4x8xi32>
    %120 = arith.extui %119 : vector<4x8xi1> to vector<4x8xi32>
    %121 = arith.sitofp %120 : vector<4x8xi32> to vector<4x8xf32>
    %cst_54 = arith.constant dense<0.000000e+00> : vector<4x256xf32>
    %122 = tpu.matmul %121, %100, %cst_54 {dimension_numbers = #tpu.dot_dimension_numbers<[1], [0], [0], [1], [0, 0, 1, 1], [], []>} : vector<4x8xf32>, vector<8x256xf32>, vector<4x256xf32> -> vector<4x256xf32>
    %c256_55 = arith.constant 256 : index
    %c0_56 = arith.constant 0 : index
    %123 = vector.load %arg6[%c256_55, %c0_56] : memref<768x256xf32, #tpu.memory_space<vmem>>, vector<256x256xf32>
    %cst_57 = arith.constant dense<0.000000e+00> : vector<4x256xf32>
    %124 = tpu.matmul %122, %123, %cst_57 {dimension_numbers = #tpu.dot_dimension_numbers<[1], [0], [0], [1], [0, 0, 1, 1], [], []>} : vector<4x256xf32>, vector<256x256xf32>, vector<4x256xf32> -> vector<4x256xf32>
    %125 = arith.addf %114, %124 : vector<4x256xf32>
    %c2_i32_58 = arith.constant 2 : i32
    %126 = vector.broadcast %c2_i32_58 : i32 to vector<4x8xi32>
    %127 = arith.muli %126, %101 : vector<4x8xi32>
    %c1_i32_59 = arith.constant 1 : i32
    %128 = vector.broadcast %c1_i32_59 : i32 to vector<4x8xi32>
    %129 = arith.addi %127, %128 : vector<4x8xi32>
    %130 = arith.cmpi eq, %102, %129 : vector<4x8xi32>
    %131 = arith.extui %130 : vector<4x8xi1> to vector<4x8xi32>
    %132 = arith.sitofp %131 : vector<4x8xi32> to vector<4x8xf32>
    %cst_60 = arith.constant dense<0.000000e+00> : vector<4x256xf32>
    %133 = tpu.matmul %132, %100, %cst_60 {dimension_numbers = #tpu.dot_dimension_numbers<[1], [0], [0], [1], [0, 0, 1, 1], [], []>} : vector<4x8xf32>, vector<8x256xf32>, vector<4x256xf32> -> vector<4x256xf32>
    %c512_61 = arith.constant 512 : index
    %c0_62 = arith.constant 0 : index
    %134 = vector.load %arg6[%c512_61, %c0_62] : memref<768x256xf32, #tpu.memory_space<vmem>>, vector<256x256xf32>
    %cst_63 = arith.constant dense<0.000000e+00> : vector<4x256xf32>
    %135 = tpu.matmul %133, %134, %cst_63 {dimension_numbers = #tpu.dot_dimension_numbers<[1], [0], [0], [1], [0, 0, 1, 1], [], []>} : vector<4x256xf32>, vector<256x256xf32>, vector<4x256xf32> -> vector<4x256xf32>
    %136 = arith.addf %125, %135 : vector<4x256xf32>
    %c0_64 = arith.constant 0 : index
    %c0_65 = arith.constant 0 : index
    %137 = vector.load %arg7[%c0_64, %c0_65] : memref<3x256xf32, #tpu.memory_space<vmem>>, vector<1x256xf32>
    %138 = vector.broadcast %137 : vector<1x256xf32> to vector<4x256xf32>
    %139 = arith.addf %136, %138 : vector<4x256xf32>
    %cst_66 = arith.constant 0.000000e+00 : f32
    %140 = vector.broadcast %cst_66 : f32 to vector<4x256xf32>
    %141 = arith.cmpf oge, %139, %140 : vector<4x256xf32>
    %cst_67 = arith.constant 2.000000e-01 : f32
    %142 = vector.broadcast %cst_67 : f32 to vector<4x256xf32>
    %143 = arith.mulf %142, %139 : vector<4x256xf32>
    %144 = arith.select %141, %139, %143 : vector<4x256xi1>, vector<4x256xf32>
    %c1_68 = arith.constant 1 : index
    %c0_69 = arith.constant 0 : index
    %145 = vector.load %arg7[%c1_68, %c0_69] : memref<3x256xf32, #tpu.memory_space<vmem>>, vector<1x256xf32>
    %146 = vector.broadcast %145 : vector<1x256xf32> to vector<4x256xf32>
    %147 = arith.mulf %144, %146 : vector<4x256xf32>
    %c2_70 = arith.constant 2 : index
    %c0_71 = arith.constant 0 : index
    %148 = vector.load %arg7[%c2_70, %c0_71] : memref<3x256xf32, #tpu.memory_space<vmem>>, vector<1x256xf32>
    %149 = vector.broadcast %148 : vector<1x256xf32> to vector<4x256xf32>
    %150 = arith.addf %147, %149 : vector<4x256xf32>
    %151 = tpu.iota {dimensions = array<i32: 0>} : vector<2x4xi32>
    %152 = tpu.iota {dimensions = array<i32: 1>} : vector<2x4xi32>
    %cst_72 = arith.constant 0.000000e+00 : f32
    %153 = vector.broadcast %cst_72 : f32 to vector<2x256xf32>
    %c2_i32_73 = arith.constant 2 : i32
    %154 = vector.broadcast %c2_i32_73 : i32 to vector<2x4xi32>
    %155 = arith.muli %154, %151 : vector<2x4xi32>
    %c-1_i32_74 = arith.constant -1 : i32
    %156 = vector.broadcast %c-1_i32_74 : i32 to vector<2x4xi32>
    %157 = arith.addi %155, %156 : vector<2x4xi32>
    %158 = arith.cmpi eq, %152, %157 : vector<2x4xi32>
    %159 = arith.extui %158 : vector<2x4xi1> to vector<2x4xi32>
    %160 = arith.sitofp %159 : vector<2x4xi32> to vector<2x4xf32>
    %cst_75 = arith.constant dense<0.000000e+00> : vector<2x256xf32>
    %161 = tpu.matmul %160, %150, %cst_75 {dimension_numbers = #tpu.dot_dimension_numbers<[1], [0], [0], [1], [0, 0, 1, 1], [], []>} : vector<2x4xf32>, vector<4x256xf32>, vector<2x256xf32> -> vector<2x256xf32>
    %c0_76 = arith.constant 0 : index
    %c0_77 = arith.constant 0 : index
    %162 = vector.load %arg8[%c0_76, %c0_77] : memref<768x256xf32, #tpu.memory_space<vmem>>, vector<256x256xf32>
    %cst_78 = arith.constant dense<0.000000e+00> : vector<2x256xf32>
    %163 = tpu.matmul %161, %162, %cst_78 {dimension_numbers = #tpu.dot_dimension_numbers<[1], [0], [0], [1], [0, 0, 1, 1], [], []>} : vector<2x256xf32>, vector<256x256xf32>, vector<2x256xf32> -> vector<2x256xf32>
    %164 = arith.addf %153, %163 : vector<2x256xf32>
    %c2_i32_79 = arith.constant 2 : i32
    %165 = vector.broadcast %c2_i32_79 : i32 to vector<2x4xi32>
    %166 = arith.muli %165, %151 : vector<2x4xi32>
    %c0_i32_80 = arith.constant 0 : i32
    %167 = vector.broadcast %c0_i32_80 : i32 to vector<2x4xi32>
    %168 = arith.addi %166, %167 : vector<2x4xi32>
    %169 = arith.cmpi eq, %152, %168 : vector<2x4xi32>
    %170 = arith.extui %169 : vector<2x4xi1> to vector<2x4xi32>
    %171 = arith.sitofp %170 : vector<2x4xi32> to vector<2x4xf32>
    %cst_81 = arith.constant dense<0.000000e+00> : vector<2x256xf32>
    %172 = tpu.matmul %171, %150, %cst_81 {dimension_numbers = #tpu.dot_dimension_numbers<[1], [0], [0], [1], [0, 0, 1, 1], [], []>} : vector<2x4xf32>, vector<4x256xf32>, vector<2x256xf32> -> vector<2x256xf32>
    %c256_82 = arith.constant 256 : index
    %c0_83 = arith.constant 0 : index
    %173 = vector.load %arg8[%c256_82, %c0_83] : memref<768x256xf32, #tpu.memory_space<vmem>>, vector<256x256xf32>
    %cst_84 = arith.constant dense<0.000000e+00> : vector<2x256xf32>
    %174 = tpu.matmul %172, %173, %cst_84 {dimension_numbers = #tpu.dot_dimension_numbers<[1], [0], [0], [1], [0, 0, 1, 1], [], []>} : vector<2x256xf32>, vector<256x256xf32>, vector<2x256xf32> -> vector<2x256xf32>
    %175 = arith.addf %164, %174 : vector<2x256xf32>
    %c2_i32_85 = arith.constant 2 : i32
    %176 = vector.broadcast %c2_i32_85 : i32 to vector<2x4xi32>
    %177 = arith.muli %176, %151 : vector<2x4xi32>
    %c1_i32_86 = arith.constant 1 : i32
    %178 = vector.broadcast %c1_i32_86 : i32 to vector<2x4xi32>
    %179 = arith.addi %177, %178 : vector<2x4xi32>
    %180 = arith.cmpi eq, %152, %179 : vector<2x4xi32>
    %181 = arith.extui %180 : vector<2x4xi1> to vector<2x4xi32>
    %182 = arith.sitofp %181 : vector<2x4xi32> to vector<2x4xf32>
    %cst_87 = arith.constant dense<0.000000e+00> : vector<2x256xf32>
    %183 = tpu.matmul %182, %150, %cst_87 {dimension_numbers = #tpu.dot_dimension_numbers<[1], [0], [0], [1], [0, 0, 1, 1], [], []>} : vector<2x4xf32>, vector<4x256xf32>, vector<2x256xf32> -> vector<2x256xf32>
    %c512_88 = arith.constant 512 : index
    %c0_89 = arith.constant 0 : index
    %184 = vector.load %arg8[%c512_88, %c0_89] : memref<768x256xf32, #tpu.memory_space<vmem>>, vector<256x256xf32>
    %cst_90 = arith.constant dense<0.000000e+00> : vector<2x256xf32>
    %185 = tpu.matmul %183, %184, %cst_90 {dimension_numbers = #tpu.dot_dimension_numbers<[1], [0], [0], [1], [0, 0, 1, 1], [], []>} : vector<2x256xf32>, vector<256x256xf32>, vector<2x256xf32> -> vector<2x256xf32>
    %186 = arith.addf %175, %185 : vector<2x256xf32>
    %c0_91 = arith.constant 0 : index
    %c0_92 = arith.constant 0 : index
    %187 = vector.load %arg9[%c0_91, %c0_92] : memref<3x256xf32, #tpu.memory_space<vmem>>, vector<1x256xf32>
    %188 = vector.broadcast %187 : vector<1x256xf32> to vector<2x256xf32>
    %189 = arith.addf %186, %188 : vector<2x256xf32>
    %cst_93 = arith.constant 0.000000e+00 : f32
    %190 = vector.broadcast %cst_93 : f32 to vector<2x256xf32>
    %191 = arith.cmpf oge, %189, %190 : vector<2x256xf32>
    %cst_94 = arith.constant 2.000000e-01 : f32
    %192 = vector.broadcast %cst_94 : f32 to vector<2x256xf32>
    %193 = arith.mulf %192, %189 : vector<2x256xf32>
    %194 = arith.select %191, %189, %193 : vector<2x256xi1>, vector<2x256xf32>
    %c1_95 = arith.constant 1 : index
    %c0_96 = arith.constant 0 : index
    %195 = vector.load %arg9[%c1_95, %c0_96] : memref<3x256xf32, #tpu.memory_space<vmem>>, vector<1x256xf32>
    %196 = vector.broadcast %195 : vector<1x256xf32> to vector<2x256xf32>
    %197 = arith.mulf %194, %196 : vector<2x256xf32>
    %c2_97 = arith.constant 2 : index
    %c0_98 = arith.constant 0 : index
    %198 = vector.load %arg9[%c2_97, %c0_98] : memref<3x256xf32, #tpu.memory_space<vmem>>, vector<1x256xf32>
    %199 = vector.broadcast %198 : vector<1x256xf32> to vector<2x256xf32>
    %200 = arith.addf %197, %199 : vector<2x256xf32>
    %201 = vector.extract_strided_slice %200 {offsets = [0, 0], sizes = [1, 256], strides = [1, 1]} : vector<2x256xf32> to vector<1x256xf32>
    %c0_99 = arith.constant 0 : index
    %c0_100 = arith.constant 0 : index
    %202 = vector.load %arg10[%c0_99, %c0_100] : memref<512x128xf32, #tpu.memory_space<vmem>>, vector<256x128xf32>
    %cst_101 = arith.constant dense<0.000000e+00> : vector<1x128xf32>
    %203 = tpu.matmul %201, %202, %cst_101 {dimension_numbers = #tpu.dot_dimension_numbers<[1], [0], [0], [1], [0, 0, 1, 1], [], []>} : vector<1x256xf32>, vector<256x128xf32>, vector<1x128xf32> -> vector<1x128xf32>
    %204 = vector.extract_strided_slice %200 {offsets = [1, 0], sizes = [1, 256], strides = [1, 1]} : vector<2x256xf32> to vector<1x256xf32>
    %c256_102 = arith.constant 256 : index
    %c0_103 = arith.constant 0 : index
    %205 = vector.load %arg10[%c256_102, %c0_103] : memref<512x128xf32, #tpu.memory_space<vmem>>, vector<256x128xf32>
    %cst_104 = arith.constant dense<0.000000e+00> : vector<1x128xf32>
    %206 = tpu.matmul %204, %205, %cst_104 {dimension_numbers = #tpu.dot_dimension_numbers<[1], [0], [0], [1], [0, 0, 1, 1], [], []>} : vector<1x256xf32>, vector<256x128xf32>, vector<1x128xf32> -> vector<1x128xf32>
    %207 = arith.addf %203, %206 : vector<1x128xf32>
    %c0_105 = arith.constant 0 : index
    %c0_106 = arith.constant 0 : index
    %208 = vector.load %arg11[%c0_105, %c0_106] : memref<1x128xf32, #tpu.memory_space<vmem>>, vector<1x128xf32>
    %209 = arith.addf %207, %208 : vector<1x128xf32>
    %210 = tpu.iota {dimensions = array<i32: 1>} : vector<1x128xi32>
    %c1_i32_107 = arith.constant 1 : i32
    %211 = vector.broadcast %c1_i32_107 : i32 to vector<1x128xi32>
    %212 = arith.cmpi sge, %210, %211 : vector<1x128xi32>
    %c10_i32 = arith.constant 10 : i32
    %213 = vector.broadcast %c10_i32 : i32 to vector<1x128xi32>
    %214 = arith.cmpi sle, %210, %213 : vector<1x128xi32>
    %215 = arith.andi %212, %214 : vector<1x128xi1>
    %cst_108 = arith.constant 0xFF800000 : f32
    %216 = vector.broadcast %cst_108 : f32 to vector<1x128xf32>
    %217 = arith.select %215, %209, %216 : vector<1x128xi1>, vector<1x128xf32>
    %cst_109 = arith.constant dense<0xFF800000> : vector<1xf32>
    %218 = vector.multi_reduction <maximumf>, %217, %cst_109 [1] : vector<1x128xf32> to vector<1xf32>
    %219 = vector.shape_cast %218 : vector<1xf32> to vector<1x1xf32>
    %220 = vector.broadcast %219 : vector<1x1xf32> to vector<1x128xf32>
    %221 = arith.subf %209, %220 : vector<1x128xf32>
    %222 = math.exp %221 : vector<1x128xf32>
    %cst_110 = arith.constant 0.000000e+00 : f32
    %223 = vector.broadcast %cst_110 : f32 to vector<1x128xf32>
    %224 = arith.select %215, %222, %223 : vector<1x128xi1>, vector<1x128xf32>
    %cst_111 = arith.constant dense<0.000000e+00> : vector<1xf32>
    %225 = vector.multi_reduction <add>, %224, %cst_111 [1] : vector<1x128xf32> to vector<1xf32>
    %226 = vector.shape_cast %225 : vector<1xf32> to vector<1x1xf32>
    %227 = tpu.reciprocal %226 {approx = true} : vector<1x1xf32> -> vector<1x1xf32>
    %cst_112 = arith.constant 0.000000e+00 : f32
    %228 = vector.broadcast %cst_112 : f32 to vector<1x128xf32>
    %229 = arith.subf %228, %209 : vector<1x128xf32>
    %230 = math.exp %229 : vector<1x128xf32>
    %cst_113 = arith.constant 1.000000e+00 : f32
    %231 = vector.broadcast %cst_113 : f32 to vector<1x128xf32>
    %232 = arith.addf %231, %230 : vector<1x128xf32>
    %233 = tpu.reciprocal %232 {approx = true} : vector<1x128xf32> -> vector<1x128xf32>
    %c0_i32_114 = arith.constant 0 : i32
    %234 = vector.broadcast %c0_i32_114 : i32 to vector<1x128xi32>
    %235 = arith.cmpi eq, %210, %234 : vector<1x128xi32>
    %236 = vector.broadcast %227 : vector<1x1xf32> to vector<1x128xf32>
    %237 = arith.mulf %224, %236 : vector<1x128xf32>
    %238 = arith.select %235, %233, %237 : vector<1x128xi1>, vector<1x128xf32>
    %c0_115 = arith.constant 0 : index
    %c0_116 = arith.constant 0 : index
    %c0_117 = arith.constant 0 : index
    %239 = vector.load %arg12[%c0_115, %c0_116, %c0_117] : memref<1x1x128xf32, #tpu.memory_space<vmem>>, vector<1x1x128xf32>
    %240 = vector.shape_cast %239 : vector<1x1x128xf32> to vector<1x128xf32>
    %241 = vector.shape_cast %238 : vector<1x128xf32> to vector<1x1x128xf32>
    tpu.vector_store %arg12[%c0_115, %c0_116, %c0_117], %241 {strides = array<i32>} : memref<1x1x128xf32, #tpu.memory_space<vmem>>, vector<1x1x128xf32>,
    return
  }
  func.func @transform_0(%arg0: i32) -> (i32, i32) {
    %c0_i32 = arith.constant 0 : i32
    %c0_i32_0 = arith.constant 0 : i32
    return %arg0, %c0_i32 : i32, i32
  }
  func.func @transform_1(%arg0: i32) -> (i32, i32) {
    %c0_i32 = arith.constant 0 : i32
    %c0_i32_0 = arith.constant 0 : i32
    %c0_i32_1 = arith.constant 0 : i32
    return %c0_i32, %c0_i32_0 : i32, i32
  }
  func.func @transform_2(%arg0: i32) -> (i32, i32) {
    %c0_i32 = arith.constant 0 : i32
    %c0_i32_0 = arith.constant 0 : i32
    %c0_i32_1 = arith.constant 0 : i32
    return %c0_i32, %c0_i32_0 : i32, i32
  }
  func.func @transform_3(%arg0: i32) -> (i32, i32) {
    %c0_i32 = arith.constant 0 : i32
    %c0_i32_0 = arith.constant 0 : i32
    %c0_i32_1 = arith.constant 0 : i32
    return %c0_i32, %c0_i32_0 : i32, i32
  }
  func.func @transform_4(%arg0: i32) -> (i32, i32) {
    %c0_i32 = arith.constant 0 : i32
    %c0_i32_0 = arith.constant 0 : i32
    %c0_i32_1 = arith.constant 0 : i32
    return %c0_i32, %c0_i32_0 : i32, i32
  }
  func.func @transform_5(%arg0: i32) -> (i32, i32) {
    %c0_i32 = arith.constant 0 : i32
    %c0_i32_0 = arith.constant 0 : i32
    %c0_i32_1 = arith.constant 0 : i32
    return %c0_i32, %c0_i32_0 : i32, i32
  }
  func.func @transform_6(%arg0: i32) -> (i32, i32) {
    %c0_i32 = arith.constant 0 : i32
    %c0_i32_0 = arith.constant 0 : i32
    %c0_i32_1 = arith.constant 0 : i32
    return %c0_i32, %c0_i32_0 : i32, i32
  }
  func.func @transform_7(%arg0: i32) -> (i32, i32) {
    %c0_i32 = arith.constant 0 : i32
    %c0_i32_0 = arith.constant 0 : i32
    %c0_i32_1 = arith.constant 0 : i32
    return %c0_i32, %c0_i32_0 : i32, i32
  }
  func.func @transform_8(%arg0: i32) -> (i32, i32) {
    %c0_i32 = arith.constant 0 : i32
    %c0_i32_0 = arith.constant 0 : i32
    %c0_i32_1 = arith.constant 0 : i32
    return %c0_i32, %c0_i32_0 : i32, i32
  }
  func.func @transform_9(%arg0: i32) -> (i32, i32) {
    %c0_i32 = arith.constant 0 : i32
    %c0_i32_0 = arith.constant 0 : i32
    %c0_i32_1 = arith.constant 0 : i32
    return %c0_i32, %c0_i32_0 : i32, i32
  }
  func.func @transform_10(%arg0: i32) -> (i32, i32) {
    %c0_i32 = arith.constant 0 : i32
    %c0_i32_0 = arith.constant 0 : i32
    %c0_i32_1 = arith.constant 0 : i32
    return %c0_i32, %c0_i32_0 : i32, i32
  }
  func.func @transform_11(%arg0: i32) -> (i32, i32, i32) {
    %c0_i32 = arith.constant 0 : i32
    %c0_i32_0 = arith.constant 0 : i32
    %c0_i32_1 = arith.constant 0 : i32
    return %arg0, %c0_i32, %c0_i32_0 : i32, i32, i32
  }
}

</mosaic_0001>

<bundles_post_ra>
// kernel: discriminator_forward.1
= control target key start
LH: loop header
LB: loop body
LE: loop exit
PB: predicated region body
PF: predicated region fallthrough
CT: control target
= control target key end

     0   :  { %16 = vsyncpa [#allocation3], 0  ;;  %s5360_s0 = inlined_call_operand.vmem [shape: f32[64,128], index: 0, kind: input, shape index: {}]   ;;  %s5361_s1 = inlined_call_operand.vmem [shape: f32[384,256], index: 1, kind: input, shape index: {}]   ;;  %s5362_s2 = inlined_call_operand.vmem [shape: f32[3,256], index: 2, kind: input, shape index: {}]   ;;  %s5363_s3 = inlined_call_operand.hbm [shape: f32[768,256], index: 3, kind: input, shape index: {}]   ;;  %s5364_s4 = inlined_call_operand.vmem [shape: f32[3,256], index: 4, kind: input, shape index: {}]   ;;  %s5365_s5 = inlined_call_operand.hbm [shape: f32[768,256], index: 5, kind: input, shape index: {}]   ;;  %s5366_s6 = inlined_call_operand.vmem [shape: f32[3,256], index: 6, kind: input, shape index: {}]   ;;  %s5367_s7 = inlined_call_operand.hbm [shape: f32[768,256], index: 7, kind: input, shape index: {}]   ;;  %s5368_s8 = inlined_call_operand.vmem [shape: f32[3,256], index: 8, kind: input, shape index: {}]   ;;  %s5369_s9 = inlined_call_operand.hbm [shape: f32[512,128], index: 9, kind: input, shape index: {}]   ;;  %s5370_s10 = inlined_call_operand.vmem [shape: f32[1,128], index: 10, kind: input, shape index: {}]   ;;  %s5371_s11 = inlined_call_operand.vmem [shape: f32[2,1,128], index: 11, kind: output, shape index: {}]  }
   0x1   :  { %17 = vsyncpa [#allocation5], 0 }
   0x2   :  { %18 = vsyncpa [#allocation8], 0  ;;  %s4705_s17 = smov 0  }
   0x3 LB: > { %5375 = sst [smem:[#allocation12_spill]] %s4634_s17  ;;  %s4711_s18 = sadd.s32 4294967295, %s4634_s17   ;;  %s4634_s17 = sphi %s4705_s17, %s24_s17  }
   0x4   : > { %p3479_p0 = scmp.ge.s32.totalorder %s4634_s17, 1  ;;  %p291_p1 = scmp.lt.s32.totalorder %s4634_s17, 3 }
   0x5   : > { %p5373_p2 = scmp.eq.s32.totalorder %s4711_s18, 0  ;;  %s4636_s20 = smov [#allocation4]  }
   0x6   : > { %p4716_p3 = pnand %p3479_p0, %p291_p1  ;;  %s325_s21 = sshll.u32 %s4636_s20, 4  ;;  %s4720_s21 = int_to_ptr.vmem [resolvable:$true] %s325_s21 }
   0x7   : > { %s4637_s22 = smov [#allocation2]   ;;  %s4638_s25 = smov [#allocation6]  }
   0x8   : > { %s5376_s19 = scalar_select %p4716_p3, 1, 0 }
   0x9   : > { %p4458_p4 = pneg %p4716_p3  ;;  %s309_s23 = sshll.u32 %s4637_s22, 4  ;;  %s4724_s23 = int_to_ptr.vmem [resolvable:$true] %s309_s23 }
   0xa   : > { %s341_s26 = sshll.u32 %s4638_s25, 4  ;;  %s4639_s27 = smov [#allocation7]   ;;  %s4732_s26 = int_to_ptr.vmem [resolvable:$true] %s341_s26 }
   0xb   : > { %p4728_p5 = pnand %p5373_p2, %p4458_p4  ;;  %s4734_s28 = sshll.u32 %s4639_s27, 4  ;;  %s358_s28 = int_to_ptr.vmem [resolvable:$true] %s4734_s28 }
   0xc   : > { %s4504_s12 = scalar_lea.hbm %s5365_s5, 24576 }
   0xd   : > { %p4505_p6 = scmp.ne.s32.totalorder %s5365_s5, %s4504_s12  ;;  %p4744_p7 = pneg %p4728_p5 }
   0xe   : > { %p4511_p10 = scmp.lt.u32.totalorder %s4504_s12, %s5365_s5 }
   0xf   : > { %p4507_p8 = pnand %p4744_p7, %p4505_p6 }
  0x11   : > { %p4508_p9 = pneg %p4507_p8 }
  0x13   : > { %p4513_p11 = pnand %p4511_p10, %p4508_p9 }
  0x15   : > { %4516 = shalt.err (!%p4513_p11)
}
  0x16   : > { %s4517_s22 = scalar_lea.vmem %s4720_s21, 24576  ;;  %p4525_p1 = scmp.lt.s32.totalorder %s4720_s21, %s4720_s21 }
  0x17   : > { %p4518_p12 = scmp.ne.s32.totalorder %s4720_s21, %s4517_s22  ;;  %p4526_p4 = scmp.lt.s32.totalorder %s4517_s22, %s4517_s22 }
  0x19   : > { %p4520_p13 = pnand %p4518_p12, %p4744_p7  ;;  %p4527_p6 = por %p4526_p4, %p4525_p1 }
  0x1b   : > { %p4521_p0 = pneg %p4520_p13 }
  0x1d   : > { %p4528_p8 = pnand %p4527_p6, %p4521_p0 }
  0x1f   : > { %4531 = shalt.err (!%p4528_p8)
}
  0x20   : > { %s4640_s25 = smov 256   ;;  %s4641_s27 = smov 16  }
  0x21   : > { %4464 = dma.hbm_to_vmem [thread:$0]  (!%p4728_p5), %s5365_s5, 24576, %s4720_s21, [#allocation5], %s4640_s25, %s4640_s25, %s4641_s27  }
  0x22   : > { %s4532_s14 = scalar_lea.hbm %s5363_s3, 24576 }
  0x23   : > { %p4533_p9 = scmp.ne.s32.totalorder %s5363_s3, %s4532_s14  ;;  %p4539_p12 = scmp.lt.u32.totalorder %s4532_s14, %s5363_s3 }
  0x25   : > { %p4535_p10 = pnand %p4533_p9, %p4744_p7 }
  0x27   : > { %p4536_p11 = pneg %p4535_p10 }
  0x29   : > { %p4541_p13 = pnand %p4539_p12, %p4536_p11 }
  0x2b   : > { %4544 = shalt.err (!%p4541_p13)
}
  0x2c   : > { %s4545_s21 = scalar_lea.vmem %s4724_s23, 24576  ;;  %p4553_p6 = scmp.lt.s32.totalorder %s4724_s23, %s4724_s23 }
  0x2d   : > { %p4546_p0 = scmp.ne.s32.totalorder %s4724_s23, %s4545_s21  ;;  %p4554_p8 = scmp.lt.s32.totalorder %s4545_s21, %s4545_s21 }
  0x2f   : > { %p4548_p1 = pnand %p4546_p0, %p4744_p7  ;;  %p4555_p9 = por %p4554_p8, %p4553_p6 }
  0x31   : > { %p4549_p4 = pneg %p4548_p1 }
  0x33   : > { %p4556_p10 = pnand %p4555_p9, %p4549_p4 }
  0x35   : > { %4559 = shalt.err (!%p4556_p10)
}
  0x36   : > { %4461 = dma.hbm_to_vmem [thread:$0]  (!%p4728_p5), %s5363_s3, 24576, %s4724_s23, [#allocation3], %s4640_s25, %s4640_s25, %s4641_s27  }
  0x37   : > { %s4560_s13 = scalar_lea.hbm %s5367_s7, 24576 }
  0x38   : > { %p4561_p11 = scmp.ne.s32.totalorder %s5367_s7, %s4560_s13  ;;  %p4567_p0 = scmp.lt.u32.totalorder %s4560_s13, %s5367_s7 }
  0x3a   : > { %p4563_p12 = pnand %p4561_p11, %p4744_p7 }
  0x3c   : > { %p4564_p13 = pneg %p4563_p12 }
  0x3e   : > { %p4569_p1 = pnand %p4567_p0, %p4564_p13 }
  0x40   : > { %4572 = shalt.err (!%p4569_p1)
}
  0x41   : > { %s4573_s23 = scalar_lea.vmem %s4732_s26, 24576  ;;  %p4581_p9 = scmp.lt.s32.totalorder %s4732_s26, %s4732_s26 }
  0x42   : > { %p4574_p4 = scmp.ne.s32.totalorder %s4732_s26, %s4573_s23  ;;  %p4582_p10 = scmp.lt.s32.totalorder %s4573_s23, %s4573_s23 }
  0x44   : > { %p4576_p6 = pnand %p4574_p4, %p4744_p7  ;;  %p4583_p11 = por %p4582_p10, %p4581_p9 }
  0x46   : > { %p4577_p8 = pneg %p4576_p6 }
  0x48   : > { %p4584_p12 = pnand %p4583_p11, %p4577_p8 }
  0x4a   : > { %4587 = shalt.err (!%p4584_p12)
}
  0x4b   : > { %4467 = dma.hbm_to_vmem [thread:$0]  (!%p4728_p5), %s5367_s7, 24576, %s4732_s26, [#allocation5], %s4640_s25, %s4640_s25, %s4641_s27  }
  0x4c   : > { %s4588_s12 = scalar_lea.hbm %s5369_s9, 8192 }
  0x4d   : > { %p4589_p13 = scmp.ne.s32.totalorder %s5369_s9, %s4588_s12  ;;  %p4595_p4 = scmp.lt.u32.totalorder %s4588_s12, %s5369_s9 }
  0x4f   : > { %p4591_p0 = pnand %p4589_p13, %p4744_p7 }
  0x51   : > { %p4592_p1 = pneg %p4591_p0 }
  0x53   : > { %p4597_p6 = pnand %p4595_p4, %p4592_p1 }
  0x55   : > { %4600 = shalt.err (!%p4597_p6)
}
  0x56   : > { %s4601_s22 = scalar_lea.vmem %s358_s28, 8192  ;;  %p4609_p11 = scmp.lt.s32.totalorder %s358_s28, %s358_s28 }
  0x57   : > { %p4602_p8 = scmp.ne.s32.totalorder %s358_s28, %s4601_s22  ;;  %p4610_p12 = scmp.lt.s32.totalorder %s4601_s22, %s4601_s22 }
  0x59   : > { %p4604_p9 = pnand %p4602_p8, %p4744_p7  ;;  %p4611_p2 = por %p4610_p12, %p4609_p11 }
  0x5b   : > { %p4605_p10 = pneg %p4604_p9 }
  0x5d   : > { %p4612_p3 = pnand %p4611_p2, %p4605_p10 }
  0x5f   : > { %4615 = shalt.err (!%p4612_p3)
}
  0x60   : > { %s4642_s26 = smov 128   ;;  %s4643_s25 = smov 8  }
  0x61   : > { %4470 = dma.hbm_to_vmem [thread:$0]  (!%p4728_p5), %s5369_s9, 8192, %s358_s28, [#allocation8], %s4642_s26, %s4642_s26, %s4643_s25  }
  0x62   : > { %p5379_p13 = scmp.ne.s32.totalorder %s5376_s19, 0 }
  0x63   : > { %p5380_p0 = scmp.eq.s32.totalorder (!%p5379_p13), %s4711_s18, 0 }
  0x64   : > { %385 = sbr.rel (%p5379_p13) target bundleno = 3113 (0xc29), region = 64 }
  0x6b   : > { %4621 = dma.done.wait (%p5380_p0), [#allocation3], 24576   ;;  %p5381_p7 = pmov %p5380_p0 }
  0x6c   : > { %p5382_p2 = pmov %p5380_p0 }
  0x6d   : > { %4623 = vsyncadd (%p5381_p7), [#allocation3], 4294942720 }
  0x6e   : > { %4625 = dma.done.wait (%p5382_p2), [#allocation5], 49152   ;;  %p5383_p3 = pmov %p5380_p0 }
  0x6f   : > { %p5384_p1 = pmov %p5380_p0 }
  0x70   : > { %4627 = vsyncadd (%p5383_p3), [#allocation5], 4294918144 }
  0x71   : > { %4629 = dma.done.wait (%p5384_p1), [#allocation8], 8192   ;;  %p5385_p5 = pmov %p5380_p0 }
  0x72   : > { %s3490_s19 = sshll.u32 %s4711_s18, 2  ;;  %v448_v0 = vlaneseq  ;;  %v4644_v1 = vmov 0.0   ;;  %vm463_vm0 = vcmask 261120   ;;  %v665_v18 = vld [vmem:[%s5361_s1 + $0x108] sm:$0xff]  ;;  %v667_v19 = vld [vmem:[%s5361_s1 + $0x118] sm:$0xff]  ;;  %v664_v21 = vld [vmem:[%s5361_s1 + $0x100] sm:$0xff] }
  0x73   : > { %4631 = vsyncadd (%p5385_p5), [#allocation8], 4294959104  ;;  %p436_p4 = scmp.lt.s32.totalorder %s3490_s19, 7  ;;  %1318 = vmatprep.mubr.f32.mxu1 %v4644_v1  ;;  %v3666_v20 = vpack.c.bf16 %v667_v19, %v665_v18  ;;  %v666_v22 = vld [vmem:[%s5361_s1 + $0x110] sm:$0xff]  ;;  %v669_v23 = vld [vmem:[%s5361_s1 + $0x128] sm:$0xff]  ;;  %vm1114_vm11 = vcmask 130048  }
  0x74   : > { %v4855_v2 = vshrl.u32 %v448_v0, 7  ;;  %v4857_v3 = vand.u32 127, %v448_v0  ;;  %v671_v24 = vld [vmem:[%s5361_s1 + $0x138] sm:$0xff]  ;;  %v3668_v26 = vpack.c.bf16 %v666_v22, %v664_v21  ;;  %v668_v28 = vld [vmem:[%s5361_s1 + $0x120] sm:$0xff]  ;;  %v670_v29 = vld [vmem:[%s5361_s1 + $0x130] sm:$0xff]  ;;  %vm1791_vm14 = vcmask 64512  }
  0x75   : > { %s5388_s19 = smov (!%p436_p4, %s3490_s19), 7  ;;  %v3670_v27 = vpack.c.bf16 %v671_v24, %v669_v23  ;;  %v673_v30 = vld [vmem:[%s5361_s1 + $0x148] sm:$0xff]  ;;  %v675_v31 = vld [vmem:[%s5361_s1 + $0x158] sm:$0xff]  ;;  %v3672_v32 = vpack.c.bf16 %v670_v29, %v668_v28  ;;  %v672_v34 = vld [vmem:[%s5361_s1 + $0x140] sm:$0xff]  ;;  %p441_p6 = scmp.lt.s32.totalorder %s4711_s18, 1 }
  0x76   : > { %v4860_v4 = vmul.u32 2, %v4855_v2  ;;  %v450_v5 = vadd.s32 8, %v4855_v2  ;;  %s3491_s24 = sshll.u32 %s5388_s19, 3  ;;  %v3674_v33 = vpack.c.bf16 %v675_v31, %v673_v30  ;;  %v674_v35 = vld [vmem:[%s5361_s1 + $0x150] sm:$0xff]  ;;  %v677_v36 = vld [vmem:[%s5361_s1 + $0x168] sm:$0xff]  ;;  %v679_v37 = vld [vmem:[%s5361_s1 + $0x178] sm:$0xff] }
  0x77   : > { %s439_s21 = scalar_lea.vmem %s5360_s0, %s3491_s24  ;;  %v3676_v38 = vpack.c.bf16 %v674_v35, %v672_v34  ;;  %v3678_v39 = vpack.c.bf16 %v679_v37, %v677_v36  ;;  %v676_v40 = vld [vmem:[%s5361_s1 + $0x160] sm:$0xff]  ;;  %v678_v41 = vld [vmem:[%s5361_s1 + $0x170] sm:$0xff]  ;;  %v681_v42 = vld [vmem:[%s5361_s1 + $0x188] sm:$0xff]  ;;  %s5390_s18 = smov (!%p441_p6, %s4711_s18), 1 }
  0x78   : > { %v455_v6 = vadd.s32 4294967295, %v4860_v4  ;;  %v4867_v7 = vmul.u32 2, %v450_v5  ;;  %v444_v8 = vld [vmem:[%s439_s21] sm:$0xff]  ;;  %v445_v9 = vld [vmem:[%s439_s21 + $0x8] sm:$0xff]  ;;  %v446_v10 = vld [vmem:[%s439_s21 + $0x10] sm:$0xff]  ;;  %vm577_vm3 = vcmp.eq.s32.totalorder %v4857_v3, %v4860_v4  ;;  %v3680_v44 = vpack.c.bf16 %v678_v41, %v676_v40  ;;  %s443_s13 = scalar_lea.vmem %s5371_s11, %s5390_s18 }
  0x79   : > { %v4869_v11 = vpack.c.bf16 %v445_v9, %v444_v8  ;;  %v447_v12 = vld [vmem:[%s439_s21 + $0x18] sm:$0xff]  ;;  %v4890_v17 = vsel %vm577_vm3, 1.0, %v4644_v1  ;;  %v680_v46 = vld [vmem:[%s5361_s1 + $0x180] sm:$0xff]  ;;  %v682_v47 = vld [vmem:[%s5361_s1 + $0x190] sm:$0xff] }
  0x7a   : > { %vm457_vm1 = vcmp.eq.s32.totalorder %v4857_v3, %v455_v6  ;;  %v456_v13 = vadd.s32 4294967295, %v4867_v7  ;;  %v4873_v14 = vpack.c.bf16 %v447_v12, %v446_v10  ;;  %vm578_vm4 = vcmp.eq.s32.totalorder %v4857_v3, %v4867_v7  ;;  %v683_v43 = vld [vmem:[%s5361_s1 + $0x198] sm:$0xff]  ;;  %v685_v48 = vld [vmem:[%s5361_s1 + $0x1a8] sm:$0xff]  ;;  %v684_v52 = vld [vmem:[%s5361_s1 + $0x1a0] sm:$0xff] }
  0x7b   : > { %v4876_v15 = vsel %vm457_vm1, 1.0, %v4644_v1  ;;  %3651 = vmatprep.subr.bf16.mxu0 %v4869_v11  ;;  %v3497_v25 = vsel %vm578_vm4, 1.0, %v4644_v1  ;;  %v3682_v45 = vpack.c.bf16 %v683_v43, %v681_v42  ;;  %v687_v49 = vld [vmem:[%s5361_s1 + $0x1b8] sm:$0xff]  ;;  %v3684_v50 = vpack.c.bf16 %v682_v47, %v680_v46  ;;  %v686_v53 = vld [vmem:[%s5361_s1 + $0x1b0] sm:$0xff]  ;;  %v689_v55 = vld [vmem:[%s5361_s1 + $0x1c8] sm:$0xff] }
  0x7c   : > { %3625 = vmatprep.mubr.msk.f32.mxu0 %vm463_vm0, %v4876_v15  ;;  %3653 = vmatpush3.bf16.msra.mxu0 %v4869_v11  ;;  %vm458_vm2 = vcmp.eq.s32.totalorder %v4857_v3, %v456_v13  ;;  %v3686_v51 = vpack.c.bf16 %v687_v49, %v685_v48  ;;  %v3688_v54 = vpack.c.bf16 %v686_v53, %v684_v52  ;;  %v691_v56 = vld [vmem:[%s5361_s1 + $0x1d8] sm:$0xff]  ;;  %v688_v58 = vld [vmem:[%s5361_s1 + $0x1c0] sm:$0xff]  ;;  %v690_v59 = vld [vmem:[%s5361_s1 + $0x1d0] sm:$0xff]  ;;  %vm2471_vm1 = vcmask 1043456  }
  0x7d   : > { %3655 = vmatprep.subr.bf16.mxu0 %v4873_v14  ;;  %v3493_v16 = vsel %vm458_vm2, 1.0, %v4644_v1  ;;  %v3690_v57 = vpack.c.bf16 %v691_v56, %v689_v55  ;;  %v3692_v60 = vpack.c.bf16 %v690_v59, %v688_v58  ;;  %v693_v61 = vld [vmem:[%s5361_s1 + $0x1e8] sm:$0xff]  ;;  %v695_v62 = vld [vmem:[%s5361_s1 + $0x1f8] sm:$0xff]  ;;  %v692_v63 = vld [vmem:[%s5361_s1 + $0x1e0] sm:$0xff]  ;;  %vm2468_vm2 = vcmask 31744  }
  0x7e   : > { %v3694_v0 = vpack.c.bf16 %v695_v62, %v693_v61  ;;  %v694_v5 = vld [vmem:[%s5361_s1 + $0x1f0] sm:$0xff]  ;;  %v546_v8 = vld [vmem:[%s5361_s1 + $0x8] sm:$0xff]  ;;  %v548_v9 = vld [vmem:[%s5361_s1 + $0x18] sm:$0xff] }
  0x7f   : > { %v3696_v6 = vpack.c.bf16 %v694_v5, %v692_v63  ;;  %v3698_v10 = vpack.c.bf16 %v548_v9, %v546_v8  ;;  %v547_v18 = vld [vmem:[%s5361_s1 + $0x10] sm:$0xff]  ;;  %v550_v19 = vld [vmem:[%s5361_s1 + $0x28] sm:$0xff]  ;;  %v549_v24 = vld [vmem:[%s5361_s1 + $0x20] sm:$0xff]  ;;  %v851_v5 = vadd.s32 1, %v4867_v7 }
  0x80   : > { %3657 = vmatpush3.bf16.msra.mxu0 %v4873_v14  ;;  %v556_v28 = vld [vmem:[%s5361_s1 + $0x58] sm:$0xff]  ;;  %v553_v31 = vld [vmem:[%s5361_s1 + $0x40] sm:$0xff]  ;;  %v571_v56 = vld [vmem:[%s5361_s1 + $0xd0] sm:$0xff] }
  0x81   : > { %3659 = vmatprep.subr.bf16.mxu0 %v4869_v11  ;;  %v560_v34 = vld [vmem:[%s5361_s1 + $0x78] sm:$0xff]  ;;  %v557_v37 = vld [vmem:[%s5361_s1 + $0x60] sm:$0xff]  ;;  %v575_v62 = vld [vmem:[%s5361_s1 + $0xf0] sm:$0xff]  ;;  %vm853_vm6 = vcmp.eq.s32.totalorder %v4857_v3, %v851_v5 }
  0x82   : > { %v564_v40 = vld [vmem:[%s5361_s1 + $0x98] sm:$0xff]  ;;  %v561_v43 = vld [vmem:[%s5361_s1 + $0x80] sm:$0xff] }
  0x83   : > { %3626 = vmatmul.mubr.msk.f32.vlgmr.msra.gmra.mrb[0].mxu0 %vm463_vm0, %v3493_v16  ;;  %v545_v16 = vld [vmem:[%s5361_s1] sm:$0xff]  ;;  %v568_v46 = vld [vmem:[%s5361_s1 + $0xb8] sm:$0xff] }
  0x84   : > { %3661 = vmatpush3.bf16.msra.mxu0 %v4869_v11  ;;  %3636 = vmatprep.mubr.msk.f32.mxu0 %vm463_vm0, %v4890_v17  ;;  %v3700_v21 = vpack.c.bf16 %v547_v18, %v545_v16  ;;  %v565_v49 = vld [vmem:[%s5361_s1 + $0xa0] sm:$0xff]  ;;  %v572_v52 = vld [vmem:[%s5361_s1 + $0xd8] sm:$0xff]  ;;  %v3501_v16 = vsel %vm853_vm6, 1.0, %v4644_v1  ;;  %vm3365_vm6 = vcmp.le.s32.totalorder %v4857_v3, 10 }
  0x85   : > { %3663 = vmatprep.subr.bf16.mxu0 %v4873_v14  ;;  %v569_v55 = vld [vmem:[%s5361_s1 + $0xc0] sm:$0xff]  ;;  %v576_v58 = vld [vmem:[%s5361_s1 + $0xf8] sm:$0xff] }
  0x86   : > { %v3724_v59 = vpack.c.bf16 %v571_v56, %v569_v55  ;;  %v573_v61 = vld [vmem:[%s5361_s1 + $0xe0] sm:$0xff]  ;;  %v942_v8 = vld [vmem:[%s5361_s1 + $0x218] sm:$0xff]  ;;  %v969_v55 = vld [vmem:[%s5361_s1 + $0x2f0] sm:$0xff] }
  0x87   : > { %v3728_v63 = vpack.c.bf16 %v575_v62, %v573_v61  ;;  %v939_v9 = vld [vmem:[%s5361_s1 + $0x200] sm:$0xff] }
  0x88   : > { %3665 = vmatpush3.bf16.msra.mxu0 %v4873_v14  ;;  %v1052_v61 = vld [vmem:[%s5362_s2] ss:$4 sm:$0x3] }
  0x89   : > { %3667 = vmatprep.subr.bf16.mxu0 %v3666_v20  ;;  %v552_v20 = vld [vmem:[%s5361_s1 + $0x38] sm:$0xff] }
  0x8a   : > { %v3702_v23 = vpack.c.bf16 %v552_v20, %v550_v19  ;;  %v943_v20 = vld [vmem:[%s5361_s1 + $0x220] sm:$0xff] }
  0x8b   : > { %3637 = vmatmul.mubr.msk.f32.vlgmr.msra.gmra.mrb[2].mxu0 %vm463_vm0, %v3497_v25  ;;  %v551_v25 = vld [vmem:[%s5361_s1 + $0x30] sm:$0xff] }
  0x8c   : > { %3669 = vmatpush1.bf16.msra.mxu0 %v3668_v26  ;;  %760 = vmatprep.mubr.f32.mxu0 %v4644_v1  ;;  %v3704_v29 = vpack.c.bf16 %v551_v25, %v549_v24  ;;  %v947_v24 = vld [vmem:[%s5361_s1 + $0x240] sm:$0xff]  ;;  %v949_v25 = vld [vmem:[%s5361_s1 + $0x250] sm:$0xff] }
  0x8d   : > { %3671 = vmatprep.subr.bf16.mxu0 %v3670_v27  ;;  %v554_v27 = vld [vmem:[%s5361_s1 + $0x48] sm:$0xff] }
  0x8e   : > { %v3706_v30 = vpack.c.bf16 %v556_v28, %v554_v27  ;;  %v954_v27 = vld [vmem:[%s5361_s1 + $0x278] sm:$0xff]  ;;  %v3748_v28 = vpack.c.bf16 %v949_v25, %v947_v24 }
  0x90   : > { %3673 = vmatpush1.bf16.msra.mxu0 %v3672_v32  ;;  %v555_v32 = vld [vmem:[%s5361_s1 + $0x50] sm:$0xff] }
  0x91   : > { %3675 = vmatprep.subr.bf16.mxu0 %v3674_v33  ;;  %v558_v33 = vld [vmem:[%s5361_s1 + $0x68] sm:$0xff]  ;;  %v3708_v35 = vpack.c.bf16 %v555_v32, %v553_v31  ;;  %v953_v31 = vld [vmem:[%s5361_s1 + $0x270] sm:$0xff] }
  0x92   : > { %v3710_v36 = vpack.c.bf16 %v560_v34, %v558_v33  ;;  %v956_v32 = vld [vmem:[%s5361_s1 + $0x288] sm:$0xff]  ;;  %v958_v33 = vld [vmem:[%s5361_s1 + $0x298] sm:$0xff] }
  0x94   : > { %3677 = vmatpush1.bf16.msra.mxu0 %v3676_v38  ;;  %v559_v38 = vld [vmem:[%s5361_s1 + $0x70] sm:$0xff] }
  0x95   : > { %3679 = vmatprep.subr.bf16.mxu0 %v3678_v39  ;;  %v562_v39 = vld [vmem:[%s5361_s1 + $0x88] sm:$0xff]  ;;  %v3712_v41 = vpack.c.bf16 %v559_v38, %v557_v37  ;;  %v957_v37 = vld [vmem:[%s5361_s1 + $0x290] sm:$0xff] }
  0x96   : > { %v3714_v42 = vpack.c.bf16 %v564_v40, %v562_v39  ;;  %v960_v38 = vld [vmem:[%s5361_s1 + $0x2a8] sm:$0xff]  ;;  %v962_v39 = vld [vmem:[%s5361_s1 + $0x2b8] sm:$0xff] }
  0x98   : > { %3681 = vmatpush1.bf16.msra.mxu0 %v3680_v44  ;;  %v563_v44 = vld [vmem:[%s5361_s1 + $0x90] sm:$0xff] }
  0x99   : > { %3683 = vmatprep.subr.bf16.mxu0 %v3682_v45  ;;  %v566_v45 = vld [vmem:[%s5361_s1 + $0xa8] sm:$0xff]  ;;  %v3716_v47 = vpack.c.bf16 %v563_v44, %v561_v43  ;;  %v961_v43 = vld [vmem:[%s5361_s1 + $0x2b0] sm:$0xff] }
  0x9a   : > { %v3718_v48 = vpack.c.bf16 %v568_v46, %v566_v45  ;;  %v964_v44 = vld [vmem:[%s5361_s1 + $0x2c8] sm:$0xff]  ;;  %v966_v45 = vld [vmem:[%s5361_s1 + $0x2d8] sm:$0xff] }
  0x9c   : > { %3685 = vmatpush1.bf16.msra.mxu0 %v3684_v50  ;;  %v567_v50 = vld [vmem:[%s5361_s1 + $0xb0] sm:$0xff] }
  0x9d   : > { %3687 = vmatprep.subr.bf16.mxu0 %v3686_v51  ;;  %v570_v51 = vld [vmem:[%s5361_s1 + $0xc8] sm:$0xff]  ;;  %v3720_v53 = vpack.c.bf16 %v567_v50, %v565_v49  ;;  %v965_v49 = vld [vmem:[%s5361_s1 + $0x2d0] sm:$0xff] }
  0x9e   : > { %v968_v50 = vld [vmem:[%s5361_s1 + $0x2e8] sm:$0xff] }
  0xa0   : > { %3689 = vmatpush1.bf16.msra.mxu0 %v3688_v54  ;;  %v3722_v54 = vpack.c.bf16 %v572_v52, %v570_v51  ;;  %v970_v51 = vld [vmem:[%s5361_s1 + $0x2f8] sm:$0xff] }
  0xa1   : > { %3691 = vmatprep.subr.bf16.mxu0 %v3690_v57  ;;  %v574_v57 = vld [vmem:[%s5361_s1 + $0xe8] sm:$0xff] }
  0xa4   : > { %3693 = vmatpush1.bf16.msra.mxu0 %v3692_v60  ;;  %v3726_v60 = vpack.c.bf16 %v576_v58, %v574_v57 }
  0xa5   : > { %3695 = vmatprep.subr.bf16.mxu0 %v3694_v0  ;;  %v850_v0 = vadd.s32 1, %v4860_v4 }
  0xa7   : > { %vm852_vm5 = vcmp.eq.s32.totalorder %v4857_v3, %v850_v0 }
  0xa8   : > { %3697 = vmatpush1.bf16.msra.mxu0 %v3696_v6  ;;  %v940_v6 = vld [vmem:[%s5361_s1 + $0x208] sm:$0xff]  ;;  %v5116_v4 = vsel %vm852_vm5, 1.0, %v4644_v1  ;;  %vm3364_vm5 = vcmp.ge.s32.totalorder %v4857_v3, 1 }
  0xa9   : > { %3699 = vmatprep.subr.bf16.mxu0 %v3698_v10  ;;  %v3738_v7 = vpack.c.bf16 %v942_v8, %v940_v6  ;;  %v941_v10 = vld [vmem:[%s5361_s1 + $0x210] sm:$0xff]  ;;  %v3504_v6 = vld [vmem:[%s5362_s2 + $0x1] ss:$4 sm:$0x3] }
  0xaa   : > { %v3740_v18 = vpack.c.bf16 %v941_v10, %v939_v9 }
 0x156   : > { %v5005_v12 = vpop.f32.mrb[0].mxu0 }
 0x157   : > { %v5007_v13 = vpop.f32.mrb[1].mxu0 }
 0x15e   : > { %v3638_v22 = vpop.f32.mrb[2].mxu0 }
 0x15f   : > { %v655_v26 = vpop.f32.mrb[3].mxu0 }
 0x160   : > { %761 = vmatmul.mubr.f32.vlgmr.msra.gmra.mrb[4].mxu0 %v655_v26  ;;  %v952_v26 = vld [vmem:[%s5361_s1 + $0x268] sm:$0xff] }
 0x161   : > { %3701 = vmatpush1.bf16.msra.mxu0 %v3700_v21  ;;  %766 = vmatprep.mubr.f32.mxu0 %v4644_v1  ;;  %v945_v21 = vld [vmem:[%s5361_s1 + $0x230] sm:$0xff] }
 0x162   : > { %3703 = vmatprep.subr.bf16.mxu0 %v3702_v23 }
 0x164   : > { %767 = vmatmul.mubr.f32.gmra.mrb[6].mxu0 %v3638_v22  ;;  %v3744_v22 = vpack.c.bf16 %v945_v21, %v943_v20 }
 0x165   : > { %3705 = vmatpush1.bf16.msra.mxu0 %v3704_v29  ;;  %837 = vmatprep.mubr.f32.mxu0 %v4644_v1  ;;  %v3750_v29 = vpack.c.bf16 %v954_v27, %v952_v26 }
 0x166   : > { %3707 = vmatprep.subr.bf16.mxu0 %v3706_v30  ;;  %v951_v30 = vld [vmem:[%s5361_s1 + $0x260] sm:$0xff] }
 0x167   : > { %v3752_v34 = vpack.c.bf16 %v953_v31, %v951_v30 }
 0x169   : > { %3709 = vmatpush1.bf16.msra.mxu0 %v3708_v35  ;;  %v3754_v35 = vpack.c.bf16 %v958_v33, %v956_v32  ;;  %v1326_v33 = vld [vmem:[#allocation2 + $0x208] sm:$0xff] }
 0x16a   : > { %3711 = vmatprep.subr.bf16.mxu0 %v3710_v36  ;;  %v955_v36 = vld [vmem:[%s5361_s1 + $0x280] sm:$0xff] }
 0x16b   : > { %v3756_v40 = vpack.c.bf16 %v957_v37, %v955_v36 }
 0x16d   : > { %3713 = vmatpush1.bf16.msra.mxu0 %v3712_v41  ;;  %v3758_v41 = vpack.c.bf16 %v962_v39, %v960_v38 }
 0x16e   : > { %3715 = vmatprep.subr.bf16.mxu0 %v3714_v42  ;;  %v959_v42 = vld [vmem:[%s5361_s1 + $0x2a0] sm:$0xff] }
 0x16f   : > { %v3760_v46 = vpack.c.bf16 %v961_v43, %v959_v42  ;;  %v1330_v42 = vld [vmem:[#allocation2 + $0x228] sm:$0xff]  ;;  %v1332_v43 = vld [vmem:[#allocation2 + $0x238] sm:$0xff] }
 0x171   : > { %3717 = vmatpush1.bf16.msra.mxu0 %v3716_v47  ;;  %v3762_v47 = vpack.c.bf16 %v966_v45, %v964_v44  ;;  %v3782_v45 = vpack.c.bf16 %v1332_v43, %v1330_v42  ;;  %v1365_v43 = vld [vmem:[#allocation2 + $0x340] sm:$0xff] }
 0x172   : > { %3719 = vmatprep.subr.bf16.mxu0 %v3718_v48  ;;  %v963_v48 = vld [vmem:[%s5361_s1 + $0x2c0] sm:$0xff] }
 0x173   : > { %v3764_v52 = vpack.c.bf16 %v965_v49, %v963_v48  ;;  %v1334_v48 = vld [vmem:[#allocation2 + $0x248] sm:$0xff]  ;;  %v1336_v49 = vld [vmem:[#allocation2 + $0x258] sm:$0xff] }
 0x175   : > { %3721 = vmatpush1.bf16.msra.mxu0 %v3720_v53  ;;  %v3766_v53 = vpack.c.bf16 %v970_v51, %v968_v50  ;;  %v3786_v51 = vpack.c.bf16 %v1336_v49, %v1334_v48  ;;  %v1369_v49 = vld [vmem:[#allocation2 + $0x360] sm:$0xff] }
 0x176   : > { %3723 = vmatprep.subr.bf16.mxu0 %v3722_v54  ;;  %v967_v54 = vld [vmem:[%s5361_s1 + $0x2e0] sm:$0xff] }
 0x177   : > { %v3768_v56 = vpack.c.bf16 %v969_v55, %v967_v54  ;;  %v1338_v54 = vld [vmem:[#allocation2 + $0x268] sm:$0xff]  ;;  %v1340_v55 = vld [vmem:[#allocation2 + $0x278] sm:$0xff] }
 0x179   : > { %3725 = vmatpush1.bf16.msra.mxu0 %v3724_v59  ;;  %v5219_v59 = vsub.s32 0, %v4855_v2 }
 0x17a   : > { %3727 = vmatprep.subr.bf16.mxu0 %v3726_v60  ;;  %v5222_v60 = vsub.s32 1, %v4855_v2 }
 0x17b   : > { %v1057_v62 = vrot.slane %v1052_v61, %v5219_v59  ;;  %v1086_v2 = vrot.slane %v3504_v6, %v5219_v59 }
 0x17d   : > { %3729 = vmatpush1.bf16.msra.mxu0 %v3728_v63  ;;  %v1061_v63 = vrot.slane %v1052_v61, %v5222_v60  ;;  %v1339_v61 = vld [vmem:[#allocation2 + $0x270] sm:$0xff] }
 0x17e   : > { %3731 = vmatprep.subr.bf16.mxu0 %v4869_v11 }
 0x180   : > { %838 = vmatmul.mubr.f32.vlgmr.msra.gmra.mrb[4].mxu0 %v5007_v13  ;;  %v946_v13 = vld [vmem:[%s5361_s1 + $0x238] sm:$0xff] }
 0x181   : > { %3733 = vmatpush3.bf16.msra.mxu0 %v4869_v11  ;;  %843 = vmatprep.mubr.f32.mxu0 %v4644_v1  ;;  %v944_v11 = vld [vmem:[%s5361_s1 + $0x228] sm:$0xff] }
 0x182   : > { %3735 = vmatprep.subr.bf16.mxu0 %v4873_v14  ;;  %v3742_v19 = vpack.c.bf16 %v946_v13, %v944_v11 }
 0x184   : > { %844 = vmatmul.mubr.f32.gmra.mrb[6].mxu0 %v5005_v12  ;;  %v950_v12 = vld [vmem:[%s5361_s1 + $0x258] sm:$0xff] }
 0x185   : > { %3737 = vmatpush3.bf16.msra.mxu0 %v4873_v14  ;;  %3647 = vmatprep.mubr.msk.f32.mxu0 %vm463_vm0, %v5116_v4  ;;  %v948_v14 = vld [vmem:[%s5361_s1 + $0x248] sm:$0xff] }
 0x186   : > { %3739 = vmatprep.subr.bf16.mxu0 %v3738_v7  ;;  %v3746_v23 = vpack.c.bf16 %v950_v12, %v948_v14 }
 0x188   : > { %3648 = vmatmul.mubr.msk.f32.vlgmr.msra.gmra.mrb[8].mxu0 %vm463_vm0, %v3501_v16  ;;  %v3505_v16 = vld [vmem:[%s5362_s2 + $0x2] ss:$4 sm:$0x3] }
 0x189   : > { %3741 = vmatpush1.bf16.msra.mxu0 %v3740_v18  ;;  %1035 = vmatprep.mubr.f32.mxu0 %v4644_v1  ;;  %v1090_v18 = vrot.slane %v3504_v6, %v5222_v60  ;;  %v1107_v27 = vrot.slane %v3505_v16, %v5222_v60  ;;  %v1341_v6 = vld [vmem:[#allocation2 + $0x280] sm:$0xff] }
 0x18a   : > { %3743 = vmatprep.subr.bf16.mxu0 %v3742_v19 }
 0x18d   : > { %3745 = vmatpush1.bf16.msra.mxu0 %v3744_v22 }
 0x18e   : > { %3747 = vmatprep.subr.bf16.mxu0 %v3746_v23  ;;  %v1103_v23 = vrot.slane %v3505_v16, %v5219_v59  ;;  %v1350_v16 = vld [vmem:[#allocation2 + $0x2c8] sm:$0xff] }
 0x191   : > { %3749 = vmatpush1.bf16.msra.mxu0 %v3748_v28 }
 0x192   : > { %3751 = vmatprep.subr.bf16.mxu0 %v3750_v29 }
 0x195   : > { %3753 = vmatpush1.bf16.msra.mxu0 %v3752_v34  ;;  %v1328_v34 = vld [vmem:[#allocation2 + $0x218] sm:$0xff] }
 0x196   : > { %3755 = vmatprep.subr.bf16.mxu0 %v3754_v35  ;;  %v3778_v39 = vpack.c.bf16 %v1328_v34, %v1326_v33  ;;  %v1362_v33 = vld [vmem:[#allocation2 + $0x328] sm:$0xff]  ;;  %v1364_v34 = vld [vmem:[#allocation2 + $0x338] sm:$0xff] }
 0x199   : > { %3757 = vmatpush1.bf16.msra.mxu0 %v3756_v40  ;;  %v1325_v40 = vld [vmem:[#allocation2 + $0x200] sm:$0xff] }
 0x19a   : > { %3759 = vmatprep.subr.bf16.mxu0 %v3758_v41  ;;  %v1327_v41 = vld [vmem:[#allocation2 + $0x210] sm:$0xff] }
 0x19b   : > { %v3780_v44 = vpack.c.bf16 %v1327_v41, %v1325_v40  ;;  %v1368_v40 = vld [vmem:[#allocation2 + $0x358] sm:$0xff] }
 0x19d   : > { %3761 = vmatpush1.bf16.msra.mxu0 %v3760_v46  ;;  %v1329_v46 = vld [vmem:[#allocation2 + $0x220] sm:$0xff] }
 0x19e   : > { %3763 = vmatprep.subr.bf16.mxu0 %v3762_v47  ;;  %v1331_v47 = vld [vmem:[#allocation2 + $0x230] sm:$0xff] }
 0x19f   : > { %v3784_v50 = vpack.c.bf16 %v1331_v47, %v1329_v46  ;;  %v1372_v46 = vld [vmem:[#allocation2 + $0x378] sm:$0xff] }
 0x1a1   : > { %3765 = vmatpush1.bf16.msra.mxu0 %v3764_v52  ;;  %v1333_v52 = vld [vmem:[#allocation2 + $0x240] sm:$0xff] }
 0x1a2   : > { %3767 = vmatprep.subr.bf16.mxu0 %v3766_v53  ;;  %v1335_v53 = vld [vmem:[#allocation2 + $0x250] sm:$0xff] }
 0x1a5   : > { %3769 = vmatpush1.bf16.msra.mxu0 %v3768_v56  ;;  %v3788_v56 = vpack.c.bf16 %v1335_v53, %v1333_v52  ;;  %v1376_v52 = vld [vmem:[#allocation2 + $0x398] sm:$0xff] }
 0x25b   : > { %v3649_v57 = vpop.f32.mrb[8].mxu0 }
 0x25c   : > { %v930_v58 = vpop.f32.mrb[9].mxu0 }
 0x25d   : > { %1036 = vmatmul.mubr.f32.vlgmr.msra.gmra.mrb[4].mxu0 %v930_v58  ;;  %v1337_v58 = vld [vmem:[#allocation2 + $0x260] sm:$0xff] }
 0x25e   : > { %1041 = vmatprep.mubr.f32.mxu0 %v4644_v1 }
 0x261   : > { %1042 = vmatmul.mubr.f32.gmra.mrb[6].mxu0 %v3649_v57  ;;  %v3790_v57 = vpack.c.bf16 %v1340_v55, %v1338_v54  ;;  %v1373_v55 = vld [vmem:[#allocation2 + $0x380] sm:$0xff] }
 0x262   : > { %1181 = vmatprep.mubr.f32.mxu0 %v4644_v1 }
 0x330   : > { %v1037_v0 = vpop.f32.mrb[4].mxu0 }
 0x331   : > { %v1064_v5 = vadd.f32 %v1057_v62, %v1037_v0  ;;  %v1039_v8 = vpop.f32.mrb[5].mxu0  ;;  %v3792_v0 = vpack.c.bf16 %v1339_v61, %v1337_v58  ;;  %v1380_v58 = vld [vmem:[#allocation2 + $0x3b8] sm:$0xff] }
 0x332   : > { %v1065_v7 = vadd.f32 %v1061_v63, %v1039_v8  ;;  %v1343_v8 = vld [vmem:[#allocation2 + $0x290] sm:$0xff] }
 0x333   : > { %vm1068_vm7 = vcmp.ge.f32.partialorder %v1064_v5, 0.0  ;;  %v1072_v9 = vmul.f32 0.2, %v1064_v5 }
 0x334   : > { %vm1069_vm8 = vcmp.ge.f32.partialorder %v1065_v7, 0.0  ;;  %v1073_v10 = vmul.f32 0.2, %v1065_v7  ;;  %v1043_v11 = vpop.f32.mrb[6].mxu0 }
 0x335   : > { %v1076_v13 = vsel %vm1068_vm7, %v1064_v5, %v1072_v9  ;;  %v1066_v19 = vadd.f32 %v1057_v62, %v1043_v11  ;;  %v1045_v20 = vpop.f32.mrb[7].mxu0  ;;  %v1342_v62 = vld [vmem:[#allocation2 + $0x288] sm:$0xff]  ;;  %v1348_v9 = vld [vmem:[#allocation2 + $0x2b8] sm:$0xff]  ;;  %v1345_v11 = vld [vmem:[#allocation2 + $0x2a0] sm:$0xff] }
 0x336   : > { %v1077_v21 = vsel %vm1069_vm8, %v1065_v7, %v1073_v10  ;;  %v1067_v14 = vadd.f32 %v1061_v63, %v1045_v20  ;;  %v1093_v22 = vmul.f32 %v1086_v2, %v1076_v13  ;;  %v1344_v63 = vld [vmem:[#allocation2 + $0x298] sm:$0xff]  ;;  %v1346_v7 = vld [vmem:[#allocation2 + $0x2a8] sm:$0xff]  ;;  %v1347_v13 = vld [vmem:[#allocation2 + $0x2b0] sm:$0xff]  ;;  %vm3368_vm8 = vcmask 1040384  }
 0x337   : > { %vm1070_vm9 = vcmp.ge.f32.partialorder %v1066_v19, 0.0  ;;  %v1074_v12 = vmul.f32 0.2, %v1066_v19  ;;  %v1094_v25 = vmul.f32 %v1090_v18, %v1077_v21  ;;  %v3794_v5 = vpack.c.bf16 %v1344_v63, %v1342_v62  ;;  %v1349_v21 = vld [vmem:[#allocation2 + $0x2c0] sm:$0xff]  ;;  %vm3366_vm7 = vmand %vm3364_vm5, %vm3365_vm6 }
 0x338   : > { %vm1071_vm10 = vcmp.ge.f32.partialorder %v1067_v14, 0.0  ;;  %v1075_v24 = vmul.f32 0.2, %v1067_v14  ;;  %v1110_v31 = vadd.f32 %v1103_v23, %v1093_v22  ;;  %v3798_v10 = vpack.c.bf16 %v1348_v9, %v1346_v7  ;;  %v1356_v22 = vld [vmem:[#allocation2 + $0x2f8] sm:$0xff]  ;;  %v1377_v63 = vld [vmem:[#allocation2 + $0x3a0] sm:$0xff] }
 0x339   : > { %v1078_v26 = vsel %vm1070_vm9, %v1066_v19, %v1074_v12  ;;  %v1111_v35 = vadd.f32 %v1107_v27, %v1094_v25  ;;  %v3800_v19 = vpack.c.bf16 %v1347_v13, %v1345_v11  ;;  %v1354_v12 = vld [vmem:[#allocation2 + $0x2e8] sm:$0xff]  ;;  %v1353_v25 = vld [vmem:[#allocation2 + $0x2e0] sm:$0xff]  ;;  %v1388_v11 = vld [vmem:[#allocation2 + $0x3f8] sm:$0xff]  ;;  %vm3385_vm9 = vcmp.eq.s32.totalorder %v4857_v3, 0 }
 0x33a   : > { %v1095_v28 = vmul.f32 %v1086_v2, %v1078_v26  ;;  %v1079_v29 = vsel %vm1071_vm10, %v1067_v14, %v1075_v24  ;;  %v3796_v2 = vpack.c.bf16 %v1343_v8, %v1341_v6  ;;  %v1351_v14 = vld [vmem:[#allocation2 + $0x2d0] sm:$0xff]  ;;  %v3806_v24 = vpack.c.bf16 %v1356_v22, %v1354_v12  ;;  %v1384_v6 = vld [vmem:[#allocation2 + $0x3d8] sm:$0xff]  ;;  %v1381_v9 = vld [vmem:[#allocation2 + $0x3c0] sm:$0xff] }
 0x33b   : > { %v1096_v30 = vmul.f32 %v1090_v18, %v1079_v29  ;;  %v1352_v18 = vld [vmem:[#allocation2 + $0x2d8] sm:$0xff]  ;;  %v1355_v26 = vld [vmem:[#allocation2 + $0x2f0] sm:$0xff]  ;;  %v1188_v22 = vld [vmem:[#allocation2] sm:$0xff] }
 0x33c   : > { %v1112_v32 = vadd.f32 %v1103_v23, %v1095_v28  ;;  %v3802_v20 = vpack.c.bf16 %v1352_v18, %v1350_v16  ;;  %v3804_v23 = vpack.c.bf16 %v1351_v14, %v1349_v21  ;;  %v1360_v28 = vld [vmem:[#allocation2 + $0x318] sm:$0xff]  ;;  %v3808_v29 = vpack.c.bf16 %v1355_v26, %v1353_v25  ;;  %v1385_v18 = vld [vmem:[#allocation2 + $0x3e0] sm:$0xff]  ;;  %v1189_v21 = vld [vmem:[#allocation2 + $0x8] sm:$0xff] }
 0x33d   : > { %v1113_v36 = vadd.f32 %v1107_v27, %v1096_v30  ;;  %v1358_v27 = vld [vmem:[#allocation2 + $0x308] sm:$0xff]  ;;  %v1191_v14 = vld [vmem:[#allocation2 + $0x18] sm:$0xff] }
 0x33e   : > { %v3772_v37 = vpack.c.bf16 %v1112_v32, %v1110_v31  ;;  %v3810_v30 = vpack.c.bf16 %v1360_v28, %v1358_v27  ;;  %v1357_v31 = vld [vmem:[#allocation2 + $0x300] sm:$0xff]  ;;  %v1359_v32 = vld [vmem:[#allocation2 + $0x310] sm:$0xff]  ;;  %v3842_v12 = vpack.c.bf16 %v1191_v14, %v1189_v21  ;;  %v1195_v25 = vld [vmem:[#allocation2 + $0x38] sm:$0xff] }
 0x33f   : > { %v3770_v38 = vpack.c.bf16 %v1113_v36, %v1111_v35  ;;  %v3812_v35 = vpack.c.bf16 %v1359_v32, %v1357_v31  ;;  %v3814_v36 = vpack.c.bf16 %v1364_v34, %v1362_v33  ;;  %v1192_v31 = vld [vmem:[#allocation2 + $0x20] sm:$0xff]  ;;  %v1194_v32 = vld [vmem:[#allocation2 + $0x30] sm:$0xff]  ;;  %v1197_v34 = vld [vmem:[#allocation2 + $0x48] sm:$0xff] }
 0x340   : > { %v1220_v21 = vld [vmem:[#allocation2 + $0x100] sm:$0xff]  ;;  %v1222_v14 = vld [vmem:[#allocation2 + $0x110] sm:$0xff] }
 0x341   : > { %3771 = vmatprep.subr.bf16.mxu0 %v3770_v38  ;;  %3775 = vmatprep.subr.bf16.mxu1 %v3770_v38 }
 0x342   : > { %3773 = vmatpush1.bf16.msra.mxu0 %v3772_v37  ;;  %3777 = vmatpush1.bf16.msra.mxu1 %v3772_v37 }
 0x343   : > { %3907 = vmatprep.subr.bf16.mxu0 %v3770_v38  ;;  %3779 = vmatprep.subr.bf16.mxu1 %v3778_v39  ;;  %v1363_v38 = vld [vmem:[#allocation2 + $0x330] sm:$0xff]  ;;  %v1366_v39 = vld [vmem:[#allocation2 + $0x348] sm:$0xff] }
 0x344   : > { %v3818_v42 = vpack.c.bf16 %v1368_v40, %v1366_v39  ;;  %v1196_v39 = vld [vmem:[#allocation2 + $0x40] sm:$0xff]  ;;  %v1198_v40 = vld [vmem:[#allocation2 + $0x50] sm:$0xff] }
 0x345   : > { %3507 = vmatmul.mubr.msk.f32.vlgmr.msra.gmra.mrb[0].mxu1 %vm1114_vm11, %v4890_v17  ;;  %3506 = vmatmul.mubr.msk.f32.vlgmr.msra.gmra.mrb[10].mxu0 %vm1114_vm11, %v4876_v15 }
 0x346   : > { %3909 = vmatpush1.bf16.msra.mxu0 %v3772_v37  ;;  %1597 = vmatprep.mubr.f32.mxu0 %v4644_v1  ;;  %v1361_v37 = vld [vmem:[#allocation2 + $0x320] sm:$0xff] }
 0x347   : > { %3781 = vmatpush1.bf16.msra.mxu1 %v3780_v44  ;;  %v3816_v41 = vpack.c.bf16 %v1363_v38, %v1361_v37  ;;  %v1367_v44 = vld [vmem:[#allocation2 + $0x350] sm:$0xff] }
 0x348   : > { %3783 = vmatprep.subr.bf16.mxu1 %v3782_v45  ;;  %v1370_v45 = vld [vmem:[#allocation2 + $0x368] sm:$0xff]  ;;  %v3820_v47 = vpack.c.bf16 %v1367_v44, %v1365_v43  ;;  %v1203_v43 = vld [vmem:[#allocation2 + $0x78] sm:$0xff]  ;;  %v3852_v44 = vpack.c.bf16 %v1198_v40, %v1196_v39  ;;  %v1232_v39 = vld [vmem:[#allocation2 + $0x160] sm:$0xff] }
 0x349   : > { %3508 = vmatmul.mubr.msk.f32.vlgmr.msra.gmra.mrb[12].mxu0 %vm1114_vm11, %v5116_v4  ;;  %v3822_v48 = vpack.c.bf16 %v1372_v46, %v1370_v45  ;;  %v1200_v46 = vld [vmem:[#allocation2 + $0x60] sm:$0xff]  ;;  %v1234_v40 = vld [vmem:[#allocation2 + $0x170] sm:$0xff] }
 0x34a   : > { %1858 = vmatprep.mubr.f32.mxu0 %v4644_v1 }
 0x34b   : > { %3785 = vmatpush1.bf16.msra.mxu1 %v3784_v50  ;;  %v1371_v50 = vld [vmem:[#allocation2 + $0x370] sm:$0xff] }
 0x34c   : > { %3787 = vmatprep.subr.bf16.mxu1 %v3786_v51  ;;  %v1374_v51 = vld [vmem:[#allocation2 + $0x388] sm:$0xff]  ;;  %v3824_v53 = vpack.c.bf16 %v1371_v50, %v1369_v49  ;;  %v1207_v49 = vld [vmem:[#allocation2 + $0x98] sm:$0xff] }
 0x34d   : > { %v3826_v54 = vpack.c.bf16 %v1376_v52, %v1374_v51  ;;  %v1204_v52 = vld [vmem:[#allocation2 + $0x80] sm:$0xff] }
 0x34f   : > { %3789 = vmatpush1.bf16.msra.mxu1 %v3788_v56  ;;  %v1375_v56 = vld [vmem:[#allocation2 + $0x390] sm:$0xff] }
 0x350   : > { %3791 = vmatprep.subr.bf16.mxu1 %v3790_v57  ;;  %v1378_v57 = vld [vmem:[#allocation2 + $0x3a8] sm:$0xff]  ;;  %v3828_v61 = vpack.c.bf16 %v1375_v56, %v1373_v55  ;;  %v1211_v55 = vld [vmem:[#allocation2 + $0xb8] sm:$0xff] }
 0x351   : > { %v3830_v62 = vpack.c.bf16 %v1380_v58, %v1378_v57  ;;  %v1208_v58 = vld [vmem:[#allocation2 + $0xa0] sm:$0xff] }
 0x353   : > { %3793 = vmatpush1.bf16.msra.mxu1 %v3792_v0  ;;  %v1379_v0 = vld [vmem:[#allocation2 + $0x3b0] sm:$0xff] }
 0x354   : > { %3795 = vmatprep.subr.bf16.mxu1 %v3794_v5  ;;  %v1382_v5 = vld [vmem:[#allocation2 + $0x3c8] sm:$0xff]  ;;  %v3832_v8 = vpack.c.bf16 %v1379_v0, %v1377_v63  ;;  %v1215_v63 = vld [vmem:[#allocation2 + $0xd8] sm:$0xff] }
 0x355   : > { %v3834_v7 = vpack.c.bf16 %v1384_v6, %v1382_v5  ;;  %v1212_v6 = vld [vmem:[#allocation2 + $0xc0] sm:$0xff] }
 0x357   : > { %3797 = vmatpush1.bf16.msra.mxu1 %v3796_v2  ;;  %v1383_v2 = vld [vmem:[#allocation2 + $0x3d0] sm:$0xff] }
 0x358   : > { %3799 = vmatprep.subr.bf16.mxu1 %v3798_v10  ;;  %v1386_v10 = vld [vmem:[#allocation2 + $0x3e8] sm:$0xff]  ;;  %v3836_v13 = vpack.c.bf16 %v1383_v2, %v1381_v9  ;;  %v1219_v9 = vld [vmem:[#allocation2 + $0xf8] sm:$0xff] }
 0x359   : > { %v3838_v16 = vpack.c.bf16 %v1388_v11, %v1386_v10  ;;  %v1216_v11 = vld [vmem:[#allocation2 + $0xe0] sm:$0xff] }
 0x35b   : > { %3801 = vmatpush1.bf16.msra.mxu1 %v3800_v19  ;;  %v1387_v19 = vld [vmem:[#allocation2 + $0x3f0] sm:$0xff] }
 0x35c   : > { %3803 = vmatprep.subr.bf16.mxu1 %v3802_v20  ;;  %v3840_v20 = vpack.c.bf16 %v1387_v19, %v1385_v18  ;;  %v1223_v18 = vld [vmem:[#allocation2 + $0x118] sm:$0xff] }
 0x35f   : > { %3805 = vmatpush1.bf16.msra.mxu1 %v3804_v23  ;;  %v1190_v23 = vld [vmem:[#allocation2 + $0x10] sm:$0xff] }
 0x360   : > { %3807 = vmatprep.subr.bf16.mxu1 %v3806_v24  ;;  %v1193_v24 = vld [vmem:[#allocation2 + $0x28] sm:$0xff]  ;;  %v3844_v27 = vpack.c.bf16 %v1190_v23, %v1188_v22  ;;  %v1227_v22 = vld [vmem:[#allocation2 + $0x138] sm:$0xff]  ;;  %v3876_v23 = vpack.c.bf16 %v1222_v14, %v1220_v21  ;;  %v1608_v21 = vld [vmem:[#allocation2 + $0x420] sm:$0xff] }
 0x361   : > { %v1610_v14 = vld [vmem:[#allocation2 + $0x430] sm:$0xff] }
 0x363   : > { %3809 = vmatpush1.bf16.msra.mxu1 %v3808_v29 }
 0x364   : > { %3811 = vmatprep.subr.bf16.mxu1 %v3810_v30  ;;  %v3846_v30 = vpack.c.bf16 %v1195_v25, %v1193_v24  ;;  %v1224_v25 = vld [vmem:[#allocation2 + $0x120] sm:$0xff] }
 0x367   : > { %3813 = vmatpush1.bf16.msra.mxu1 %v3812_v35  ;;  %v1199_v35 = vld [vmem:[#allocation2 + $0x58] sm:$0xff] }
 0x368   : > { %3815 = vmatprep.subr.bf16.mxu1 %v3814_v36  ;;  %v3848_v36 = vpack.c.bf16 %v1194_v32, %v1192_v31  ;;  %v3850_v38 = vpack.c.bf16 %v1199_v35, %v1197_v34  ;;  %v1228_v32 = vld [vmem:[#allocation2 + $0x140] sm:$0xff]  ;;  %v1233_v34 = vld [vmem:[#allocation2 + $0x168] sm:$0xff]  ;;  %v1235_v35 = vld [vmem:[#allocation2 + $0x178] sm:$0xff] }
 0x36b   : > { %3817 = vmatpush1.bf16.msra.mxu1 %v3816_v41 }
 0x36c   : > { %3819 = vmatprep.subr.bf16.mxu1 %v3818_v42  ;;  %v1201_v42 = vld [vmem:[#allocation2 + $0x68] sm:$0xff] }
 0x36d   : > { %v3854_v45 = vpack.c.bf16 %v1203_v43, %v1201_v42  ;;  %v1237_v42 = vld [vmem:[#allocation2 + $0x188] sm:$0xff]  ;;  %v1239_v43 = vld [vmem:[#allocation2 + $0x198] sm:$0xff] }
 0x36f   : > { %3821 = vmatpush1.bf16.msra.mxu1 %v3820_v47  ;;  %v1202_v47 = vld [vmem:[#allocation2 + $0x70] sm:$0xff] }
 0x370   : > { %3823 = vmatprep.subr.bf16.mxu1 %v3822_v48  ;;  %v1205_v48 = vld [vmem:[#allocation2 + $0x88] sm:$0xff]  ;;  %v3856_v50 = vpack.c.bf16 %v1202_v47, %v1200_v46  ;;  %v1236_v46 = vld [vmem:[#allocation2 + $0x180] sm:$0xff]  ;;  %v1238_v47 = vld [vmem:[#allocation2 + $0x190] sm:$0xff] }
 0x371   : > { %v3858_v51 = vpack.c.bf16 %v1207_v49, %v1205_v48  ;;  %v1241_v48 = vld [vmem:[#allocation2 + $0x1a8] sm:$0xff]  ;;  %v1243_v49 = vld [vmem:[#allocation2 + $0x1b8] sm:$0xff] }
 0x373   : > { %3825 = vmatpush1.bf16.msra.mxu1 %v3824_v53  ;;  %v1206_v53 = vld [vmem:[#allocation2 + $0x90] sm:$0xff] }
 0x374   : > { %3827 = vmatprep.subr.bf16.mxu1 %v3826_v54  ;;  %v1209_v54 = vld [vmem:[#allocation2 + $0xa8] sm:$0xff]  ;;  %v3860_v56 = vpack.c.bf16 %v1206_v53, %v1204_v52  ;;  %v1240_v52 = vld [vmem:[#allocation2 + $0x1a0] sm:$0xff]  ;;  %v1242_v53 = vld [vmem:[#allocation2 + $0x1b0] sm:$0xff] }
 0x375   : > { %v3862_v57 = vpack.c.bf16 %v1211_v55, %v1209_v54  ;;  %v1245_v54 = vld [vmem:[#allocation2 + $0x1c8] sm:$0xff]  ;;  %v1247_v55 = vld [vmem:[#allocation2 + $0x1d8] sm:$0xff] }
 0x377   : > { %3829 = vmatpush1.bf16.msra.mxu1 %v3828_v61  ;;  %v1210_v61 = vld [vmem:[#allocation2 + $0xb0] sm:$0xff] }
 0x378   : > { %3831 = vmatprep.subr.bf16.mxu1 %v3830_v62  ;;  %v1213_v62 = vld [vmem:[#allocation2 + $0xc8] sm:$0xff]  ;;  %v3864_v0 = vpack.c.bf16 %v1210_v61, %v1208_v58  ;;  %v1244_v58 = vld [vmem:[#allocation2 + $0x1c0] sm:$0xff]  ;;  %v1246_v61 = vld [vmem:[#allocation2 + $0x1d0] sm:$0xff] }
 0x379   : > { %v3866_v5 = vpack.c.bf16 %v1215_v63, %v1213_v62  ;;  %v1249_v62 = vld [vmem:[#allocation2 + $0x1e8] sm:$0xff]  ;;  %v1251_v63 = vld [vmem:[#allocation2 + $0x1f8] sm:$0xff] }
 0x37b   : > { %3833 = vmatpush1.bf16.msra.mxu1 %v3832_v8  ;;  %v1214_v8 = vld [vmem:[#allocation2 + $0xd0] sm:$0xff] }
 0x37c   : > { %3835 = vmatprep.subr.bf16.mxu1 %v3834_v7  ;;  %v1217_v7 = vld [vmem:[#allocation2 + $0xe8] sm:$0xff]  ;;  %v3868_v2 = vpack.c.bf16 %v1214_v8, %v1212_v6  ;;  %v1248_v6 = vld [vmem:[#allocation2 + $0x1e0] sm:$0xff]  ;;  %v1250_v8 = vld [vmem:[#allocation2 + $0x1f0] sm:$0xff] }
 0x37d   : > { %v3870_v10 = vpack.c.bf16 %v1219_v9, %v1217_v7  ;;  %v1605_v7 = vld [vmem:[#allocation2 + $0x408] sm:$0xff]  ;;  %v1607_v9 = vld [vmem:[#allocation2 + $0x418] sm:$0xff] }
 0x37f   : > { %3837 = vmatpush1.bf16.msra.mxu1 %v3836_v13  ;;  %v1218_v13 = vld [vmem:[#allocation2 + $0xf0] sm:$0xff] }
 0x380   : > { %3839 = vmatprep.subr.bf16.mxu1 %v3838_v16  ;;  %v1221_v16 = vld [vmem:[#allocation2 + $0x108] sm:$0xff]  ;;  %v3872_v19 = vpack.c.bf16 %v1218_v13, %v1216_v11  ;;  %v1604_v11 = vld [vmem:[#allocation2 + $0x400] sm:$0xff]  ;;  %v1606_v13 = vld [vmem:[#allocation2 + $0x410] sm:$0xff] }
 0x383   : > { %3841 = vmatpush1.bf16.msra.mxu1 %v3840_v20  ;;  %v3874_v20 = vpack.c.bf16 %v1223_v18, %v1221_v16  ;;  %v1609_v16 = vld [vmem:[#allocation2 + $0x428] sm:$0xff]  ;;  %v1611_v18 = vld [vmem:[#allocation2 + $0x438] sm:$0xff] }
 0x384   : > { %3843 = vmatprep.subr.bf16.mxu1 %v3842_v12  ;;  %v1225_v12 = vld [vmem:[#allocation2 + $0x128] sm:$0xff] }
 0x385   : > { %v3878_v24 = vpack.c.bf16 %v1227_v22, %v1225_v12  ;;  %v1613_v12 = vld [vmem:[#allocation2 + $0x448] sm:$0xff]  ;;  %v1615_v22 = vld [vmem:[#allocation2 + $0x458] sm:$0xff] }
 0x418   : > { %v1320_v26 = vpop.f32.mrb[0].mxu1  ;;  %v5247_v28 = vpop.f32.mrb[10].mxu0 }
 0x419   : > { %v1322_v29 = vpop.f32.mrb[1].mxu1  ;;  %v1185_v33 = vpop.f32.mrb[11].mxu0 }
 0x41a   : > { %1453 = vmatprep.mubr.f32.mxu1 %v1322_v29  ;;  %v1231_v29 = vld [vmem:[#allocation2 + $0x158] sm:$0xff] }
 0x41b   : > { %1454 = vmatmul.mubr.f32.vlgmr.msra.gmra.mrb[2].mxu1 %v1320_v26  ;;  %v1226_v26 = vld [vmem:[#allocation2 + $0x130] sm:$0xff] }
 0x41c   : > { %3845 = vmatpush1.bf16.msra.mxu1 %v3844_v27  ;;  %1524 = vmatprep.mubr.f32.mxu1 %v1185_v33  ;;  %v5249_v37 = vpop.f32.mrb[12].mxu0  ;;  %v1229_v27 = vld [vmem:[#allocation2 + $0x148] sm:$0xff]  ;;  %v1230_v33 = vld [vmem:[#allocation2 + $0x150] sm:$0xff] }
 0x41d   : > { %3847 = vmatprep.subr.bf16.mxu1 %v3846_v30  ;;  %v5251_v41 = vpop.f32.mrb[13].mxu0  ;;  %v3880_v30 = vpack.c.bf16 %v1226_v26, %v1224_v25  ;;  %v3882_v31 = vpack.c.bf16 %v1231_v29, %v1229_v27  ;;  %v1612_v25 = vld [vmem:[#allocation2 + $0x440] sm:$0xff]  ;;  %v1614_v26 = vld [vmem:[#allocation2 + $0x450] sm:$0xff]  ;;  %v1617_v27 = vld [vmem:[#allocation2 + $0x468] sm:$0xff] }
 0x41e   : > { %v1619_v29 = vld [vmem:[#allocation2 + $0x478] sm:$0xff] }
 0x420   : > { %3849 = vmatpush1.bf16.msra.mxu1 %v3848_v36  ;;  %v3884_v36 = vpack.c.bf16 %v1230_v33, %v1228_v32  ;;  %v1616_v32 = vld [vmem:[#allocation2 + $0x460] sm:$0xff]  ;;  %v1618_v33 = vld [vmem:[#allocation2 + $0x470] sm:$0xff] }
 0x421   : > { %3851 = vmatprep.subr.bf16.mxu1 %v3850_v38  ;;  %v3886_v38 = vpack.c.bf16 %v1235_v35, %v1233_v34  ;;  %v1621_v34 = vld [vmem:[#allocation2 + $0x488] sm:$0xff]  ;;  %v1623_v35 = vld [vmem:[#allocation2 + $0x498] sm:$0xff] }
 0x424   : > { %3853 = vmatpush1.bf16.msra.mxu1 %v3852_v44  ;;  %v3888_v44 = vpack.c.bf16 %v1234_v40, %v1232_v39  ;;  %v1625_v39 = vld [vmem:[#allocation2 + $0x4a8] sm:$0xff]  ;;  %v1627_v40 = vld [vmem:[#allocation2 + $0x4b8] sm:$0xff] }
 0x425   : > { %3855 = vmatprep.subr.bf16.mxu1 %v3854_v45  ;;  %v3890_v45 = vpack.c.bf16 %v1239_v43, %v1237_v42  ;;  %v3930_v43 = vpack.c.bf16 %v1627_v40, %v1625_v39 }
 0x428   : > { %3857 = vmatpush1.bf16.msra.mxu1 %v3856_v50  ;;  %v3892_v50 = vpack.c.bf16 %v1238_v47, %v1236_v46  ;;  %v1629_v46 = vld [vmem:[#allocation2 + $0x4c8] sm:$0xff]  ;;  %v1631_v47 = vld [vmem:[#allocation2 + $0x4d8] sm:$0xff] }
 0x429   : > { %3859 = vmatprep.subr.bf16.mxu1 %v3858_v51  ;;  %v3894_v51 = vpack.c.bf16 %v1243_v49, %v1241_v48  ;;  %v3934_v49 = vpack.c.bf16 %v1631_v47, %v1629_v46 }
 0x42c   : > { %3861 = vmatpush1.bf16.msra.mxu1 %v3860_v56  ;;  %v3896_v56 = vpack.c.bf16 %v1242_v53, %v1240_v52  ;;  %v1633_v52 = vld [vmem:[#allocation2 + $0x4e8] sm:$0xff]  ;;  %v1635_v53 = vld [vmem:[#allocation2 + $0x4f8] sm:$0xff] }
 0x42d   : > { %3863 = vmatprep.subr.bf16.mxu1 %v3862_v57  ;;  %v3898_v57 = vpack.c.bf16 %v1247_v55, %v1245_v54  ;;  %v3938_v55 = vpack.c.bf16 %v1635_v53, %v1633_v52 }
 0x430   : > { %3865 = vmatpush1.bf16.msra.mxu1 %v3864_v0  ;;  %v3900_v0 = vpack.c.bf16 %v1246_v61, %v1244_v58  ;;  %v1637_v58 = vld [vmem:[#allocation2 + $0x508] sm:$0xff]  ;;  %v1639_v61 = vld [vmem:[#allocation2 + $0x518] sm:$0xff] }
 0x431   : > { %3867 = vmatprep.subr.bf16.mxu1 %v3866_v5  ;;  %v3902_v5 = vpack.c.bf16 %v1251_v63, %v1249_v62  ;;  %v3942_v63 = vpack.c.bf16 %v1639_v61, %v1637_v58  ;;  %v3510_v61 = vld [vmem:[%s5364_s4 + $0x2] ss:$4 sm:$0x3] }
 0x434   : > { %3869 = vmatpush1.bf16.msra.mxu1 %v3868_v2  ;;  %v3904_v2 = vpack.c.bf16 %v1250_v8, %v1248_v6  ;;  %v1641_v6 = vld [vmem:[#allocation2 + $0x528] sm:$0xff]  ;;  %v1643_v8 = vld [vmem:[#allocation2 + $0x538] sm:$0xff] }
 0x435   : > { %3871 = vmatprep.subr.bf16.mxu1 %v3870_v10  ;;  %v3910_v10 = vpack.c.bf16 %v1607_v9, %v1605_v7  ;;  %v3946_v9 = vpack.c.bf16 %v1643_v8, %v1641_v6  ;;  %v1786_v6 = vrot.slane %v3510_v61, %v5222_v60 }
 0x438   : > { %3873 = vmatpush1.bf16.msra.mxu1 %v3872_v19  ;;  %v3912_v19 = vpack.c.bf16 %v1606_v13, %v1604_v11  ;;  %v1645_v11 = vld [vmem:[#allocation2 + $0x548] sm:$0xff]  ;;  %v1647_v13 = vld [vmem:[#allocation2 + $0x558] sm:$0xff] }
 0x439   : > { %3875 = vmatprep.subr.bf16.mxu1 %v3874_v20  ;;  %v3914_v20 = vpack.c.bf16 %v1611_v18, %v1609_v16  ;;  %v3950_v18 = vpack.c.bf16 %v1647_v13, %v1645_v11  ;;  %v2005_v11 = vld [vmem:[#allocation4 + $0x218] sm:$0xff] }
 0x43c   : > { %3877 = vmatpush1.bf16.msra.mxu1 %v3876_v23  ;;  %v3916_v23 = vpack.c.bf16 %v1610_v14, %v1608_v21  ;;  %v1649_v21 = vld [vmem:[#allocation2 + $0x568] sm:$0xff]  ;;  %v1651_v14 = vld [vmem:[#allocation2 + $0x578] sm:$0xff] }
 0x43d   : > { %3879 = vmatprep.subr.bf16.mxu1 %v3878_v24  ;;  %v3918_v24 = vpack.c.bf16 %v1615_v22, %v1613_v12  ;;  %v3954_v22 = vpack.c.bf16 %v1651_v14, %v1649_v21  ;;  %v2007_v21 = vld [vmem:[#allocation4 + $0x228] sm:$0xff]  ;;  %v2009_v14 = vld [vmem:[#allocation4 + $0x238] sm:$0xff] }
 0x440   : > { %3881 = vmatpush1.bf16.msra.mxu1 %v3880_v30  ;;  %v3920_v30 = vpack.c.bf16 %v1614_v26, %v1612_v25  ;;  %v1653_v25 = vld [vmem:[#allocation2 + $0x588] sm:$0xff]  ;;  %v1655_v26 = vld [vmem:[#allocation2 + $0x598] sm:$0xff] }
 0x441   : > { %3883 = vmatprep.subr.bf16.mxu1 %v3882_v31  ;;  %v3922_v31 = vpack.c.bf16 %v1619_v29, %v1617_v27  ;;  %v3958_v29 = vpack.c.bf16 %v1655_v26, %v1653_v25  ;;  %v2011_v25 = vld [vmem:[#allocation4 + $0x248] sm:$0xff]  ;;  %v2013_v26 = vld [vmem:[#allocation4 + $0x258] sm:$0xff] }
 0x444   : > { %3885 = vmatpush1.bf16.msra.mxu1 %v3884_v36  ;;  %v3926_v36 = vpack.c.bf16 %v1623_v35, %v1621_v34 }
 0x445   : > { %3887 = vmatprep.subr.bf16.mxu1 %v3886_v38  ;;  %v1620_v38 = vld [vmem:[#allocation2 + $0x480] sm:$0xff] }
 0x448   : > { %3889 = vmatpush1.bf16.msra.mxu1 %v3888_v44  ;;  %v1624_v44 = vld [vmem:[#allocation2 + $0x4a0] sm:$0xff] }
 0x449   : > { %3891 = vmatprep.subr.bf16.mxu1 %v3890_v45  ;;  %v1626_v45 = vld [vmem:[#allocation2 + $0x4b0] sm:$0xff] }
 0x44a   : > { %v3932_v48 = vpack.c.bf16 %v1626_v45, %v1624_v44  ;;  %v1665_v44 = vld [vmem:[#allocation2 + $0x5e8] sm:$0xff]  ;;  %v1667_v45 = vld [vmem:[#allocation2 + $0x5f8] sm:$0xff] }
 0x44b   : > { %v3970_v47 = vpack.c.bf16 %v1667_v45, %v1665_v44  ;;  %v2023_v44 = vld [vmem:[#allocation4 + $0x2a8] sm:$0xff]  ;;  %v2025_v45 = vld [vmem:[#allocation4 + $0x2b8] sm:$0xff] }
 0x44c   : > { %3893 = vmatpush1.bf16.msra.mxu1 %v3892_v50  ;;  %v1628_v50 = vld [vmem:[#allocation2 + $0x4c0] sm:$0xff] }
 0x44d   : > { %3895 = vmatprep.subr.bf16.mxu1 %v3894_v51  ;;  %v1630_v51 = vld [vmem:[#allocation2 + $0x4d0] sm:$0xff] }
 0x44e   : > { %v3936_v54 = vpack.c.bf16 %v1630_v51, %v1628_v50  ;;  %v1741_v51 = vld [vmem:[%s5364_s4] ss:$4 sm:$0x3] }
 0x44f   : > { %v1746_v52 = vrot.slane %v1741_v51, %v5219_v59  ;;  %v1750_v53 = vrot.slane %v1741_v51, %v5222_v60  ;;  %v2029_v51 = vld [vmem:[#allocation4 + $0x2d8] sm:$0xff] }
 0x450   : > { %3897 = vmatpush1.bf16.msra.mxu1 %v3896_v56  ;;  %v1632_v56 = vld [vmem:[#allocation2 + $0x4e0] sm:$0xff] }
 0x451   : > { %3899 = vmatprep.subr.bf16.mxu1 %v3898_v57  ;;  %v1634_v57 = vld [vmem:[#allocation2 + $0x4f0] sm:$0xff] }
 0x452   : > { %v3940_v62 = vpack.c.bf16 %v1634_v57, %v1632_v56 }
 0x454   : > { %3901 = vmatpush1.bf16.msra.mxu1 %v3900_v0  ;;  %v1636_v0 = vld [vmem:[#allocation2 + $0x500] sm:$0xff] }
 0x455   : > { %3903 = vmatprep.subr.bf16.mxu1 %v3902_v5  ;;  %v1638_v5 = vld [vmem:[#allocation2 + $0x510] sm:$0xff] }
 0x456   : > { %v3944_v7 = vpack.c.bf16 %v1638_v5, %v1636_v0 }
 0x458   : > { %3905 = vmatpush1.bf16.msra.mxu1 %v3904_v2  ;;  %v1640_v2 = vld [vmem:[#allocation2 + $0x520] sm:$0xff] }
 0x459   : > { %3911 = vmatprep.subr.bf16.mxu1 %v3910_v10  ;;  %v1642_v10 = vld [vmem:[#allocation2 + $0x530] sm:$0xff] }
 0x45a   : > { %v3948_v16 = vpack.c.bf16 %v1642_v10, %v1640_v2  ;;  %v2003_v10 = vld [vmem:[#allocation4 + $0x208] sm:$0xff] }
 0x45b   : > { %1525 = vmatmul.mubr.f32.vlgmr.msra.gmra.mrb[2].mxu1 %v5247_v28  ;;  %v3924_v28 = vpack.c.bf16 %v1618_v33, %v1616_v32  ;;  %v1657_v32 = vld [vmem:[#allocation2 + $0x5a8] sm:$0xff]  ;;  %v1659_v33 = vld [vmem:[#allocation2 + $0x5b8] sm:$0xff] }
 0x45c   : > { %3913 = vmatpush1.bf16.msra.mxu1 %v3912_v19  ;;  %1732 = vmatprep.mubr.f32.mxu1 %v5251_v41  ;;  %v1622_v41 = vld [vmem:[#allocation2 + $0x490] sm:$0xff]  ;;  %v1644_v19 = vld [vmem:[#allocation2 + $0x540] sm:$0xff]  ;;  %v3962_v35 = vpack.c.bf16 %v1659_v33, %v1657_v32  ;;  %v2015_v32 = vld [vmem:[#allocation4 + $0x268] sm:$0xff] }
 0x45d   : > { %3915 = vmatprep.subr.bf16.mxu1 %v3914_v20  ;;  %v3928_v42 = vpack.c.bf16 %v1622_v41, %v1620_v38  ;;  %v1646_v20 = vld [vmem:[#allocation2 + $0x550] sm:$0xff]  ;;  %v1661_v38 = vld [vmem:[#allocation2 + $0x5c8] sm:$0xff]  ;;  %v1663_v41 = vld [vmem:[#allocation2 + $0x5d8] sm:$0xff] }
 0x45e   : > { %v3952_v12 = vpack.c.bf16 %v1646_v20, %v1644_v19  ;;  %v3966_v40 = vpack.c.bf16 %v1663_v41, %v1661_v38  ;;  %v2002_v19 = vld [vmem:[#allocation4 + $0x200] sm:$0xff]  ;;  %v2004_v20 = vld [vmem:[#allocation4 + $0x210] sm:$0xff]  ;;  %v2017_v33 = vld [vmem:[#allocation4 + $0x278] sm:$0xff] }
 0x45f   : > { %v2019_v38 = vld [vmem:[#allocation4 + $0x288] sm:$0xff]  ;;  %v2021_v41 = vld [vmem:[#allocation4 + $0x298] sm:$0xff] }
 0x460   : > { %3917 = vmatpush1.bf16.msra.mxu1 %v3916_v23  ;;  %v1648_v23 = vld [vmem:[#allocation2 + $0x560] sm:$0xff] }
 0x461   : > { %3919 = vmatprep.subr.bf16.mxu1 %v3918_v24  ;;  %v1650_v24 = vld [vmem:[#allocation2 + $0x570] sm:$0xff] }
 0x462   : > { %v3956_v27 = vpack.c.bf16 %v1650_v24, %v1648_v23  ;;  %v2006_v23 = vld [vmem:[#allocation4 + $0x220] sm:$0xff]  ;;  %v2008_v24 = vld [vmem:[#allocation4 + $0x230] sm:$0xff] }
 0x464   : > { %3921 = vmatpush1.bf16.msra.mxu1 %v3920_v30  ;;  %v1652_v30 = vld [vmem:[#allocation2 + $0x580] sm:$0xff] }
 0x465   : > { %3923 = vmatprep.subr.bf16.mxu1 %v3922_v31  ;;  %v1654_v31 = vld [vmem:[#allocation2 + $0x590] sm:$0xff] }
 0x466   : > { %v3960_v34 = vpack.c.bf16 %v1654_v31, %v1652_v30  ;;  %v2010_v30 = vld [vmem:[#allocation4 + $0x240] sm:$0xff]  ;;  %v2012_v31 = vld [vmem:[#allocation4 + $0x250] sm:$0xff] }
 0x468   : > { %3925 = vmatpush1.bf16.msra.mxu1 %v3924_v28  ;;  %v1656_v28 = vld [vmem:[#allocation2 + $0x5a0] sm:$0xff] }
 0x469   : > { %3927 = vmatprep.subr.bf16.mxu1 %v3926_v36  ;;  %v1658_v36 = vld [vmem:[#allocation2 + $0x5b0] sm:$0xff] }
 0x46a   : > { %v3964_v39 = vpack.c.bf16 %v1658_v36, %v1656_v28  ;;  %v2014_v28 = vld [vmem:[#allocation4 + $0x260] sm:$0xff]  ;;  %v2016_v36 = vld [vmem:[#allocation4 + $0x270] sm:$0xff] }
 0x46c   : > { %3929 = vmatpush1.bf16.msra.mxu1 %v3928_v42  ;;  %v1660_v42 = vld [vmem:[#allocation2 + $0x5c0] sm:$0xff] }
 0x46d   : > { %3931 = vmatprep.subr.bf16.mxu1 %v3930_v43  ;;  %v1662_v43 = vld [vmem:[#allocation2 + $0x5d0] sm:$0xff] }
 0x46e   : > { %v3968_v46 = vpack.c.bf16 %v1662_v43, %v1660_v42  ;;  %v2018_v42 = vld [vmem:[#allocation4 + $0x280] sm:$0xff]  ;;  %v2020_v43 = vld [vmem:[#allocation4 + $0x290] sm:$0xff] }
 0x470   : > { %3933 = vmatpush1.bf16.msra.mxu1 %v3932_v48  ;;  %v1664_v48 = vld [vmem:[#allocation2 + $0x5e0] sm:$0xff] }
 0x471   : > { %3935 = vmatprep.subr.bf16.mxu1 %v3934_v49  ;;  %v1666_v49 = vld [vmem:[#allocation2 + $0x5f0] sm:$0xff] }
 0x472   : > { %v3972_v50 = vpack.c.bf16 %v1666_v49, %v1664_v48  ;;  %v2022_v48 = vld [vmem:[#allocation4 + $0x2a0] sm:$0xff]  ;;  %v2024_v49 = vld [vmem:[#allocation4 + $0x2b0] sm:$0xff] }
 0x474   : > { %3937 = vmatpush1.bf16.msra.mxu1 %v3936_v54  ;;  %v3509_v54 = vld [vmem:[%s5364_s4 + $0x1] ss:$4 sm:$0x3] }
 0x475   : > { %3939 = vmatprep.subr.bf16.mxu1 %v3938_v55  ;;  %v1767_v58 = vrot.slane %v3509_v54, %v5219_v59 }
 0x478   : > { %3941 = vmatpush1.bf16.msra.mxu1 %v3940_v62 }
 0x479   : > { %3943 = vmatprep.subr.bf16.mxu1 %v3942_v63  ;;  %v1771_v63 = vrot.slane %v3509_v54, %v5222_v60  ;;  %v2026_v54 = vld [vmem:[#allocation4 + $0x2c0] sm:$0xff] }
 0x47c   : > { %3945 = vmatpush1.bf16.msra.mxu1 %v3944_v7 }
 0x47d   : > { %3947 = vmatprep.subr.bf16.mxu1 %v3946_v9  ;;  %v1782_v9 = vrot.slane %v3510_v61, %v5219_v59  ;;  %v2030_v61 = vld [vmem:[#allocation4 + $0x2e0] sm:$0xff] }
 0x480   : > { %3949 = vmatpush1.bf16.msra.mxu1 %v3948_v16 }
 0x481   : > { %3951 = vmatprep.subr.bf16.mxu1 %v3950_v18  ;;  %v3974_v18 = vpack.c.bf16 %v2005_v11, %v2003_v10 }
 0x484   : > { %3953 = vmatpush1.bf16.msra.mxu1 %v3952_v12  ;;  %v3976_v12 = vpack.c.bf16 %v2004_v20, %v2002_v19  ;;  %v2045_v19 = vld [vmem:[#allocation4 + $0x358] sm:$0xff] }
 0x485   : > { %3955 = vmatprep.subr.bf16.mxu1 %v3954_v22  ;;  %v3978_v22 = vpack.c.bf16 %v2009_v14, %v2007_v21  ;;  %v2042_v14 = vld [vmem:[#allocation4 + $0x340] sm:$0xff] }
 0x488   : > { %3957 = vmatpush1.bf16.msra.mxu1 %v3956_v27  ;;  %v3980_v27 = vpack.c.bf16 %v2008_v24, %v2006_v23  ;;  %v2049_v23 = vld [vmem:[#allocation4 + $0x378] sm:$0xff] }
 0x489   : > { %3959 = vmatprep.subr.bf16.mxu1 %v3958_v29  ;;  %v3982_v29 = vpack.c.bf16 %v2013_v26, %v2011_v25  ;;  %v2046_v26 = vld [vmem:[#allocation4 + $0x360] sm:$0xff] }
 0x48c   : > { %3961 = vmatpush1.bf16.msra.mxu1 %v3960_v34  ;;  %v3984_v34 = vpack.c.bf16 %v2012_v31, %v2010_v30  ;;  %v2053_v30 = vld [vmem:[#allocation4 + $0x398] sm:$0xff] }
 0x48d   : > { %3963 = vmatprep.subr.bf16.mxu1 %v3962_v35  ;;  %v3986_v35 = vpack.c.bf16 %v2017_v33, %v2015_v32  ;;  %v2050_v33 = vld [vmem:[#allocation4 + $0x380] sm:$0xff] }
 0x490   : > { %3965 = vmatpush1.bf16.msra.mxu1 %v3964_v39  ;;  %v3988_v39 = vpack.c.bf16 %v2016_v36, %v2014_v28  ;;  %v2057_v28 = vld [vmem:[#allocation4 + $0x3b8] sm:$0xff] }
 0x491   : > { %3967 = vmatprep.subr.bf16.mxu1 %v3966_v40  ;;  %v3990_v40 = vpack.c.bf16 %v2021_v41, %v2019_v38  ;;  %v2054_v41 = vld [vmem:[#allocation4 + $0x3a0] sm:$0xff] }
 0x494   : > { %3969 = vmatpush1.bf16.msra.mxu1 %v3968_v46  ;;  %v3992_v46 = vpack.c.bf16 %v2020_v43, %v2018_v42  ;;  %v2061_v42 = vld [vmem:[#allocation4 + $0x3d8] sm:$0xff] }
 0x495   : > { %3971 = vmatprep.subr.bf16.mxu1 %v3970_v47  ;;  %v3994_v47 = vpack.c.bf16 %v2025_v45, %v2023_v44  ;;  %v2058_v45 = vld [vmem:[#allocation4 + $0x3c0] sm:$0xff] }
 0x498   : > { %3973 = vmatpush1.bf16.msra.mxu1 %v3972_v50  ;;  %v2027_v50 = vld [vmem:[#allocation4 + $0x2c8] sm:$0xff] }
 0x49b   : > { %1733 = vmatmul.mubr.f32.vlgmr.msra.gmra.mrb[2].mxu1 %v5249_v37 }
 0x49c   : > { %2274 = vmatprep.mubr.f32.mxu1 %v4644_v1 }
 0x56e   : > { %v1734_v55 = vpop.f32.mrb[2].mxu1 }
 0x56f   : > { %v1753_v56 = vadd.f32 %v1746_v52, %v1734_v55  ;;  %v1736_v57 = vpop.f32.mrb[3].mxu1  ;;  %v3996_v52 = vpack.c.bf16 %v2024_v49, %v2022_v48  ;;  %v2028_v55 = vld [vmem:[#allocation4 + $0x2d0] sm:$0xff]  ;;  %v2063_v48 = vld [vmem:[#allocation4 + $0x3e8] sm:$0xff]  ;;  %v2065_v49 = vld [vmem:[#allocation4 + $0x3f8] sm:$0xff] }
 0x570   : > { %v1754_v37 = vadd.f32 %v1750_v53, %v1736_v57  ;;  %v3998_v53 = vpack.c.bf16 %v2029_v51, %v2027_v50  ;;  %v2033_v57 = vld [vmem:[#allocation4 + $0x2f8] sm:$0xff]  ;;  %v4034_v50 = vpack.c.bf16 %v2065_v49, %v2063_v48  ;;  %v2062_v51 = vld [vmem:[#allocation4 + $0x3e0] sm:$0xff]  ;;  %v1895_v49 = vld [vmem:[#allocation4 + $0xf0] sm:$0xff] }
 0x571   : > { %vm1755_vm12 = vcmp.ge.f32.partialorder %v1753_v56, 0.0  ;;  %v1757_v62 = vmul.f32 0.2, %v1753_v56  ;;  %v1893_v48 = vld [vmem:[#allocation4 + $0xe0] sm:$0xff] }
 0x572   : > { %vm1756_vm13 = vcmp.ge.f32.partialorder %v1754_v37, 0.0  ;;  %v1758_v0 = vmul.f32 0.2, %v1754_v37 }
 0x573   : > { %v1759_v5 = vsel %vm1755_vm12, %v1753_v56, %v1757_v62  ;;  %v2031_v56 = vld [vmem:[#allocation4 + $0x2e8] sm:$0xff]  ;;  %v2032_v62 = vld [vmem:[#allocation4 + $0x2f0] sm:$0xff] }
 0x574   : > { %v1774_v8 = vmul.f32 %v1767_v58, %v1759_v5  ;;  %v1760_v7 = vsel %vm1756_vm13, %v1754_v37, %v1758_v0  ;;  %v4000_v58 = vpack.c.bf16 %v2028_v55, %v2026_v54  ;;  %v4002_v37 = vpack.c.bf16 %v2033_v57, %v2031_v56  ;;  %v2037_v0 = vld [vmem:[#allocation4 + $0x318] sm:$0xff]  ;;  %v1866_v54 = vld [vmem:[#allocation4 + $0x8] sm:$0xff] }
 0x575   : > { %v1775_v2 = vmul.f32 %v1771_v63, %v1760_v7  ;;  %v2035_v63 = vld [vmem:[#allocation4 + $0x308] sm:$0xff]  ;;  %v4004_v5 = vpack.c.bf16 %v2032_v62, %v2030_v61  ;;  %v2036_v7 = vld [vmem:[#allocation4 + $0x310] sm:$0xff]  ;;  %v1868_v55 = vld [vmem:[#allocation4 + $0x18] sm:$0xff] }
 0x576   : > { %v1789_v16 = vadd.f32 %v1782_v9, %v1774_v8  ;;  %v2034_v8 = vld [vmem:[#allocation4 + $0x300] sm:$0xff]  ;;  %v2039_v9 = vld [vmem:[#allocation4 + $0x328] sm:$0xff]  ;;  %v4038_v56 = vpack.c.bf16 %v1868_v55, %v1866_v54  ;;  %v1867_v61 = vld [vmem:[#allocation4 + $0x10] sm:$0xff] }
 0x577   : > { %v1790_v13 = vadd.f32 %v1786_v6, %v1775_v2  ;;  %v4006_v6 = vpack.c.bf16 %v2037_v0, %v2035_v63  ;;  %v2041_v2 = vld [vmem:[#allocation4 + $0x338] sm:$0xff]  ;;  %v4008_v10 = vpack.c.bf16 %v2036_v7, %v2034_v8  ;;  %v1870_v62 = vld [vmem:[#allocation4 + $0x28] sm:$0xff]  ;;  %v1897_v54 = vld [vmem:[#allocation4 + $0x100] sm:$0xff] }
 0x578   : > { %v4010_v11 = vpack.c.bf16 %v2041_v2, %v2039_v9  ;;  %v1872_v63 = vld [vmem:[#allocation4 + $0x38] sm:$0xff]  ;;  %v1869_v2 = vld [vmem:[#allocation4 + $0x20] sm:$0xff]  ;;  %v1899_v55 = vld [vmem:[#allocation4 + $0x110] sm:$0xff] }
 0x579   : > { %1794 = vmatprep.subr.mxu0 %v1790_v13  ;;  %2210 = vmatprep.subr.mxu1 %v1790_v13  ;;  %v4042_v9 = vpack.c.bf16 %v1872_v63, %v1870_v62  ;;  %v1901_v62 = vld [vmem:[#allocation4 + $0x120] sm:$0xff]  ;;  %v1903_v63 = vld [vmem:[#allocation4 + $0x130] sm:$0xff] }
 0x57a   : > { %1795 = vmatpush1.msra.mxu0 %v1789_v16  ;;  %2211 = vmatpush1.msra.mxu1 %v1789_v16 }
 0x57b   : > { %3511 = vmatmul.mubr.msk.f32.vlgmr.msra.gmra.mrb[14].mxu0 %vm1791_vm14, %v4876_v15  ;;  %1931 = vmatprep.subr.mxu0 %v1790_v13  ;;  %v2038_v13 = vld [vmem:[#allocation4 + $0x320] sm:$0xff] }
 0x57c   : > { %1932 = vmatpush1.msra.mxu0 %v1789_v16  ;;  %1995 = vmatprep.mubr.f32.mxu0 %v4644_v1  ;;  %v2040_v16 = vld [vmem:[#allocation4 + $0x330] sm:$0xff] }
 0x57d   : > { %3513 = vmatmul.mubr.msk.f32.vlgmr.msra.gmra.mrb[4].mxu1 %vm1791_vm14, %v5116_v4  ;;  %3975 = vmatprep.subr.bf16.mxu0 %v3974_v18  ;;  %v2043_v18 = vld [vmem:[#allocation4 + $0x348] sm:$0xff]  ;;  %v4012_v20 = vpack.c.bf16 %v2040_v16, %v2038_v13  ;;  %v1876_v13 = vld [vmem:[#allocation4 + $0x58] sm:$0xff] }
 0x57e   : > { %2542 = vmatprep.mubr.f32.mxu1 %v4644_v1  ;;  %v4014_v21 = vpack.c.bf16 %v2045_v19, %v2043_v18  ;;  %v1873_v19 = vld [vmem:[#allocation4 + $0x40] sm:$0xff] }
 0x57f   : > { %3512 = vmatmul.mubr.msk.f32.vlgmr.msra.gmra.mrb[16].mxu0 %vm1791_vm14, %v4890_v17 }
 0x580   : > { %3977 = vmatpush1.bf16.msra.mxu0 %v3976_v12  ;;  %v2044_v12 = vld [vmem:[#allocation4 + $0x350] sm:$0xff] }
 0x581   : > { %3979 = vmatprep.subr.bf16.mxu0 %v3978_v22  ;;  %v2047_v22 = vld [vmem:[#allocation4 + $0x368] sm:$0xff]  ;;  %v4016_v24 = vpack.c.bf16 %v2044_v12, %v2042_v14  ;;  %v1880_v14 = vld [vmem:[#allocation4 + $0x78] sm:$0xff] }
 0x582   : > { %v4018_v25 = vpack.c.bf16 %v2049_v23, %v2047_v22  ;;  %v1877_v23 = vld [vmem:[#allocation4 + $0x60] sm:$0xff] }
 0x584   : > { %3981 = vmatpush1.bf16.msra.mxu0 %v3980_v27  ;;  %v2048_v27 = vld [vmem:[#allocation4 + $0x370] sm:$0xff] }
 0x585   : > { %3983 = vmatprep.subr.bf16.mxu0 %v3982_v29  ;;  %v2051_v29 = vld [vmem:[#allocation4 + $0x388] sm:$0xff]  ;;  %v4020_v31 = vpack.c.bf16 %v2048_v27, %v2046_v26  ;;  %v1884_v26 = vld [vmem:[#allocation4 + $0x98] sm:$0xff] }
 0x586   : > { %v4022_v32 = vpack.c.bf16 %v2053_v30, %v2051_v29  ;;  %v1881_v30 = vld [vmem:[#allocation4 + $0x80] sm:$0xff] }
 0x588   : > { %3985 = vmatpush1.bf16.msra.mxu0 %v3984_v34  ;;  %v2052_v34 = vld [vmem:[#allocation4 + $0x390] sm:$0xff] }
 0x589   : > { %3987 = vmatprep.subr.bf16.mxu0 %v3986_v35  ;;  %v2055_v35 = vld [vmem:[#allocation4 + $0x3a8] sm:$0xff]  ;;  %v4024_v36 = vpack.c.bf16 %v2052_v34, %v2050_v33  ;;  %v1888_v33 = vld [vmem:[#allocation4 + $0xb8] sm:$0xff] }
 0x58a   : > { %v4026_v38 = vpack.c.bf16 %v2057_v28, %v2055_v35  ;;  %v1885_v28 = vld [vmem:[#allocation4 + $0xa0] sm:$0xff] }
 0x58c   : > { %3989 = vmatpush1.bf16.msra.mxu0 %v3988_v39  ;;  %v2056_v39 = vld [vmem:[#allocation4 + $0x3b0] sm:$0xff] }
 0x58d   : > { %3991 = vmatprep.subr.bf16.mxu0 %v3990_v40  ;;  %v2059_v40 = vld [vmem:[#allocation4 + $0x3c8] sm:$0xff]  ;;  %v4028_v43 = vpack.c.bf16 %v2056_v39, %v2054_v41  ;;  %v1892_v41 = vld [vmem:[#allocation4 + $0xd8] sm:$0xff] }
 0x58e   : > { %v4030_v44 = vpack.c.bf16 %v2061_v42, %v2059_v40  ;;  %v1889_v42 = vld [vmem:[#allocation4 + $0xc0] sm:$0xff] }
 0x590   : > { %3993 = vmatpush1.bf16.msra.mxu0 %v3992_v46  ;;  %v2060_v46 = vld [vmem:[#allocation4 + $0x3d0] sm:$0xff] }
 0x591   : > { %3995 = vmatprep.subr.bf16.mxu0 %v3994_v47  ;;  %v4032_v47 = vpack.c.bf16 %v2060_v46, %v2058_v45  ;;  %v1896_v45 = vld [vmem:[#allocation4 + $0xf8] sm:$0xff] }
 0x594   : > { %3997 = vmatpush1.bf16.msra.mxu0 %v3996_v52  ;;  %v2064_v52 = vld [vmem:[#allocation4 + $0x3f0] sm:$0xff] }
 0x595   : > { %3999 = vmatprep.subr.bf16.mxu0 %v3998_v53  ;;  %v4036_v53 = vpack.c.bf16 %v2064_v52, %v2062_v51  ;;  %v1900_v51 = vld [vmem:[#allocation4 + $0x118] sm:$0xff]  ;;  %v4068_v52 = vpack.c.bf16 %v1895_v49, %v1893_v48  ;;  %v2281_v48 = vld [vmem:[#allocation4 + $0x400] sm:$0xff]  ;;  %v2283_v49 = vld [vmem:[#allocation4 + $0x410] sm:$0xff] }
 0x598   : > { %4001 = vmatpush1.bf16.msra.mxu0 %v4000_v58 }
 0x599   : > { %4003 = vmatprep.subr.bf16.mxu0 %v4002_v37  ;;  %v1865_v37 = vld [vmem:[#allocation4] sm:$0xff] }
 0x59a   : > { %v4040_v8 = vpack.c.bf16 %v1867_v61, %v1865_v37  ;;  %v4072_v37 = vpack.c.bf16 %v1899_v55, %v1897_v54  ;;  %v2285_v54 = vld [vmem:[#allocation4 + $0x420] sm:$0xff]  ;;  %v2287_v55 = vld [vmem:[#allocation4 + $0x430] sm:$0xff] }
 0x59c   : > { %4005 = vmatpush1.bf16.msra.mxu0 %v4004_v5 }
 0x59d   : > { %4007 = vmatprep.subr.bf16.mxu0 %v4006_v6 }
 0x5a0   : > { %4009 = vmatpush1.bf16.msra.mxu0 %v4008_v10  ;;  %v1871_v10 = vld [vmem:[#allocation4 + $0x30] sm:$0xff] }
 0x5a1   : > { %4011 = vmatprep.subr.bf16.mxu0 %v4010_v11  ;;  %v1874_v11 = vld [vmem:[#allocation4 + $0x48] sm:$0xff]  ;;  %v4044_v16 = vpack.c.bf16 %v1871_v10, %v1869_v2  ;;  %v1905_v2 = vld [vmem:[#allocation4 + $0x140] sm:$0xff]  ;;  %v1907_v10 = vld [vmem:[#allocation4 + $0x150] sm:$0xff] }
 0x5a2   : > { %v4046_v18 = vpack.c.bf16 %v1876_v13, %v1874_v11  ;;  %v1910_v11 = vld [vmem:[#allocation4 + $0x168] sm:$0xff]  ;;  %v1912_v13 = vld [vmem:[#allocation4 + $0x178] sm:$0xff] }
 0x5a4   : > { %4013 = vmatpush1.bf16.msra.mxu0 %v4012_v20  ;;  %v1875_v20 = vld [vmem:[#allocation4 + $0x50] sm:$0xff] }
 0x5a5   : > { %4015 = vmatprep.subr.bf16.mxu0 %v4014_v21  ;;  %v1878_v21 = vld [vmem:[#allocation4 + $0x68] sm:$0xff]  ;;  %v4048_v12 = vpack.c.bf16 %v1875_v20, %v1873_v19  ;;  %v1909_v19 = vld [vmem:[#allocation4 + $0x160] sm:$0xff]  ;;  %v1911_v20 = vld [vmem:[#allocation4 + $0x170] sm:$0xff] }
 0x5a6   : > { %v4050_v22 = vpack.c.bf16 %v1880_v14, %v1878_v21  ;;  %v1914_v21 = vld [vmem:[#allocation4 + $0x188] sm:$0xff]  ;;  %v1916_v14 = vld [vmem:[#allocation4 + $0x198] sm:$0xff] }
 0x5a8   : > { %4017 = vmatpush1.bf16.msra.mxu0 %v4016_v24  ;;  %v1879_v24 = vld [vmem:[#allocation4 + $0x70] sm:$0xff] }
 0x5a9   : > { %4019 = vmatprep.subr.bf16.mxu0 %v4018_v25  ;;  %v1882_v25 = vld [vmem:[#allocation4 + $0x88] sm:$0xff]  ;;  %v4052_v27 = vpack.c.bf16 %v1879_v24, %v1877_v23  ;;  %v1913_v23 = vld [vmem:[#allocation4 + $0x180] sm:$0xff]  ;;  %v1915_v24 = vld [vmem:[#allocation4 + $0x190] sm:$0xff] }
 0x5aa   : > { %v4054_v29 = vpack.c.bf16 %v1884_v26, %v1882_v25  ;;  %v1918_v25 = vld [vmem:[#allocation4 + $0x1a8] sm:$0xff]  ;;  %v1920_v26 = vld [vmem:[#allocation4 + $0x1b8] sm:$0xff] }
 0x5ac   : > { %4021 = vmatpush1.bf16.msra.mxu0 %v4020_v31  ;;  %v1883_v31 = vld [vmem:[#allocation4 + $0x90] sm:$0xff] }
 0x5ad   : > { %4023 = vmatprep.subr.bf16.mxu0 %v4022_v32  ;;  %v1886_v32 = vld [vmem:[#allocation4 + $0xa8] sm:$0xff]  ;;  %v4056_v34 = vpack.c.bf16 %v1883_v31, %v1881_v30  ;;  %v1917_v30 = vld [vmem:[#allocation4 + $0x1a0] sm:$0xff]  ;;  %v1919_v31 = vld [vmem:[#allocation4 + $0x1b0] sm:$0xff] }
 0x5ae   : > { %v4058_v35 = vpack.c.bf16 %v1888_v33, %v1886_v32  ;;  %v1922_v32 = vld [vmem:[#allocation4 + $0x1c8] sm:$0xff]  ;;  %v1924_v33 = vld [vmem:[#allocation4 + $0x1d8] sm:$0xff] }
 0x5b0   : > { %4025 = vmatpush1.bf16.msra.mxu0 %v4024_v36  ;;  %v1887_v36 = vld [vmem:[#allocation4 + $0xb0] sm:$0xff] }
 0x5b1   : > { %4027 = vmatprep.subr.bf16.mxu0 %v4026_v38  ;;  %v1890_v38 = vld [vmem:[#allocation4 + $0xc8] sm:$0xff]  ;;  %v4060_v39 = vpack.c.bf16 %v1887_v36, %v1885_v28  ;;  %v1921_v28 = vld [vmem:[#allocation4 + $0x1c0] sm:$0xff]  ;;  %v1923_v36 = vld [vmem:[#allocation4 + $0x1d0] sm:$0xff] }
 0x5b2   : > { %v4062_v40 = vpack.c.bf16 %v1892_v41, %v1890_v38  ;;  %v1926_v38 = vld [vmem:[#allocation4 + $0x1e8] sm:$0xff]  ;;  %v1928_v41 = vld [vmem:[#allocation4 + $0x1f8] sm:$0xff] }
 0x5b4   : > { %4029 = vmatpush1.bf16.msra.mxu0 %v4028_v43  ;;  %v1891_v43 = vld [vmem:[#allocation4 + $0xd0] sm:$0xff] }
 0x5b5   : > { %4031 = vmatprep.subr.bf16.mxu0 %v4030_v44  ;;  %v1894_v44 = vld [vmem:[#allocation4 + $0xe8] sm:$0xff]  ;;  %v4064_v46 = vpack.c.bf16 %v1891_v43, %v1889_v42  ;;  %v1925_v42 = vld [vmem:[#allocation4 + $0x1e0] sm:$0xff]  ;;  %v1927_v43 = vld [vmem:[#allocation4 + $0x1f0] sm:$0xff] }
 0x5b8   : > { %4033 = vmatpush1.bf16.msra.mxu0 %v4032_v47  ;;  %v4066_v47 = vpack.c.bf16 %v1896_v45, %v1894_v44  ;;  %v2282_v44 = vld [vmem:[#allocation4 + $0x408] sm:$0xff]  ;;  %v2284_v45 = vld [vmem:[#allocation4 + $0x418] sm:$0xff] }
 0x5b9   : > { %4035 = vmatprep.subr.bf16.mxu0 %v4034_v50  ;;  %v1898_v50 = vld [vmem:[#allocation4 + $0x108] sm:$0xff] }
 0x5bc   : > { %4037 = vmatpush1.bf16.msra.mxu0 %v4036_v53  ;;  %v4070_v53 = vpack.c.bf16 %v1900_v51, %v1898_v50  ;;  %v2286_v50 = vld [vmem:[#allocation4 + $0x428] sm:$0xff]  ;;  %v2288_v51 = vld [vmem:[#allocation4 + $0x438] sm:$0xff] }
 0x5bd   : > { %4039 = vmatprep.subr.bf16.mxu0 %v4038_v56  ;;  %v1902_v56 = vld [vmem:[#allocation4 + $0x128] sm:$0xff] }
 0x64e   : > { %v5280_v57 = vpop.f32.mrb[14].mxu0 }
 0x64f   : > { %v1862_v58 = vpop.f32.mrb[15].mxu0 }
 0x650   : > { %v5282_v0 = vpop.f32.mrb[4].mxu1 }
 0x651   : > { %v5284_v5 = vpop.f32.mrb[5].mxu1 }
 0x652   : > { %v1997_v6 = vpop.f32.mrb[16].mxu0 }
 0x653   : > { %v1999_v7 = vpop.f32.mrb[17].mxu0 }
 0x654   : > { %2130 = vmatprep.mubr.f32.mxu0 %v1999_v7  ;;  %v4076_v7 = vpack.c.bf16 %v1903_v63, %v1901_v62  ;;  %v2289_v62 = vld [vmem:[#allocation4 + $0x440] sm:$0xff]  ;;  %v2291_v63 = vld [vmem:[#allocation4 + $0x450] sm:$0xff] }
 0x655   : > { %2131 = vmatmul.mubr.f32.vlgmr.msra.gmra.mrb[18].mxu0 %v1997_v6  ;;  %v1906_v6 = vld [vmem:[#allocation4 + $0x148] sm:$0xff] }
 0x656   : > { %4041 = vmatpush1.bf16.msra.mxu0 %v4040_v8  ;;  %2201 = vmatprep.mubr.f32.mxu0 %v1862_v58  ;;  %v1904_v58 = vld [vmem:[#allocation4 + $0x138] sm:$0xff] }
 0x657   : > { %4043 = vmatprep.subr.bf16.mxu0 %v4042_v9  ;;  %v4074_v61 = vpack.c.bf16 %v1904_v58, %v1902_v56  ;;  %v1908_v8 = vld [vmem:[#allocation4 + $0x158] sm:$0xff]  ;;  %v2290_v56 = vld [vmem:[#allocation4 + $0x448] sm:$0xff] }
 0x658   : > { %v4078_v9 = vpack.c.bf16 %v1908_v8, %v1906_v6  ;;  %v2292_v58 = vld [vmem:[#allocation4 + $0x458] sm:$0xff]  ;;  %v2294_v6 = vld [vmem:[#allocation4 + $0x468] sm:$0xff] }
 0x659   : > { %v2296_v8 = vld [vmem:[#allocation4 + $0x478] sm:$0xff] }
 0x65a   : > { %4045 = vmatpush1.bf16.msra.mxu0 %v4044_v16  ;;  %v4080_v16 = vpack.c.bf16 %v1907_v10, %v1905_v2  ;;  %v2293_v2 = vld [vmem:[#allocation4 + $0x460] sm:$0xff]  ;;  %v2295_v10 = vld [vmem:[#allocation4 + $0x470] sm:$0xff] }
 0x65b   : > { %4047 = vmatprep.subr.bf16.mxu0 %v4046_v18  ;;  %v4082_v18 = vpack.c.bf16 %v1912_v13, %v1910_v11  ;;  %v2298_v11 = vld [vmem:[#allocation4 + $0x488] sm:$0xff]  ;;  %v2300_v13 = vld [vmem:[#allocation4 + $0x498] sm:$0xff] }
 0x65e   : > { %4049 = vmatpush1.bf16.msra.mxu0 %v4048_v12  ;;  %v4084_v12 = vpack.c.bf16 %v1911_v20, %v1909_v19  ;;  %v2302_v19 = vld [vmem:[#allocation4 + $0x4a8] sm:$0xff]  ;;  %v2304_v20 = vld [vmem:[#allocation4 + $0x4b8] sm:$0xff] }
 0x65f   : > { %4051 = vmatprep.subr.bf16.mxu0 %v4050_v22  ;;  %v4086_v22 = vpack.c.bf16 %v1916_v14, %v1914_v21  ;;  %v4122_v14 = vpack.c.bf16 %v2304_v20, %v2302_v19 }
 0x662   : > { %4053 = vmatpush1.bf16.msra.mxu0 %v4052_v27  ;;  %v4088_v27 = vpack.c.bf16 %v1915_v24, %v1913_v23  ;;  %v2306_v23 = vld [vmem:[#allocation4 + $0x4c8] sm:$0xff]  ;;  %v2308_v24 = vld [vmem:[#allocation4 + $0x4d8] sm:$0xff] }
 0x663   : > { %4055 = vmatprep.subr.bf16.mxu0 %v4054_v29  ;;  %v4090_v29 = vpack.c.bf16 %v1920_v26, %v1918_v25  ;;  %v4126_v26 = vpack.c.bf16 %v2308_v24, %v2306_v23 }
 0x666   : > { %4057 = vmatpush1.bf16.msra.mxu0 %v4056_v34  ;;  %v4092_v34 = vpack.c.bf16 %v1919_v31, %v1917_v30  ;;  %v2310_v30 = vld [vmem:[#allocation4 + $0x4e8] sm:$0xff]  ;;  %v2312_v31 = vld [vmem:[#allocation4 + $0x4f8] sm:$0xff] }
 0x667   : > { %4059 = vmatprep.subr.bf16.mxu0 %v4058_v35  ;;  %v4094_v35 = vpack.c.bf16 %v1924_v33, %v1922_v32  ;;  %v4130_v33 = vpack.c.bf16 %v2312_v31, %v2310_v30 }
 0x66a   : > { %4061 = vmatpush1.bf16.msra.mxu0 %v4060_v39  ;;  %v4096_v39 = vpack.c.bf16 %v1923_v36, %v1921_v28  ;;  %v2314_v28 = vld [vmem:[#allocation4 + $0x508] sm:$0xff]  ;;  %v2316_v36 = vld [vmem:[#allocation4 + $0x518] sm:$0xff] }
 0x66b   : > { %4063 = vmatprep.subr.bf16.mxu0 %v4062_v40  ;;  %v4098_v40 = vpack.c.bf16 %v1928_v41, %v1926_v38  ;;  %v4134_v41 = vpack.c.bf16 %v2316_v36, %v2314_v28 }
 0x66e   : > { %4065 = vmatpush1.bf16.msra.mxu0 %v4064_v46  ;;  %v4100_v46 = vpack.c.bf16 %v1927_v43, %v1925_v42  ;;  %v2318_v42 = vld [vmem:[#allocation4 + $0x528] sm:$0xff]  ;;  %v2320_v43 = vld [vmem:[#allocation4 + $0x538] sm:$0xff] }
 0x66f   : > { %4067 = vmatprep.subr.bf16.mxu0 %v4066_v47  ;;  %v4102_v47 = vpack.c.bf16 %v2284_v45, %v2282_v44  ;;  %v4138_v45 = vpack.c.bf16 %v2320_v43, %v2318_v42 }
 0x672   : > { %4069 = vmatpush1.bf16.msra.mxu0 %v4068_v52  ;;  %v4104_v52 = vpack.c.bf16 %v2283_v49, %v2281_v48  ;;  %v2322_v48 = vld [vmem:[#allocation4 + $0x548] sm:$0xff]  ;;  %v2324_v49 = vld [vmem:[#allocation4 + $0x558] sm:$0xff] }
 0x673   : > { %4071 = vmatprep.subr.bf16.mxu0 %v4070_v53  ;;  %v4106_v53 = vpack.c.bf16 %v2288_v51, %v2286_v50  ;;  %v4142_v51 = vpack.c.bf16 %v2324_v49, %v2322_v48  ;;  %v2689_v48 = vld [vmem:[#allocation6 + $0x218] sm:$0xff] }
 0x676   : > { %4073 = vmatpush1.bf16.msra.mxu0 %v4072_v37  ;;  %v4108_v37 = vpack.c.bf16 %v2287_v55, %v2285_v54  ;;  %v2326_v54 = vld [vmem:[#allocation4 + $0x568] sm:$0xff]  ;;  %v2328_v55 = vld [vmem:[#allocation4 + $0x578] sm:$0xff] }
 0x677   : > { %4075 = vmatprep.subr.bf16.mxu0 %v4074_v61  ;;  %v4110_v61 = vpack.c.bf16 %v2292_v58, %v2290_v56  ;;  %v4146_v58 = vpack.c.bf16 %v2328_v55, %v2326_v54  ;;  %v2691_v54 = vld [vmem:[#allocation6 + $0x228] sm:$0xff]  ;;  %v2693_v55 = vld [vmem:[#allocation6 + $0x238] sm:$0xff] }
 0x67a   : > { %4077 = vmatpush1.bf16.msra.mxu0 %v4076_v7  ;;  %v4112_v7 = vpack.c.bf16 %v2291_v63, %v2289_v62  ;;  %v2330_v62 = vld [vmem:[#allocation4 + $0x588] sm:$0xff]  ;;  %v2332_v63 = vld [vmem:[#allocation4 + $0x598] sm:$0xff] }
 0x67b   : > { %4079 = vmatprep.subr.bf16.mxu0 %v4078_v9  ;;  %v4114_v9 = vpack.c.bf16 %v2296_v8, %v2294_v6  ;;  %v4150_v8 = vpack.c.bf16 %v2332_v63, %v2330_v62  ;;  %v2695_v62 = vld [vmem:[#allocation6 + $0x248] sm:$0xff]  ;;  %v2697_v63 = vld [vmem:[#allocation6 + $0x258] sm:$0xff] }
 0x67e   : > { %4081 = vmatpush1.bf16.msra.mxu0 %v4080_v16  ;;  %v4118_v16 = vpack.c.bf16 %v2300_v13, %v2298_v11 }
 0x67f   : > { %4083 = vmatprep.subr.bf16.mxu0 %v4082_v18  ;;  %v2297_v18 = vld [vmem:[#allocation4 + $0x480] sm:$0xff] }
 0x682   : > { %4085 = vmatpush1.bf16.msra.mxu0 %v4084_v12  ;;  %v2301_v12 = vld [vmem:[#allocation4 + $0x4a0] sm:$0xff] }
 0x683   : > { %4087 = vmatprep.subr.bf16.mxu0 %v4086_v22  ;;  %v2303_v22 = vld [vmem:[#allocation4 + $0x4b0] sm:$0xff] }
 0x684   : > { %v4124_v25 = vpack.c.bf16 %v2303_v22, %v2301_v12  ;;  %v2342_v12 = vld [vmem:[#allocation4 + $0x5e8] sm:$0xff]  ;;  %v2344_v22 = vld [vmem:[#allocation4 + $0x5f8] sm:$0xff] }
 0x685   : > { %v4162_v24 = vpack.c.bf16 %v2344_v22, %v2342_v12  ;;  %v2706_v12 = vld [vmem:[#allocation6 + $0x2a0] sm:$0xff]  ;;  %v2708_v22 = vld [vmem:[#allocation6 + $0x2b0] sm:$0xff] }
 0x686   : > { %4089 = vmatpush1.bf16.msra.mxu0 %v4088_v27  ;;  %v2305_v27 = vld [vmem:[#allocation4 + $0x4c0] sm:$0xff] }
 0x687   : > { %4091 = vmatprep.subr.bf16.mxu0 %v4090_v29  ;;  %v2307_v29 = vld [vmem:[#allocation4 + $0x4d0] sm:$0xff] }
 0x688   : > { %v4128_v32 = vpack.c.bf16 %v2307_v29, %v2305_v27  ;;  %v2418_v29 = vld [vmem:[%s5366_s6] ss:$4 sm:$0x3] }
 0x689   : > { %v2423_v30 = vrot.slane %v2418_v29, %v5219_v59  ;;  %v2427_v31 = vrot.slane %v2418_v29, %v5222_v60  ;;  %v2712_v29 = vld [vmem:[#allocation6 + $0x2d0] sm:$0xff] }
 0x68a   : > { %4093 = vmatpush1.bf16.msra.mxu0 %v4092_v34  ;;  %v2309_v34 = vld [vmem:[#allocation4 + $0x4e0] sm:$0xff] }
 0x68b   : > { %4095 = vmatprep.subr.bf16.mxu0 %v4094_v35  ;;  %v2311_v35 = vld [vmem:[#allocation4 + $0x4f0] sm:$0xff] }
 0x68c   : > { %v4132_v38 = vpack.c.bf16 %v2311_v35, %v2309_v34 }
 0x68e   : > { %4097 = vmatpush1.bf16.msra.mxu0 %v4096_v39  ;;  %v2313_v39 = vld [vmem:[#allocation4 + $0x500] sm:$0xff] }
 0x68f   : > { %4099 = vmatprep.subr.bf16.mxu0 %v4098_v40  ;;  %v2315_v40 = vld [vmem:[#allocation4 + $0x510] sm:$0xff] }
 0x690   : > { %v4136_v44 = vpack.c.bf16 %v2315_v40, %v2313_v39 }
 0x692   : > { %4101 = vmatpush1.bf16.msra.mxu0 %v4100_v46  ;;  %v2317_v46 = vld [vmem:[#allocation4 + $0x520] sm:$0xff] }
 0x693   : > { %4103 = vmatprep.subr.bf16.mxu0 %v4102_v47  ;;  %v2319_v47 = vld [vmem:[#allocation4 + $0x530] sm:$0xff] }
 0x694   : > { %v4140_v50 = vpack.c.bf16 %v2319_v47, %v2317_v46  ;;  %v2687_v47 = vld [vmem:[#allocation6 + $0x208] sm:$0xff] }
 0x695   : > { %2202 = vmatmul.mubr.f32.vlgmr.msra.gmra.mrb[18].mxu0 %v5280_v57  ;;  %v4116_v57 = vpack.c.bf16 %v2295_v10, %v2293_v2  ;;  %v2334_v2 = vld [vmem:[#allocation4 + $0x5a8] sm:$0xff]  ;;  %v2336_v10 = vld [vmem:[#allocation4 + $0x5b8] sm:$0xff] }
 0x696   : > { %4105 = vmatpush1.bf16.msra.mxu0 %v4104_v52  ;;  %2409 = vmatprep.mubr.f32.mxu0 %v5284_v5  ;;  %v2299_v5 = vld [vmem:[#allocation4 + $0x490] sm:$0xff]  ;;  %v2321_v52 = vld [vmem:[#allocation4 + $0x540] sm:$0xff]  ;;  %v4154_v13 = vpack.c.bf16 %v2336_v10, %v2334_v2 }
 0x697   : > { %4107 = vmatprep.subr.bf16.mxu0 %v4106_v53  ;;  %v4120_v21 = vpack.c.bf16 %v2299_v5, %v2297_v18  ;;  %v2323_v53 = vld [vmem:[#allocation4 + $0x550] sm:$0xff]  ;;  %v2338_v18 = vld [vmem:[#allocation4 + $0x5c8] sm:$0xff]  ;;  %v2340_v5 = vld [vmem:[#allocation4 + $0x5d8] sm:$0xff] }
 0x698   : > { %v4144_v56 = vpack.c.bf16 %v2323_v53, %v2321_v52  ;;  %v4158_v20 = vpack.c.bf16 %v2340_v5, %v2338_v18  ;;  %v2686_v52 = vld [vmem:[#allocation6 + $0x200] sm:$0xff]  ;;  %v2688_v53 = vld [vmem:[#allocation6 + $0x210] sm:$0xff] }
 0x699   : > { %v2698_v10 = vld [vmem:[#allocation6 + $0x260] sm:$0xff]  ;;  %v2704_v5 = vld [vmem:[#allocation6 + $0x290] sm:$0xff] }
 0x69a   : > { %4109 = vmatpush1.bf16.msra.mxu0 %v4108_v37  ;;  %v2325_v37 = vld [vmem:[#allocation4 + $0x560] sm:$0xff] }
 0x69b   : > { %4111 = vmatprep.subr.bf16.mxu0 %v4110_v61  ;;  %v2327_v61 = vld [vmem:[#allocation4 + $0x570] sm:$0xff]  ;;  %v2702_v18 = vld [vmem:[#allocation6 + $0x280] sm:$0xff] }
 0x69c   : > { %v4148_v6 = vpack.c.bf16 %v2327_v61, %v2325_v37  ;;  %v2690_v37 = vld [vmem:[#allocation6 + $0x220] sm:$0xff]  ;;  %v2692_v61 = vld [vmem:[#allocation6 + $0x230] sm:$0xff] }
 0x69e   : > { %4113 = vmatpush1.bf16.msra.mxu0 %v4112_v7  ;;  %v2329_v7 = vld [vmem:[#allocation4 + $0x580] sm:$0xff] }
 0x69f   : > { %4115 = vmatprep.subr.bf16.mxu0 %v4114_v9  ;;  %v2331_v9 = vld [vmem:[#allocation4 + $0x590] sm:$0xff] }
 0x6a0   : > { %v4152_v11 = vpack.c.bf16 %v2331_v9, %v2329_v7  ;;  %v2696_v7 = vld [vmem:[#allocation6 + $0x250] sm:$0xff]  ;;  %v2701_v9 = vld [vmem:[#allocation6 + $0x278] sm:$0xff] }
 0x6a2   : > { %4117 = vmatpush1.bf16.msra.mxu0 %v4116_v57  ;;  %v2333_v57 = vld [vmem:[#allocation4 + $0x5a0] sm:$0xff] }
 0x6a3   : > { %4119 = vmatprep.subr.bf16.mxu0 %v4118_v16  ;;  %v2335_v16 = vld [vmem:[#allocation4 + $0x5b0] sm:$0xff] }
 0x6a4   : > { %v4156_v19 = vpack.c.bf16 %v2335_v16, %v2333_v57  ;;  %v2705_v57 = vld [vmem:[#allocation6 + $0x298] sm:$0xff] }
 0x6a6   : > { %4121 = vmatpush1.bf16.msra.mxu0 %v4120_v21  ;;  %v2337_v21 = vld [vmem:[#allocation4 + $0x5c0] sm:$0xff] }
 0x6a7   : > { %4123 = vmatprep.subr.bf16.mxu0 %v4122_v14  ;;  %v2339_v14 = vld [vmem:[#allocation4 + $0x5d0] sm:$0xff] }
 0x6a8   : > { %v4160_v23 = vpack.c.bf16 %v2339_v14, %v2337_v21  ;;  %v4184_v21 = vpack.c.bf16 %v2704_v5, %v2702_v18  ;;  %v2744_v18 = vld [vmem:[#allocation6 + $0x3d0] sm:$0xff] }
 0x6aa   : > { %4125 = vmatpush1.bf16.msra.mxu0 %v4124_v25  ;;  %v2341_v25 = vld [vmem:[#allocation4 + $0x5e0] sm:$0xff] }
 0x6ab   : > { %4127 = vmatprep.subr.bf16.mxu0 %v4126_v26  ;;  %v2343_v26 = vld [vmem:[#allocation4 + $0x5f0] sm:$0xff] }
 0x6ac   : > { %v4164_v27 = vpack.c.bf16 %v2343_v26, %v2341_v25  ;;  %v4188_v25 = vpack.c.bf16 %v2708_v22, %v2706_v12  ;;  %v2748_v12 = vld [vmem:[#allocation6 + $0x3f0] sm:$0xff] }
 0x6ae   : > { %4129 = vmatpush1.bf16.msra.mxu0 %v4128_v32  ;;  %v3514_v32 = vld [vmem:[%s5366_s6 + $0x1] ss:$4 sm:$0x3] }
 0x6af   : > { %4131 = vmatprep.subr.bf16.mxu0 %v4130_v33  ;;  %v2444_v28 = vrot.slane %v3514_v32, %v5219_v59 }
 0x6b2   : > { %4133 = vmatpush1.bf16.msra.mxu0 %v4132_v38 }
 0x6b3   : > { %4135 = vmatprep.subr.bf16.mxu0 %v4134_v41  ;;  %v2448_v41 = vrot.slane %v3514_v32, %v5222_v60 }
 0x6b6   : > { %4137 = vmatpush1.bf16.msra.mxu0 %v4136_v44 }
 0x6b7   : > { %4139 = vmatprep.subr.bf16.mxu0 %v4138_v45 }
 0x6ba   : > { %4141 = vmatpush1.bf16.msra.mxu0 %v4140_v50 }
 0x6bb   : > { %4143 = vmatprep.subr.bf16.mxu0 %v4142_v51  ;;  %v4166_v51 = vpack.c.bf16 %v2689_v48, %v2687_v47  ;;  %v2727_v47 = vld [vmem:[#allocation6 + $0x348] sm:$0xff]  ;;  %v2729_v48 = vld [vmem:[#allocation6 + $0x358] sm:$0xff] }
 0x6be   : > { %4145 = vmatpush1.bf16.msra.mxu0 %v4144_v56  ;;  %v4168_v56 = vpack.c.bf16 %v2688_v53, %v2686_v52  ;;  %v2728_v52 = vld [vmem:[#allocation6 + $0x350] sm:$0xff]  ;;  %v2731_v53 = vld [vmem:[#allocation6 + $0x368] sm:$0xff] }
 0x6bf   : > { %4147 = vmatprep.subr.bf16.mxu0 %v4146_v58  ;;  %v4170_v58 = vpack.c.bf16 %v2693_v55, %v2691_v54  ;;  %v2733_v54 = vld [vmem:[#allocation6 + $0x378] sm:$0xff] }
 0x6c2   : > { %4149 = vmatpush1.bf16.msra.mxu0 %v4148_v6  ;;  %v4174_v6 = vpack.c.bf16 %v2697_v63, %v2695_v62  ;;  %v2737_v62 = vld [vmem:[#allocation6 + $0x398] sm:$0xff] }
 0x6c3   : > { %4151 = vmatprep.subr.bf16.mxu0 %v4150_v8  ;;  %v2694_v8 = vld [vmem:[#allocation6 + $0x240] sm:$0xff] }
 0x6c4   : > { %v4176_v2 = vpack.c.bf16 %v2696_v7, %v2694_v8  ;;  %v2736_v8 = vld [vmem:[#allocation6 + $0x390] sm:$0xff]  ;;  %v2739_v7 = vld [vmem:[#allocation6 + $0x3a8] sm:$0xff] }
 0x6c6   : > { %4153 = vmatpush1.bf16.msra.mxu0 %v4152_v11  ;;  %v2700_v11 = vld [vmem:[#allocation6 + $0x270] sm:$0xff] }
 0x6c7   : > { %4155 = vmatprep.subr.bf16.mxu0 %v4154_v13  ;;  %v2703_v13 = vld [vmem:[#allocation6 + $0x288] sm:$0xff]  ;;  %v4180_v16 = vpack.c.bf16 %v2700_v11, %v2698_v10  ;;  %v2740_v10 = vld [vmem:[#allocation6 + $0x3b0] sm:$0xff] }
 0x6c8   : > { %v2743_v11 = vld [vmem:[#allocation6 + $0x3c8] sm:$0xff] }
 0x6ca   : > { %4157 = vmatpush1.bf16.msra.mxu0 %v4156_v19  ;;  %v2707_v19 = vld [vmem:[#allocation6 + $0x2a8] sm:$0xff] }
 0x6cb   : > { %4159 = vmatprep.subr.bf16.mxu0 %v4158_v20  ;;  %v2709_v20 = vld [vmem:[#allocation6 + $0x2b8] sm:$0xff] }
 0x6cc   : > { %v4186_v14 = vpack.c.bf16 %v2709_v20, %v2707_v19  ;;  %v2747_v19 = vld [vmem:[#allocation6 + $0x3e8] sm:$0xff]  ;;  %v2749_v20 = vld [vmem:[#allocation6 + $0x3f8] sm:$0xff] }
 0x6ce   : > { %4161 = vmatpush1.bf16.msra.mxu0 %v4160_v23  ;;  %v2711_v23 = vld [vmem:[#allocation6 + $0x2c8] sm:$0xff] }
 0x6cf   : > { %4163 = vmatprep.subr.bf16.mxu0 %v4162_v24  ;;  %v2713_v24 = vld [vmem:[#allocation6 + $0x2d8] sm:$0xff] }
 0x6d0   : > { %v4190_v26 = vpack.c.bf16 %v2713_v24, %v2711_v23  ;;  %v2550_v23 = vld [vmem:[#allocation6 + $0x8] sm:$0xff]  ;;  %v2552_v24 = vld [vmem:[#allocation6 + $0x18] sm:$0xff] }
 0x6d2   : > { %4165 = vmatpush1.bf16.msra.mxu0 %v4164_v27  ;;  %v2710_v27 = vld [vmem:[#allocation6 + $0x2c0] sm:$0xff] }
 0x6d3   : > { %v4192_v32 = vpack.c.bf16 %v2712_v29, %v2710_v27  ;;  %v2549_v29 = vld [vmem:[#allocation6] sm:$0xff] }
 0x6d5   : > { %2410 = vmatmul.mubr.f32.vlgmr.msra.gmra.mrb[18].mxu0 %v5282_v0  ;;  %v3515_v0 = vld [vmem:[%s5366_s6 + $0x2] ss:$4 sm:$0x3] }
 0x6d6   : > { %2958 = vmatprep.mubr.f32.mxu0 %v4644_v1  ;;  %v2463_v42 = vrot.slane %v3515_v0, %v5222_v60  ;;  %v2459_v44 = vrot.slane %v3515_v0, %v5219_v59  ;;  %v2721_v0 = vld [vmem:[#allocation6 + $0x318] sm:$0xff] }
 0x7a8   : > { %v2411_v33 = vpop.f32.mrb[18].mxu0 }
 0x7a9   : > { %v2430_v34 = vadd.f32 %v2423_v30, %v2411_v33  ;;  %v2413_v35 = vpop.f32.mrb[19].mxu0  ;;  %v2715_v30 = vld [vmem:[#allocation6 + $0x2e8] sm:$0xff] }
 0x7aa   : > { %v2431_v36 = vadd.f32 %v2427_v31, %v2413_v35  ;;  %v2717_v31 = vld [vmem:[#allocation6 + $0x2f8] sm:$0xff]  ;;  %v2716_v35 = vld [vmem:[#allocation6 + $0x2f0] sm:$0xff] }
 0x7ab   : > { %vm2432_vm15 = vcmp.ge.f32.partialorder %v2430_v34, 0.0  ;;  %v2434_v38 = vmul.f32 0.2, %v2430_v34  ;;  %v4194_v33 = vpack.c.bf16 %v2717_v31, %v2715_v30  ;;  %v2551_v30 = vld [vmem:[#allocation6 + $0x10] sm:$0xff]  ;;  %v2554_v31 = vld [vmem:[#allocation6 + $0x28] sm:$0xff] }
 0x7ac   : > { %vm2433_vm0 = vcmp.ge.f32.partialorder %v2431_v36, 0.0  ;;  %v2435_v39 = vmul.f32 0.2, %v2431_v36 }
 0x7ad   : > { %v2436_v40 = vsel %vm2432_vm15, %v2430_v34, %v2434_v38  ;;  %v2714_v34 = vld [vmem:[#allocation6 + $0x2e0] sm:$0xff] }
 0x7ae   : > { %v2451_v43 = vmul.f32 %v2444_v28, %v2436_v40  ;;  %v2437_v45 = vsel %vm2433_vm0, %v2431_v36, %v2435_v39  ;;  %v2719_v28 = vld [vmem:[#allocation6 + $0x308] sm:$0xff]  ;;  %v4196_v36 = vpack.c.bf16 %v2716_v35, %v2714_v34  ;;  %v2720_v39 = vld [vmem:[#allocation6 + $0x310] sm:$0xff]  ;;  %v4232_v35 = vpack.c.bf16 %v2551_v30, %v2549_v29  ;;  %v3192_v29 = vld [vmem:[#allocation7 + $0x140] sm:$0xff] }
 0x7af   : > { %v2452_v46 = vmul.f32 %v2448_v41, %v2437_v45  ;;  %v4198_v38 = vpack.c.bf16 %v2721_v0, %v2719_v28  ;;  %v2718_v41 = vld [vmem:[#allocation6 + $0x300] sm:$0xff]  ;;  %v2723_v40 = vld [vmem:[#allocation6 + $0x328] sm:$0xff] }
 0x7b0   : > { %v2466_v50 = vadd.f32 %v2459_v44, %v2451_v43  ;;  %v4200_v43 = vpack.c.bf16 %v2720_v39, %v2718_v41  ;;  %v2722_v45 = vld [vmem:[#allocation6 + $0x320] sm:$0xff]  ;;  %v2555_v41 = vld [vmem:[#allocation6 + $0x30] sm:$0xff]  ;;  %v2558_v39 = vld [vmem:[#allocation6 + $0x48] sm:$0xff] }
 0x7b1   : > { %v2467_v49 = vadd.f32 %v2463_v42, %v2452_v46  ;;  %v2725_v42 = vld [vmem:[#allocation6 + $0x338] sm:$0xff]  ;;  %v2724_v46 = vld [vmem:[#allocation6 + $0x330] sm:$0xff]  ;;  %v3193_v30 = vld [vmem:[#allocation7 + $0x148] sm:$0xff] }
 0x7b2   : > { %v4202_v44 = vpack.c.bf16 %v2725_v42, %v2723_v40  ;;  %v2560_v40 = vld [vmem:[#allocation6 + $0x58] sm:$0xff]  ;;  %v2557_v42 = vld [vmem:[#allocation6 + $0x40] sm:$0xff] }
 0x7b3   : > { %3516 = vmatprep.subr.msk.mxu1 %vm2471_vm1, %v2467_v49  ;;  %3522 = vmatprep.subr.msk.mxu0 %vm2471_vm1, %v2467_v49 }
 0x7b4   : > { %3517 = vmatpush1.msk.msra.mxu1 %vm2471_vm1, %v2466_v50  ;;  %3523 = vmatpush1.msk.msra.mxu0 %vm2471_vm1, %v2466_v50 }
 0x7b5   : > { %3518 = vmatmul.mubr.msk.f32.vlgmr.msra.gmra.mrb[6].mxu1 %vm2468_vm2, %v4876_v15  ;;  %3519 = vmatprep.subr.msk.mxu1 %vm2471_vm1, %v2467_v49  ;;  %v4172_v15 = vpack.c.bf16 %v2692_v61, %v2690_v37  ;;  %v4204_v49 = vpack.c.bf16 %v2724_v46, %v2722_v45  ;;  %v2732_v37 = vld [vmem:[#allocation6 + $0x370] sm:$0xff]  ;;  %v2735_v61 = vld [vmem:[#allocation6 + $0x388] sm:$0xff]  ;;  %v3184_v46 = vld [vmem:[#allocation7 + $0x100] sm:$0xff] }
 0x7b6   : > { %3520 = vmatpush1.msk.msra.mxu1 %vm2471_vm1, %v2466_v50  ;;  %2679 = vmatprep.mubr.f32.mxu1 %v4644_v1  ;;  %v2699_v1 = vld [vmem:[#allocation6 + $0x268] sm:$0xff]  ;;  %v4206_v50 = vpack.c.bf16 %v2729_v48, %v2727_v47 }
 0x7b7   : > { %3524 = vmatmul.mubr.msk.f32.vlgmr.msra.gmra.mrb[20].mxu0 %vm2468_vm2, %v5116_v4  ;;  %4167 = vmatprep.subr.bf16.mxu1 %v4166_v51  ;;  %v4178_v4 = vpack.c.bf16 %v2701_v9, %v2699_v1  ;;  %v2726_v51 = vld [vmem:[#allocation6 + $0x340] sm:$0xff]  ;;  %v2741_v1 = vld [vmem:[#allocation6 + $0x3b8] sm:$0xff]  ;;  %v3201_v45 = vld [vmem:[#allocation7 + $0x188] sm:$0xff] }
 0x7b8   : > { %v4208_v55 = vpack.c.bf16 %v2728_v52, %v2726_v51  ;;  %v3203_v51 = vld [vmem:[#allocation7 + $0x198] sm:$0xff]  ;;  %v4238_v52 = vpack.c.bf16 %v2560_v40, %v2558_v39  ;;  %v2573_v39 = vld [vmem:[#allocation6 + $0xc0] sm:$0xff]  ;;  %v2575_v40 = vld [vmem:[#allocation6 + $0xd0] sm:$0xff] }
 0x7b9   : > { %3521 = vmatmul.mubr.msk.f32.vlgmr.msra.gmra.mrb[8].mxu1 %vm2468_vm2, %v4890_v17  ;;  %v4182_v17 = vpack.c.bf16 %v2705_v57, %v2703_v13  ;;  %v2745_v13 = vld [vmem:[#allocation6 + $0x3d8] sm:$0xff] }
 0x7ba   : > { %4169 = vmatpush1.bf16.msra.mxu1 %v4168_v56  ;;  %v4210_v56 = vpack.c.bf16 %v2733_v54, %v2731_v53 }
 0x7bb   : > { %4171 = vmatprep.subr.bf16.mxu1 %v4170_v58  ;;  %v2730_v58 = vld [vmem:[#allocation6 + $0x360] sm:$0xff] }
 0x7bc   : > { %v4212_v63 = vpack.c.bf16 %v2732_v37, %v2730_v58  ;;  %v3204_v58 = vld [vmem:[#allocation7 + $0x1a0] sm:$0xff]  ;;  %v2562_v37 = vld [vmem:[#allocation6 + $0x68] sm:$0xff] }
 0x7be   : > { %4173 = vmatpush1.bf16.msra.mxu1 %v4172_v15  ;;  %v4214_v15 = vpack.c.bf16 %v2737_v62, %v2735_v61  ;;  %v2564_v61 = vld [vmem:[#allocation6 + $0x78] sm:$0xff]  ;;  %v3205_v62 = vld [vmem:[#allocation7 + $0x1a8] sm:$0xff] }
 0x7bf   : > { %4175 = vmatprep.subr.bf16.mxu1 %v4174_v6  ;;  %v2734_v6 = vld [vmem:[#allocation6 + $0x380] sm:$0xff] }
 0x7c0   : > { %v4216_v9 = vpack.c.bf16 %v2736_v8, %v2734_v6  ;;  %v2561_v6 = vld [vmem:[#allocation6 + $0x60] sm:$0xff]  ;;  %v4366_v8 = vpack.c.bf16 %v3205_v62, %v3204_v58  ;;  %v2590_v62 = vld [vmem:[#allocation6 + $0x148] sm:$0xff] }
 0x7c2   : > { %4177 = vmatpush1.bf16.msra.mxu1 %v4176_v2  ;;  %v4218_v2 = vpack.c.bf16 %v2741_v1, %v2739_v7  ;;  %v3188_v7 = vld [vmem:[#allocation7 + $0x120] sm:$0xff]  ;;  %v3189_v1 = vld [vmem:[#allocation7 + $0x128] sm:$0xff] }
 0x7c3   : > { %4179 = vmatprep.subr.bf16.mxu1 %v4178_v4  ;;  %v2738_v4 = vld [vmem:[#allocation6 + $0x3a0] sm:$0xff] }
 0x7c4   : > { %v4220_v57 = vpack.c.bf16 %v2740_v10, %v2738_v4  ;;  %v3206_v4 = vld [vmem:[#allocation7 + $0x1b0] sm:$0xff]  ;;  %v3207_v10 = vld [vmem:[#allocation7 + $0x1b8] sm:$0xff] }
 0x7c6   : > { %4181 = vmatpush1.bf16.msra.mxu1 %v4180_v16  ;;  %v4222_v16 = vpack.c.bf16 %v2745_v13, %v2743_v11  ;;  %v2566_v11 = vld [vmem:[#allocation6 + $0x88] sm:$0xff]  ;;  %v2568_v13 = vld [vmem:[#allocation6 + $0x98] sm:$0xff] }
 0x7c7   : > { %4183 = vmatprep.subr.bf16.mxu1 %v4182_v17  ;;  %v2742_v17 = vld [vmem:[#allocation6 + $0x3c0] sm:$0xff] }
 0x7c8   : > { %v4224_v5 = vpack.c.bf16 %v2744_v18, %v2742_v17  ;;  %v2565_v17 = vld [vmem:[#allocation6 + $0x80] sm:$0xff]  ;;  %v4370_v18 = vpack.c.bf16 %v3207_v10, %v3206_v4 }
 0x7c9   : > { %v2593_v10 = vld [vmem:[#allocation6 + $0x160] sm:$0xff] }
 0x7ca   : > { %4185 = vmatpush1.bf16.msra.mxu1 %v4184_v21  ;;  %v4226_v21 = vpack.c.bf16 %v2749_v20, %v2747_v19  ;;  %v3191_v19 = vld [vmem:[#allocation7 + $0x138] sm:$0xff]  ;;  %v4246_v20 = vpack.c.bf16 %v2568_v13, %v2566_v11  ;;  %v2595_v11 = vld [vmem:[#allocation6 + $0x170] sm:$0xff]  ;;  %v2598_v13 = vld [vmem:[#allocation6 + $0x188] sm:$0xff] }
 0x7cb   : > { %4187 = vmatprep.subr.bf16.mxu1 %v4186_v14  ;;  %v2746_v14 = vld [vmem:[#allocation6 + $0x3e0] sm:$0xff] }
 0x7cc   : > { %v4228_v22 = vpack.c.bf16 %v2748_v12, %v2746_v14  ;;  %v3208_v14 = vld [vmem:[#allocation7 + $0x1c0] sm:$0xff]  ;;  %v3209_v12 = vld [vmem:[#allocation7 + $0x1c8] sm:$0xff] }
 0x7ce   : > { %4189 = vmatpush1.bf16.msra.mxu1 %v4188_v25  ;;  %v4230_v25 = vpack.c.bf16 %v2552_v24, %v2550_v23  ;;  %v2572_v23 = vld [vmem:[#allocation6 + $0xb8] sm:$0xff] }
 0x7cf   : > { %4191 = vmatprep.subr.bf16.mxu1 %v4190_v26 }
 0x7d2   : > { %4193 = vmatpush1.bf16.msra.mxu1 %v4192_v32  ;;  %v2556_v32 = vld [vmem:[#allocation6 + $0x38] sm:$0xff] }
 0x7d3   : > { %4195 = vmatprep.subr.bf16.mxu1 %v4194_v33 }
 0x7d6   : > { %4197 = vmatpush1.bf16.msra.mxu1 %v4196_v36  ;;  %v4234_v36 = vpack.c.bf16 %v2556_v32, %v2554_v31  ;;  %v2569_v32 = vld [vmem:[#allocation6 + $0xa0] sm:$0xff] }
 0x7d7   : > { %4199 = vmatprep.subr.bf16.mxu1 %v4198_v38  ;;  %v2553_v38 = vld [vmem:[#allocation6 + $0x20] sm:$0xff] }
 0x7d8   : > { %v4236_v47 = vpack.c.bf16 %v2555_v41, %v2553_v38 }
 0x7da   : > { %4201 = vmatpush1.bf16.msra.mxu1 %v4200_v43  ;;  %v2559_v43 = vld [vmem:[#allocation6 + $0x50] sm:$0xff] }
 0x7db   : > { %4203 = vmatprep.subr.bf16.mxu1 %v4202_v44  ;;  %v3200_v44 = vld [vmem:[#allocation7 + $0x180] sm:$0xff] }
 0x7dc   : > { %v4358_v48 = vpack.c.bf16 %v3201_v45, %v3200_v44  ;;  %v4256_v44 = vpack.c.bf16 %v2575_v40, %v2573_v39 }
 0x7de   : > { %4205 = vmatpush1.bf16.msra.mxu1 %v4204_v49  ;;  %v3185_v49 = vld [vmem:[#allocation7 + $0x108] sm:$0xff]  ;;  %4359 = vmatprep.subr.bf16.mxu0 %v4358_v48 }
 0x7df   : > { %4207 = vmatprep.subr.bf16.mxu1 %v4206_v50  ;;  %v3202_v50 = vld [vmem:[#allocation7 + $0x190] sm:$0xff]  ;;  %v4360_v53 = vpack.c.bf16 %v3185_v49, %v3184_v46  ;;  %v2577_v46 = vld [vmem:[#allocation6 + $0xe0] sm:$0xff]  ;;  %v2582_v48 = vld [vmem:[#allocation6 + $0x108] sm:$0xff] }
 0x7e0   : > { %v4362_v54 = vpack.c.bf16 %v3203_v51, %v3202_v50  ;;  %v2584_v49 = vld [vmem:[#allocation6 + $0x118] sm:$0xff] }
 0x7e1   : > { %4361 = vmatpush3.bf16.msra.mxu0 %v4360_v53  ;;  %v4262_v51 = vpack.c.bf16 %v2584_v49, %v2582_v48  ;;  %v2583_v53 = vld [vmem:[#allocation6 + $0x110] sm:$0xff]  ;;  %v2969_v48 = vld [vmem:[#allocation6 + $0x420] sm:$0xff] }
 0x7e2   : > { %4209 = vmatpush1.bf16.msra.mxu1 %v4208_v55  ;;  %v3186_v55 = vld [vmem:[#allocation7 + $0x110] sm:$0xff]  ;;  %4363 = vmatprep.subr.bf16.mxu0 %v4362_v54  ;;  %v2586_v54 = vld [vmem:[#allocation6 + $0x128] sm:$0xff] }
 0x7e3   : > { %4211 = vmatprep.subr.bf16.mxu1 %v4210_v56  ;;  %v3187_v56 = vld [vmem:[#allocation7 + $0x118] sm:$0xff]  ;;  %v2971_v49 = vld [vmem:[#allocation6 + $0x430] sm:$0xff] }
 0x7e6   : > { %4213 = vmatpush1.bf16.msra.mxu1 %v4212_v63  ;;  %v4364_v63 = vpack.c.bf16 %v3187_v56, %v3186_v55  ;;  %v2588_v55 = vld [vmem:[#allocation6 + $0x138] sm:$0xff] }
 0x7e7   : > { %4215 = vmatprep.subr.bf16.mxu1 %v4214_v15  ;;  %v4240_v15 = vpack.c.bf16 %v2559_v43, %v2557_v42  ;;  %v2578_v42 = vld [vmem:[#allocation6 + $0xe8] sm:$0xff]  ;;  %v2580_v43 = vld [vmem:[#allocation6 + $0xf8] sm:$0xff]  ;;  %v4266_v58 = vpack.c.bf16 %v2588_v55, %v2586_v54  ;;  %v2973_v54 = vld [vmem:[#allocation6 + $0x440] sm:$0xff] }
 0x7e8   : > { %4365 = vmatpush3.bf16.msra.mxu0 %v4364_v63  ;;  %v4258_v45 = vpack.c.bf16 %v2580_v43, %v2578_v42  ;;  %v2592_v63 = vld [vmem:[#allocation6 + $0x158] sm:$0xff]  ;;  %v2965_v42 = vld [vmem:[#allocation6 + $0x400] sm:$0xff]  ;;  %v2967_v43 = vld [vmem:[#allocation6 + $0x410] sm:$0xff] }
 0x7e9   : > { %4367 = vmatprep.subr.bf16.mxu0 %v4366_v8  ;;  %v2589_v8 = vld [vmem:[#allocation6 + $0x140] sm:$0xff]  ;;  %v2975_v55 = vld [vmem:[#allocation6 + $0x450] sm:$0xff] }
 0x7ea   : > { %4217 = vmatpush1.bf16.msra.mxu1 %v4216_v9  ;;  %v4242_v9 = vpack.c.bf16 %v2564_v61, %v2562_v37  ;;  %v2585_v37 = vld [vmem:[#allocation6 + $0x120] sm:$0xff]  ;;  %v2587_v61 = vld [vmem:[#allocation6 + $0x130] sm:$0xff] }
 0x7eb   : > { %4219 = vmatprep.subr.bf16.mxu1 %v4218_v2  ;;  %v2563_v2 = vld [vmem:[#allocation6 + $0x70] sm:$0xff] }
 0x7ee   : > { %4221 = vmatpush1.bf16.msra.mxu1 %v4220_v57  ;;  %v4368_v57 = vpack.c.bf16 %v3189_v1, %v3188_v7  ;;  %v2591_v7 = vld [vmem:[#allocation6 + $0x150] sm:$0xff]  ;;  %v2594_v1 = vld [vmem:[#allocation6 + $0x168] sm:$0xff] }
 0x7ef   : > { %4223 = vmatprep.subr.bf16.mxu1 %v4222_v16  ;;  %v4244_v16 = vpack.c.bf16 %v2563_v2, %v2561_v6  ;;  %v4270_v6 = vpack.c.bf16 %v2592_v63, %v2590_v62  ;;  %v4272_v2 = vpack.c.bf16 %v2591_v7, %v2589_v8  ;;  %v2977_v62 = vld [vmem:[#allocation6 + $0x460] sm:$0xff]  ;;  %v2979_v63 = vld [vmem:[#allocation6 + $0x470] sm:$0xff] }
 0x7f0   : > { %4369 = vmatpush3.bf16.msra.mxu0 %v4368_v57  ;;  %v2600_v57 = vld [vmem:[#allocation6 + $0x198] sm:$0xff]  ;;  %v2981_v7 = vld [vmem:[#allocation6 + $0x480] sm:$0xff] }
 0x7f1   : > { %4371 = vmatprep.subr.bf16.mxu0 %v4370_v18  ;;  %v2597_v18 = vld [vmem:[#allocation6 + $0x180] sm:$0xff] }
 0x7f2   : > { %4225 = vmatpush1.bf16.msra.mxu1 %v4224_v5  ;;  %v3190_v5 = vld [vmem:[#allocation7 + $0x130] sm:$0xff] }
 0x7f3   : > { %4227 = vmatprep.subr.bf16.mxu1 %v4226_v21  ;;  %v2567_v21 = vld [vmem:[#allocation6 + $0x90] sm:$0xff]  ;;  %v4372_v24 = vpack.c.bf16 %v3191_v19, %v3190_v5  ;;  %v2602_v19 = vld [vmem:[#allocation6 + $0x1a8] sm:$0xff] }
 0x7f4   : > { %v2599_v5 = vld [vmem:[#allocation6 + $0x190] sm:$0xff] }
 0x7f5   : > { %4373 = vmatpush3.bf16.msra.mxu0 %v4372_v24  ;;  %v2608_v24 = vld [vmem:[#allocation6 + $0x1d8] sm:$0xff] }
 0x7f6   : > { %4229 = vmatpush1.bf16.msra.mxu1 %v4228_v22  ;;  %v2570_v22 = vld [vmem:[#allocation6 + $0xa8] sm:$0xff] }
 0x7f7   : > { %4231 = vmatprep.subr.bf16.mxu1 %v4230_v25  ;;  %v4248_v25 = vpack.c.bf16 %v2567_v21, %v2565_v17  ;;  %v4250_v31 = vpack.c.bf16 %v2572_v23, %v2570_v22  ;;  %v4278_v17 = vpack.c.bf16 %v2600_v57, %v2598_v13  ;;  %v4280_v21 = vpack.c.bf16 %v2599_v5, %v2597_v18  ;;  %v2603_v22 = vld [vmem:[#allocation6 + $0x1b0] sm:$0xff]  ;;  %v2606_v23 = vld [vmem:[#allocation6 + $0x1c8] sm:$0xff]  ;;  %v2992_v57 = vld [vmem:[#allocation6 + $0x4d8] sm:$0xff] }
 0x7f8   : > { %v2990_v13 = vld [vmem:[#allocation6 + $0x4c8] sm:$0xff]  ;;  %v2989_v18 = vld [vmem:[#allocation6 + $0x4c0] sm:$0xff]  ;;  %v2991_v5 = vld [vmem:[#allocation6 + $0x4d0] sm:$0xff] }
 0x888   : > { %v5318_v26 = vpop.f32.mrb[6].mxu1 }
 0x889   : > { %v2546_v27 = vpop.f32.mrb[7].mxu1 }
 0x88a   : > { %v5320_v33 = vpop.f32.mrb[20].mxu0 }
 0x88b   : > { %v5322_v28 = vpop.f32.mrb[21].mxu0 }
 0x88c   : > { %v2681_v34 = vpop.f32.mrb[8].mxu1 }
 0x88d   : > { %v2683_v0 = vpop.f32.mrb[9].mxu1 }
 0x88e   : > { %2814 = vmatprep.mubr.f32.mxu1 %v2683_v0  ;;  %v2576_v0 = vld [vmem:[#allocation6 + $0xd8] sm:$0xff] }
 0x88f   : > { %2815 = vmatmul.mubr.f32.vlgmr.msra.gmra.mrb[10].mxu1 %v2681_v34  ;;  %v2571_v34 = vld [vmem:[#allocation6 + $0xb0] sm:$0xff] }
 0x890   : > { %4233 = vmatpush1.bf16.msra.mxu1 %v4232_v35  ;;  %2885 = vmatprep.mubr.f32.mxu1 %v2546_v27  ;;  %v4374_v27 = vpack.c.bf16 %v3209_v12, %v3208_v14  ;;  %v2574_v35 = vld [vmem:[#allocation6 + $0xc8] sm:$0xff]  ;;  %v4252_v38 = vpack.c.bf16 %v2571_v34, %v2569_v32  ;;  %v2601_v12 = vld [vmem:[#allocation6 + $0x1a0] sm:$0xff]  ;;  %v2612_v32 = vld [vmem:[#allocation6 + $0x1f8] sm:$0xff] }
 0x891   : > { %4235 = vmatprep.subr.bf16.mxu1 %v4234_v36  ;;  %v4376_v36 = vpack.c.bf16 %v3193_v30, %v3192_v29  ;;  %v4254_v41 = vpack.c.bf16 %v2576_v0, %v2574_v35  ;;  %v2605_v29 = vld [vmem:[#allocation6 + $0x1c0] sm:$0xff]  ;;  %v2607_v30 = vld [vmem:[#allocation6 + $0x1d0] sm:$0xff] }
 0x892   : > { %4375 = vmatprep.subr.bf16.mxu0 %v4374_v27  ;;  %v4286_v27 = vpack.c.bf16 %v2608_v24, %v2606_v23  ;;  %v4288_v34 = vpack.c.bf16 %v2607_v30, %v2605_v29  ;;  %v2609_v0 = vld [vmem:[#allocation6 + $0x1e0] sm:$0xff]  ;;  %v2998_v23 = vld [vmem:[#allocation6 + $0x508] sm:$0xff]  ;;  %v3000_v24 = vld [vmem:[#allocation6 + $0x518] sm:$0xff] }
 0x893   : > { %4377 = vmatpush3.bf16.msra.mxu0 %v4376_v36  ;;  %v2611_v36 = vld [vmem:[#allocation6 + $0x1f0] sm:$0xff]  ;;  %v2997_v29 = vld [vmem:[#allocation6 + $0x500] sm:$0xff] }
 0x894   : > { %4237 = vmatpush1.bf16.msra.mxu1 %v4236_v47  ;;  %v2579_v47 = vld [vmem:[#allocation6 + $0xf0] sm:$0xff]  ;;  %v4292_v39 = vpack.c.bf16 %v2611_v36, %v2609_v0  ;;  %v3001_v0 = vld [vmem:[#allocation6 + $0x520] sm:$0xff] }
 0x895   : > { %4239 = vmatprep.subr.bf16.mxu1 %v4238_v52  ;;  %v4260_v50 = vpack.c.bf16 %v2579_v47, %v2577_v46  ;;  %v2581_v52 = vld [vmem:[#allocation6 + $0x100] sm:$0xff]  ;;  %v4296_v46 = vpack.c.bf16 %v2967_v43, %v2965_v42  ;;  %v2999_v30 = vld [vmem:[#allocation6 + $0x510] sm:$0xff] }
 0x896   : > { %v4264_v56 = vpack.c.bf16 %v2583_v53, %v2581_v52  ;;  %v4300_v52 = vpack.c.bf16 %v2971_v49, %v2969_v48  ;;  %v3003_v36 = vld [vmem:[#allocation6 + $0x530] sm:$0xff]  ;;  %v3005_v42 = vld [vmem:[#allocation6 + $0x540] sm:$0xff] }
 0x897   : > { %v3007_v43 = vld [vmem:[#allocation6 + $0x550] sm:$0xff]  ;;  %v3009_v48 = vld [vmem:[#allocation6 + $0x560] sm:$0xff] }
 0x898   : > { %4241 = vmatpush1.bf16.msra.mxu1 %v4240_v15  ;;  %v4268_v15 = vpack.c.bf16 %v2587_v61, %v2585_v37  ;;  %v4304_v37 = vpack.c.bf16 %v2975_v55, %v2973_v54  ;;  %v3011_v49 = vld [vmem:[#allocation6 + $0x570] sm:$0xff]  ;;  %v3013_v54 = vld [vmem:[#allocation6 + $0x580] sm:$0xff] }
 0x899   : > { %4243 = vmatprep.subr.bf16.mxu1 %v4242_v9  ;;  %v2596_v9 = vld [vmem:[#allocation6 + $0x178] sm:$0xff]  ;;  %v3015_v55 = vld [vmem:[#allocation6 + $0x590] sm:$0xff] }
 0x89a   : > { %v4274_v4 = vpack.c.bf16 %v2596_v9, %v2594_v1  ;;  %v2986_v1 = vld [vmem:[#allocation6 + $0x4a8] sm:$0xff]  ;;  %v2988_v9 = vld [vmem:[#allocation6 + $0x4b8] sm:$0xff] }
 0x89c   : > { %4245 = vmatpush1.bf16.msra.mxu1 %v4244_v16  ;;  %v4276_v16 = vpack.c.bf16 %v2595_v11, %v2593_v10  ;;  %v2985_v10 = vld [vmem:[#allocation6 + $0x4a0] sm:$0xff]  ;;  %v2987_v11 = vld [vmem:[#allocation6 + $0x4b0] sm:$0xff] }
 0x89d   : > { %4247 = vmatprep.subr.bf16.mxu1 %v4246_v20  ;;  %v2604_v20 = vld [vmem:[#allocation6 + $0x1b8] sm:$0xff] }
 0x89e   : > { %v4282_v14 = vpack.c.bf16 %v2604_v20, %v2602_v19  ;;  %v2994_v19 = vld [vmem:[#allocation6 + $0x4e8] sm:$0xff]  ;;  %v2996_v20 = vld [vmem:[#allocation6 + $0x4f8] sm:$0xff] }
 0x8a0   : > { %4249 = vmatpush1.bf16.msra.mxu1 %v4248_v25  ;;  %v4284_v25 = vpack.c.bf16 %v2603_v22, %v2601_v12  ;;  %v2993_v12 = vld [vmem:[#allocation6 + $0x4e0] sm:$0xff]  ;;  %v2995_v22 = vld [vmem:[#allocation6 + $0x4f0] sm:$0xff] }
 0x8a1   : > { %4251 = vmatprep.subr.bf16.mxu1 %v4250_v31  ;;  %v2610_v31 = vld [vmem:[#allocation6 + $0x1e8] sm:$0xff] }
 0x8a2   : > { %v4290_v35 = vpack.c.bf16 %v2612_v32, %v2610_v31  ;;  %v3002_v31 = vld [vmem:[#allocation6 + $0x528] sm:$0xff]  ;;  %v3004_v32 = vld [vmem:[#allocation6 + $0x538] sm:$0xff] }
 0x8a4   : > { %4253 = vmatpush1.bf16.msra.mxu1 %v4252_v38  ;;  %v2966_v38 = vld [vmem:[#allocation6 + $0x408] sm:$0xff] }
 0x8a5   : > { %4255 = vmatprep.subr.bf16.mxu1 %v4254_v41  ;;  %v2968_v41 = vld [vmem:[#allocation6 + $0x418] sm:$0xff] }
 0x8a6   : > { %v4294_v40 = vpack.c.bf16 %v2968_v41, %v2966_v38  ;;  %v3006_v38 = vld [vmem:[#allocation6 + $0x548] sm:$0xff]  ;;  %v3008_v41 = vld [vmem:[#allocation6 + $0x558] sm:$0xff] }
 0x8a8   : > { %4257 = vmatpush1.bf16.msra.mxu1 %v4256_v44  ;;  %v2970_v44 = vld [vmem:[#allocation6 + $0x428] sm:$0xff] }
 0x8a9   : > { %4259 = vmatprep.subr.bf16.mxu1 %v4258_v45  ;;  %v2972_v45 = vld [vmem:[#allocation6 + $0x438] sm:$0xff] }
 0x8aa   : > { %v4298_v47 = vpack.c.bf16 %v2972_v45, %v2970_v44  ;;  %v3010_v44 = vld [vmem:[#allocation6 + $0x568] sm:$0xff]  ;;  %v3012_v45 = vld [vmem:[#allocation6 + $0x578] sm:$0xff] }
 0x8ac   : > { %4261 = vmatpush1.bf16.msra.mxu1 %v4260_v50  ;;  %v2974_v50 = vld [vmem:[#allocation6 + $0x448] sm:$0xff] }
 0x8ad   : > { %4263 = vmatprep.subr.bf16.mxu1 %v4262_v51  ;;  %v2976_v51 = vld [vmem:[#allocation6 + $0x458] sm:$0xff] }
 0x8ae   : > { %v4302_v53 = vpack.c.bf16 %v2976_v51, %v2974_v50  ;;  %v3014_v50 = vld [vmem:[#allocation6 + $0x588] sm:$0xff]  ;;  %v3016_v51 = vld [vmem:[#allocation6 + $0x598] sm:$0xff] }
 0x8b0   : > { %4265 = vmatpush1.bf16.msra.mxu1 %v4264_v56  ;;  %v2978_v56 = vld [vmem:[#allocation6 + $0x468] sm:$0xff] }
 0x8b1   : > { %4267 = vmatprep.subr.bf16.mxu1 %v4266_v58  ;;  %v2980_v58 = vld [vmem:[#allocation6 + $0x478] sm:$0xff] }
 0x8b2   : > { %v4306_v61 = vpack.c.bf16 %v2980_v58, %v2978_v56  ;;  %v3018_v56 = vld [vmem:[#allocation6 + $0x5a8] sm:$0xff]  ;;  %v3020_v58 = vld [vmem:[#allocation6 + $0x5b8] sm:$0xff] }
 0x8b4   : > { %4269 = vmatpush1.bf16.msra.mxu1 %v4268_v15  ;;  %v2982_v15 = vld [vmem:[#allocation6 + $0x488] sm:$0xff] }
 0x8b5   : > { %4271 = vmatprep.subr.bf16.mxu1 %v4270_v6  ;;  %v2984_v6 = vld [vmem:[#allocation6 + $0x498] sm:$0xff] }
 0x8b6   : > { %v4310_v8 = vpack.c.bf16 %v2984_v6, %v2982_v15  ;;  %v3022_v15 = vld [vmem:[#allocation6 + $0x5c8] sm:$0xff]  ;;  %v3024_v6 = vld [vmem:[#allocation6 + $0x5d8] sm:$0xff] }
 0x8b8   : > { %4273 = vmatpush1.bf16.msra.mxu1 %v4272_v2 }
 0x8b9   : > { %4275 = vmatprep.subr.bf16.mxu1 %v4274_v4  ;;  %v4314_v4 = vpack.c.bf16 %v2988_v9, %v2986_v1  ;;  %v3026_v1 = vld [vmem:[#allocation6 + $0x5e8] sm:$0xff]  ;;  %v3028_v9 = vld [vmem:[#allocation6 + $0x5f8] sm:$0xff] }
 0x8bc   : > { %4277 = vmatpush1.bf16.msra.mxu1 %v4276_v16  ;;  %v4316_v16 = vpack.c.bf16 %v2987_v11, %v2985_v10  ;;  %v3025_v10 = vld [vmem:[#allocation6 + $0x5e0] sm:$0xff]  ;;  %v3027_v11 = vld [vmem:[#allocation6 + $0x5f0] sm:$0xff] }
 0x8bd   : > { %4279 = vmatprep.subr.bf16.mxu1 %v4278_v17  ;;  %v4318_v17 = vpack.c.bf16 %v2992_v57, %v2990_v13  ;;  %v4356_v13 = vpack.c.bf16 %v3027_v11, %v3025_v10  ;;  %v3210_v57 = vld [vmem:[#allocation7 + $0x1d0] sm:$0xff] }
 0x8c0   : > { %4281 = vmatpush1.bf16.msra.mxu1 %v4280_v21  ;;  %v4320_v21 = vpack.c.bf16 %v2991_v5, %v2989_v18  ;;  %v3194_v18 = vld [vmem:[#allocation7 + $0x150] sm:$0xff]  ;;  %v3195_v5 = vld [vmem:[#allocation7 + $0x158] sm:$0xff] }
 0x8c1   : > { %4283 = vmatprep.subr.bf16.mxu1 %v4282_v14  ;;  %v4322_v14 = vpack.c.bf16 %v2996_v20, %v2994_v19  ;;  %v4380_v19 = vpack.c.bf16 %v3195_v5, %v3194_v18  ;;  %v3212_v20 = vld [vmem:[#allocation7 + $0x1e0] sm:$0xff] }
 0x8c4   : > { %4285 = vmatpush1.bf16.msra.mxu1 %v4284_v25  ;;  %v4324_v25 = vpack.c.bf16 %v2995_v22, %v2993_v12  ;;  %v3196_v12 = vld [vmem:[#allocation7 + $0x160] sm:$0xff]  ;;  %v3197_v22 = vld [vmem:[#allocation7 + $0x168] sm:$0xff] }
 0x8c5   : > { %4287 = vmatprep.subr.bf16.mxu1 %v4286_v27  ;;  %v4326_v27 = vpack.c.bf16 %v3000_v24, %v2998_v23  ;;  %v4384_v23 = vpack.c.bf16 %v3197_v22, %v3196_v12  ;;  %v3214_v24 = vld [vmem:[#allocation7 + $0x1f0] sm:$0xff] }
 0x8c8   : > { %4289 = vmatpush1.bf16.msra.mxu1 %v4288_v34  ;;  %v4328_v34 = vpack.c.bf16 %v2999_v30, %v2997_v29  ;;  %v3199_v29 = vld [vmem:[#allocation7 + $0x178] sm:$0xff] }
 0x8c9   : > { %4291 = vmatprep.subr.bf16.mxu1 %v4290_v35  ;;  %v4330_v35 = vpack.c.bf16 %v3004_v32, %v3002_v31  ;;  %v3168_v31 = vld [vmem:[#allocation7 + $0x80] sm:$0xff]  ;;  %v3169_v32 = vld [vmem:[#allocation7 + $0x88] sm:$0xff] }
 0x8cc   : > { %4293 = vmatpush1.bf16.msra.mxu1 %v4292_v39  ;;  %v4332_v39 = vpack.c.bf16 %v3003_v36, %v3001_v0 }
 0x8cd   : > { %4295 = vmatprep.subr.bf16.mxu1 %v4294_v40  ;;  %v4334_v40 = vpack.c.bf16 %v3008_v41, %v3006_v38  ;;  %v3525_v38 = vld [vmem:[%s5368_s8 + $0x1] ss:$4 sm:$0x3] }
 0x8cf   : > { %2886 = vmatmul.mubr.f32.vlgmr.msra.gmra.mrb[10].mxu1 %v5318_v26  ;;  %v4308_v26 = vpack.c.bf16 %v2979_v63, %v2977_v62  ;;  %v3017_v62 = vld [vmem:[#allocation6 + $0x5a0] sm:$0xff]  ;;  %v3019_v63 = vld [vmem:[#allocation6 + $0x5b0] sm:$0xff] }
 0x8d0   : > { %4297 = vmatpush1.bf16.msra.mxu1 %v4296_v46  ;;  %3093 = vmatprep.mubr.f32.mxu1 %v5322_v28  ;;  %v2983_v28 = vld [vmem:[#allocation6 + $0x490] sm:$0xff]  ;;  %v4336_v46 = vpack.c.bf16 %v3007_v43, %v3005_v42  ;;  %v3128_v43 = vrot.slane %v3525_v38, %v5219_v59 }
 0x8d1   : > { %4299 = vmatprep.subr.bf16.mxu1 %v4298_v47  ;;  %v4312_v2 = vpack.c.bf16 %v2983_v28, %v2981_v7  ;;  %v4338_v47 = vpack.c.bf16 %v3012_v45, %v3010_v44  ;;  %v3021_v7 = vld [vmem:[#allocation6 + $0x5c0] sm:$0xff]  ;;  %v3023_v28 = vld [vmem:[#allocation6 + $0x5d0] sm:$0xff] }
 0x8d4   : > { %4301 = vmatpush1.bf16.msra.mxu1 %v4300_v52  ;;  %v4340_v52 = vpack.c.bf16 %v3011_v49, %v3009_v48 }
 0x8d5   : > { %4303 = vmatprep.subr.bf16.mxu1 %v4302_v53  ;;  %v4342_v53 = vpack.c.bf16 %v3016_v51, %v3014_v50 }
 0x8d8   : > { %4305 = vmatpush1.bf16.msra.mxu1 %v4304_v37  ;;  %v4344_v37 = vpack.c.bf16 %v3015_v55, %v3013_v54  ;;  %v3152_v55 = vld [vmem:[#allocation7] sm:$0xff] }
 0x8d9   : > { %4307 = vmatprep.subr.bf16.mxu1 %v4306_v61  ;;  %v4346_v61 = vpack.c.bf16 %v3020_v58, %v3018_v56  ;;  %v3153_v56 = vld [vmem:[#allocation7 + $0x8] sm:$0xff] }
 0x8dc   : > { %4309 = vmatpush1.bf16.msra.mxu1 %v4308_v26  ;;  %v4348_v26 = vpack.c.bf16 %v3019_v63, %v3017_v62  ;;  %v4392_v63 = vpack.c.bf16 %v3153_v56, %v3152_v55 }
 0x8dd   : > { %4311 = vmatprep.subr.bf16.mxu1 %v4310_v8  ;;  %v4350_v8 = vpack.c.bf16 %v3024_v6, %v3022_v15  ;;  %v3154_v6 = vld [vmem:[#allocation7 + $0x10] sm:$0xff] }
 0x8e0   : > { %4313 = vmatpush1.bf16.msra.mxu1 %v4312_v2  ;;  %v4352_v2 = vpack.c.bf16 %v3023_v28, %v3021_v7 }
 0x8e1   : > { %4315 = vmatprep.subr.bf16.mxu1 %v4314_v4  ;;  %v4354_v4 = vpack.c.bf16 %v3028_v9, %v3026_v1  ;;  %v3156_v1 = vld [vmem:[#allocation7 + $0x20] sm:$0xff]  ;;  %v3157_v9 = vld [vmem:[#allocation7 + $0x28] sm:$0xff] }
 0x8e2   : > { %v4400_v10 = vpack.c.bf16 %v3157_v9, %v3156_v1 }
 0x8e4   : > { %4317 = vmatpush1.bf16.msra.mxu1 %v4316_v16  ;;  %v3211_v16 = vld [vmem:[#allocation7 + $0x1d8] sm:$0xff] }
 0x8e5   : > { %4319 = vmatprep.subr.bf16.mxu1 %v4318_v17  ;;  %v4378_v17 = vpack.c.bf16 %v3211_v16, %v3210_v57  ;;  %v3159_v57 = vld [vmem:[#allocation7 + $0x38] sm:$0xff]  ;;  %v3176_v16 = vld [vmem:[#allocation7 + $0xc0] sm:$0xff] }
 0x8e7   : > { %4379 = vmatprep.subr.bf16.mxu0 %v4378_v17  ;;  %v3177_v17 = vld [vmem:[#allocation7 + $0xc8] sm:$0xff] }
 0x8e8   : > { %4321 = vmatpush1.bf16.msra.mxu1 %v4320_v21  ;;  %4381 = vmatpush3.bf16.msra.mxu0 %v4380_v19  ;;  %v3213_v21 = vld [vmem:[#allocation7 + $0x1e8] sm:$0xff]  ;;  %v4406_v5 = vpack.c.bf16 %v3177_v17, %v3176_v16  ;;  %v3160_v19 = vld [vmem:[#allocation7 + $0x40] sm:$0xff] }
 0x8e9   : > { %4323 = vmatprep.subr.bf16.mxu1 %v4322_v14  ;;  %v4382_v14 = vpack.c.bf16 %v3213_v21, %v3212_v20  ;;  %v3161_v20 = vld [vmem:[#allocation7 + $0x48] sm:$0xff]  ;;  %v3178_v21 = vld [vmem:[#allocation7 + $0xd0] sm:$0xff] }
 0x8ea   : > { %v4408_v12 = vpack.c.bf16 %v3161_v20, %v3160_v19 }
 0x8eb   : > { %4383 = vmatprep.subr.bf16.mxu0 %v4382_v14  ;;  %v3179_v14 = vld [vmem:[#allocation7 + $0xd8] sm:$0xff] }
 0x8ec   : > { %4325 = vmatpush1.bf16.msra.mxu1 %v4324_v25  ;;  %4385 = vmatpush3.bf16.msra.mxu0 %v4384_v23  ;;  %v3215_v25 = vld [vmem:[#allocation7 + $0x1f8] sm:$0xff]  ;;  %v4410_v22 = vpack.c.bf16 %v3179_v14, %v3178_v21  ;;  %v3162_v23 = vld [vmem:[#allocation7 + $0x50] sm:$0xff] }
 0x8ed   : > { %4327 = vmatprep.subr.bf16.mxu1 %v4326_v27  ;;  %v4386_v27 = vpack.c.bf16 %v3215_v25, %v3214_v24  ;;  %v3163_v24 = vld [vmem:[#allocation7 + $0x58] sm:$0xff]  ;;  %v3180_v25 = vld [vmem:[#allocation7 + $0xe0] sm:$0xff] }
 0x8ef   : > { %4387 = vmatprep.subr.bf16.mxu0 %v4386_v27  ;;  %v3181_v27 = vld [vmem:[#allocation7 + $0xe8] sm:$0xff] }
 0x8f0   : > { %4329 = vmatpush1.bf16.msra.mxu1 %v4328_v34  ;;  %v4390_v34 = vpack.c.bf16 %v3169_v32, %v3168_v31  ;;  %v3165_v31 = vld [vmem:[#allocation7 + $0x68] sm:$0xff]  ;;  %v3182_v32 = vld [vmem:[#allocation7 + $0xf0] sm:$0xff] }
 0x8f1   : > { %4331 = vmatprep.subr.bf16.mxu1 %v4330_v35  ;;  %v3102_v35 = vld [vmem:[%s5368_s8] ss:$4 sm:$0x3] }
 0x8f2   : > { %v3107_v0 = vrot.slane %v3102_v35, %v5219_v59  ;;  %v3111_v36 = vrot.slane %v3102_v35, %v5222_v60 }
 0x8f4   : > { %4333 = vmatpush1.bf16.msra.mxu1 %v4332_v39 }
 0x8f5   : > { %4335 = vmatprep.subr.bf16.mxu1 %v4334_v40  ;;  %v3526_v40 = vld [vmem:[%s5368_s8 + $0x2] ss:$4 sm:$0x3] }
 0x8f6   : > { %v3147_v50 = vrot.slane %v3526_v40, %v5222_v60 }
 0x8f8   : > { %4337 = vmatpush1.bf16.msra.mxu1 %v4336_v46  ;;  %v3132_v46 = vrot.slane %v3525_v38, %v5222_v60  ;;  %v3173_v60 = vld [vmem:[#allocation7 + $0xa8] sm:$0xff]  ;;  %v3167_v38 = vld [vmem:[#allocation7 + $0x78] sm:$0xff] }
 0x8f9   : > { %4339 = vmatprep.subr.bf16.mxu1 %v4338_v47  ;;  %v3143_v47 = vrot.slane %v3526_v40, %v5219_v59 }
 0x8fc   : > { %4341 = vmatpush1.bf16.msra.mxu1 %v4340_v52 }
 0x8fd   : > { %4343 = vmatprep.subr.bf16.mxu1 %v4342_v53 }
 0x900   : > { %4345 = vmatpush1.bf16.msra.mxu1 %v4344_v37  ;;  %v3170_v37 = vld [vmem:[#allocation7 + $0x90] sm:$0xff] }
 0x901   : > { %4347 = vmatprep.subr.bf16.mxu1 %v4346_v61  ;;  %v3171_v61 = vld [vmem:[#allocation7 + $0x98] sm:$0xff] }
 0x902   : > { %v4394_v59 = vpack.c.bf16 %v3171_v61, %v3170_v37 }
 0x904   : > { %4349 = vmatpush1.bf16.msra.mxu1 %v4348_v26  ;;  %v3155_v26 = vld [vmem:[#allocation7 + $0x18] sm:$0xff] }
 0x905   : > { %4351 = vmatprep.subr.bf16.mxu1 %v4350_v8  ;;  %v3172_v8 = vld [vmem:[#allocation7 + $0xa0] sm:$0xff]  ;;  %v4396_v7 = vpack.c.bf16 %v3155_v26, %v3154_v6 }
 0x906   : > { %v4398_v28 = vpack.c.bf16 %v3173_v60, %v3172_v8 }
 0x908   : > { %4353 = vmatpush1.bf16.msra.mxu1 %v4352_v2  ;;  %v3174_v2 = vld [vmem:[#allocation7 + $0xb0] sm:$0xff] }
 0x909   : > { %4355 = vmatprep.subr.bf16.mxu1 %v4354_v4  ;;  %v3175_v4 = vld [vmem:[#allocation7 + $0xb8] sm:$0xff] }
 0x90a   : > { %v4402_v11 = vpack.c.bf16 %v3175_v4, %v3174_v2 }
 0x90c   : > { %4357 = vmatpush1.bf16.msra.mxu1 %v4356_v13  ;;  %v3158_v13 = vld [vmem:[#allocation7 + $0x30] sm:$0xff] }
 0x90d   : > { %v4404_v18 = vpack.c.bf16 %v3159_v57, %v3158_v13 }
 0x90f   : > { %3094 = vmatmul.mubr.f32.vlgmr.msra.gmra.mrb[10].mxu1 %v5320_v33  ;;  %v3198_v33 = vld [vmem:[#allocation7 + $0x170] sm:$0xff] }
 0x910   : > { %v4388_v30 = vpack.c.bf16 %v3199_v29, %v3198_v33  ;;  %v4412_v33 = vpack.c.bf16 %v3163_v24, %v3162_v23  ;;  %v4414_v29 = vpack.c.bf16 %v3181_v27, %v3180_v25 }
 0x912   : > { %4389 = vmatpush3.bf16.msra.mxu0 %v4388_v30  ;;  %v3164_v30 = vld [vmem:[#allocation7 + $0x60] sm:$0xff] }
 0x913   : > { %4391 = vmatprep.subr.bf16.mxu0 %v4390_v34  ;;  %v3183_v34 = vld [vmem:[#allocation7 + $0xf8] sm:$0xff]  ;;  %v4416_v35 = vpack.c.bf16 %v3165_v31, %v3164_v30 }
 0x9e2   : > { %v3095_v41 = vpop.f32.mrb[10].mxu1 }
 0x9e3   : > { %v3114_v39 = vadd.f32 %v3107_v0, %v3095_v41  ;;  %v3097_v42 = vpop.f32.mrb[11].mxu1  ;;  %v4418_v0 = vpack.c.bf16 %v3183_v34, %v3182_v32 }
 0x9e4   : > { %v3115_v44 = vadd.f32 %v3111_v36, %v3097_v42  ;;  %v3166_v36 = vld [vmem:[#allocation7 + $0x70] sm:$0xff] }
 0x9e5   : > { %vm3116_vm3 = vcmp.ge.f32.partialorder %v3114_v39, 0.0  ;;  %v3118_v45 = vmul.f32 0.2, %v3114_v39  ;;  %v4420_v41 = vpack.c.bf16 %v3167_v38, %v3166_v36 }
 0x9e6   : > { %vm3117_vm4 = vcmp.ge.f32.partialorder %v3115_v44, 0.0  ;;  %v3119_v48 = vmul.f32 0.2, %v3115_v44 }
 0x9e7   : > { %v3120_v49 = vsel %vm3116_vm3, %v3114_v39, %v3118_v45 }
 0x9e8   : > { %v3135_v51 = vmul.f32 %v3128_v43, %v3120_v49  ;;  %v3121_v52 = vsel %vm3117_vm4, %v3115_v44, %v3119_v48 }
 0x9e9   : > { %v3136_v53 = vmul.f32 %v3132_v46, %v3121_v52  ;;  %v3362_v46 = vld [vmem:[%s5370_s10] sm:$0x1] }
 0x9ea   : > { %v5342_v54 = vadd.f32 %v3143_v47, %v3135_v51 }
 0x9eb   : > { %v3151_v58 = vadd.f32 %v3147_v50, %v3136_v53 }
 0x9ec   : > { %v3218_v15 = vrot.slane %v5342_v54, 1 }
 0x9ed   : > { %v3219_v62 = vrot.slane %v3151_v58, 1 }
 0x9ef   : > { %3286 = vmatprep.mubr.f32.mxu0 %v3219_v62 }
 0x9f0   : > { %3287 = vmatmul.mubr.f32.vlgmr.msra.gmra.mrb[22].mxu0 %v3218_v15 }
 0x9f1   : > { %4393 = vmatpush3.bf16.msra.mxu0 %v4392_v63  ;;  %3356 = vmatprep.mubr.f32.mxu0 %v3151_v58 }
 0x9f2   : > { %4395 = vmatprep.subr.bf16.mxu0 %v4394_v59 }
 0x9f5   : > { %4397 = vmatpush3.bf16.msra.mxu0 %v4396_v7 }
 0x9f6   : > { %4399 = vmatprep.subr.bf16.mxu0 %v4398_v28 }
 0x9f9   : > { %4401 = vmatpush3.bf16.msra.mxu0 %v4400_v10 }
 0x9fa   : > { %4403 = vmatprep.subr.bf16.mxu0 %v4402_v11 }
 0x9fd   : > { %4405 = vmatpush3.bf16.msra.mxu0 %v4404_v18 }
 0x9fe   : > { %4407 = vmatprep.subr.bf16.mxu0 %v4406_v5 }
 0xa01   : > { %4409 = vmatpush3.bf16.msra.mxu0 %v4408_v12 }
 0xa02   : > { %4411 = vmatprep.subr.bf16.mxu0 %v4410_v22 }
 0xa05   : > { %4413 = vmatpush3.bf16.msra.mxu0 %v4412_v33 }
 0xa06   : > { %4415 = vmatprep.subr.bf16.mxu0 %v4414_v29 }
 0xa09   : > { %4417 = vmatpush3.bf16.msra.mxu0 %v4416_v35 }
 0xa0a   : > { %4419 = vmatprep.subr.bf16.mxu0 %v4418_v0 }
 0xa0d   : > { %4421 = vmatpush3.bf16.msra.mxu0 %v4420_v41 }
 0xa10   : > { %3357 = vmatmul.mubr.f32.vlgmr.msra.gmra.mrb[24].mxu0 %v5342_v54 }
 0xac3   : > { %v3579_v39 = vpop.f32.mrb[22].mxu0 }
 0xac4   : > { %v3580_v40 = vpop.f32.mrb[23].mxu0 }
 0xac5   : > { %v3581_v42 = vadd.f32 %v3580_v40, %v3579_v39 }
 0xae3   : > { %v3614_v43 = vpop.f32.mrb[24].mxu0 }
 0xae4   : > { %v3615_v44 = vpop.f32.mrb[25].mxu0 }
 0xae5   : > { %v3616_v45 = vadd.f32 %v3615_v44, %v3614_v43 }
 0xae7   : > { %v3359_v47 = vadd.f32 %v3616_v45, %v3581_v42 }
 0xae9   : > { %v3363_v48 = vadd.f32 %v3362_v46, %v3359_v47 }
 0xaeb   : > { %v3367_v49 = vsel %vm3366_vm7, %v3363_v48, -inf  ;;  %v3380_v58 = vsub.f32 0.0, %v3363_v48 }
 0xaec   : > { %v3369_v50 = vsel %vm3368_vm8, %v3367_v49, -inf }
 0xaed   : > { %3370 = vmax.xlane.f32.xlu0 %v3369_v50  ;;  %v3381_v37 = vmul.f32 1.442695, %v3380_v58 }
 0xb7a   : > { %v3371_v51 = vpop.xlane.xlu0 %3370 }
 0xb7b   : > { %v3372_v52 = vsub.f32 %v3363_v48, %v3371_v51 }
 0xb7d   : > { %v3373_v53 = vmul.f32 1.442695, %v3372_v52 }
 0xb7f   : > { %4496 = vpow2.f32 %v3373_v53 }
 0xb80   : > { %4498 = vpow2.f32 %v3381_v37 }
 0xb89   : > { %v4497_v54 = vpop.eup %4496 }
 0xb8a   : > { %v3375_v55 = vsel %vm3366_vm7, %v4497_v54, 0.0  ;;  %v4499_v61 = vpop.eup %4498 }
 0xb8b   : > { %v3376_v56 = vsel %vm3368_vm8, %v3375_v55, 0.0  ;;  %v3383_v62 = vadd.f32 1.0, %v4499_v61 }
 0xb8c   : > { %3377 = vadd.xlane.f32.xlu0 %v3376_v56 }
 0xc19   : > { %v3378_v63 = vpop.xlane.xlu0 %3377 }
 0xc1a   : > { %4500 = vrcp.f32 %v3378_v63 }
 0xc1b   : > { %4502 = vrcp.f32 %v3383_v62 }
 0xc24   : > { %v4501_v15 = vpop.eup %4500 }
 0xc25   : > { %v3386_v59 = vmul.f32 %v4501_v15, %v3375_v55  ;;  %v4503_v6 = vpop.eup %4502 }
 0xc27   : > { %v3387_v26 = vsel %vm3385_vm9, %v4503_v6, %v3386_v59 }
 0xc28   : > { %3388 = vst [vmem:[%s443_s13] sm:$0x1] %v3387_v26 }
 0xc29 PF: > { %s5386_s14 = sld [smem:[#allocation12_spill]] }
 0xc2f   : > { %s24_s17 = sadd.s32 1, %s5386_s14  }
 0xc30   : > { %p21_p8 = scmp.ge.s32.totalorder %s24_s17, 4  }
 0xc32   :  { %23 = sbr.rel (!%p21_p8) target bundleno = 3 (0x3), region = 119 }
 0xc39   :  { %3406 = vsyncpa [#allocation3], 1 }
 0xc3a   :  { %3408 = vsyncpa [#allocation3 + $0x1], 1 }
 0xc3b   :  { %3409 = vsyncpa [#allocation5], 1 }
 0xc3c   :  { %3410 = vsyncpa [#allocation8], 1 }

</bundles_post_ra>
